<compile_context>
chip_gen: v6e
topology: v6e:2x2x1
jax: 0.10.0
libtpu: 0.0.40
codegen_flags: <defaults>
</compile_context>

<pallas_src>
import functools

import numpy as np
import jax
import jax.numpy as jnp
from jax.experimental import pallas as pl
from jax.experimental.pallas import tpu as pltpu


_EPS = 1e-5          # nn.BatchNorm2d default eps
_BIAS_ROWS = 8       # rhs rows [0:8] hold 1.0; weight column 0 carries the conv bias


def _rup8(n):
    return ((n + 7) // 8) * 8


def _rup(n, m):
    return ((n + m - 1) // m) * m


# -----------------------------------------------------------------------------
# Static helpers (host side, trace-time constants)
# -----------------------------------------------------------------------------
def _build_tap_masks(H, W, dilation, imgs_per_step):
    """Border-validity masks (tiled per image over the lane axis) + flat lane offsets."""
    S = H * W
    r = np.arange(S) // W
    c = np.arange(S) % W
    masks = np.zeros((9, S), np.float32)
    offsets = []
    for ky in range(3):
        for kx in range(3):
            dy = (ky - 1) * dilation
            dx = (kx - 1) * dilation
            valid = (r + dy >= 0) & (r + dy < H) & (c + dx >= 0) & (c + dx < W)
            masks[ky * 3 + kx] = valid.astype(np.float32)
            offsets.append(dy * W + dx)
    masks = np.tile(masks, (1, imgs_per_step))   # same mask for every image in the step
    return jnp.asarray(masks), tuple(offsets)


def _fold_bn(p):
    """(w, b, gamma, beta, mean, var) -> (w, b, scale, shift) for eval-mode BN."""
    w, b, gamma, beta, mean, var = p
    scale = gamma / jnp.sqrt(var + _EPS)
    shift = beta - mean * scale
    return w, b, scale, shift


def _pack_params(params, in_channel, out_channel):
    """Build one lane-aligned weight slab + one BN slab for the 4 fused layers.

    Returns (w_slab, bn_slab, meta) where meta[l] = (cin_total, cout_total, col_off)
    are static Python ints describing layer l's slice of the weight slab.
    """
    C = in_channel
    C1p, C2p, C4p = _rup8(C), _rup8(2 * C), _rup8(4 * C)
    Cop = _rup8(out_channel)

    seg1, seg2 = _fold_bn(params["seg_conv1"]), _fold_bn(params["seg_conv2"])
    edge1, edge2 = _fold_bn(params["edge_conv1"]), _fold_bn(params["edge_conv2"])
    mrg1, mrg2 = _fold_bn(params["merge_conv1"]), _fold_bn(params["merge_conv2"])
    wm = mrg1[0]

    # Each entry: (cin_total, cout_total,
    #              [(w_hwio, bias|None, in_row_off, out_row_off)],
    #              [(bn_scale, bn_shift, out_row_off)])
    layer_defs = [
        # L0: seg_conv1 (+) edge_conv1 — block-diagonal over the stacked [seg ; edge] input
        (2 * C1p, 2 * C2p,
         [(seg1[0], seg1[1], 0, 0), (edge1[0], edge1[1], C1p, C2p)],
         [(seg1[2], seg1[3], 0), (edge1[2], edge1[3], C2p)]),
        # L1: seg_conv2 (+) edge_conv2
        (2 * C2p, 2 * C4p,
         [(seg2[0], seg2[1], 0, 0), (edge2[0], edge2[1], C2p, C4p)],
         [(seg2[2], seg2[3], 0), (edge2[2], edge2[3], C4p)]),
        # L2: merge_conv1 — torch.cat([seg_2, edge_2], dim=1) is exactly the stacked,
        #     8-padded output of L1, so the weight's input channels [0:4C]/[4C:8C]
        #     land at stacked row offsets 0 / C4p.
        (2 * C4p, C4p,
         [(wm[:, :, :4 * C, :], mrg1[1], 0, 0), (wm[:, :, 4 * C:, :], None, C4p, 0)],
         [(mrg1[2], mrg1[3], 0)]),
        # L3: merge_conv2
        (C4p, Cop,
         [(mrg2[0], mrg2[1], 0, 0)],
         [(mrg2[2], mrg2[3], 0)]),
    ]

    built = []
    for cin_t, cout_t, wblocks, bnblocks in layer_defs:
        K = _BIAS_ROWS + 9 * cin_t
        Wl = jnp.zeros((cout_t, K), jnp.float32)
        for w, b, in_off, out_off in wblocks:
            ci, co = w.shape[2], w.shape[3]
            if b is not None:
                Wl = Wl.at[out_off:out_off + co, 0].set(b.astype(jnp.float32))
            wt = jnp.transpose(w, (3, 0, 1, 2)).astype(jnp.float32)   # (co, ky, kx, ci)
            for k in range(9):
                ky, kx = divmod(k, 3)
                col = _BIAS_ROWS + k * cin_t + in_off
                Wl = Wl.at[out_off:out_off + co, col:col + ci].set(wt[:, ky, kx, :])
        sc = jnp.zeros((cout_t,), jnp.float32)
        sh = jnp.zeros((cout_t,), jnp.float32)
        for s, h, out_off in bnblocks:
            co = s.shape[0]
            sc = sc.at[out_off:out_off + co].set(s.astype(jnp.float32))
            sh = sh.at[out_off:out_off + co].set(h.astype(jnp.float32))
        built.append((cin_t, cout_t, Wl, sc, sh))

    max_rows = max(c for _, c, _, _, _ in built)
    col, col_offs = 0, []
    for cin_t, cout_t, Wl, _, _ in built:
        col_offs.append(col)
        col = _rup(col + Wl.shape[1], 128)      # 128-aligned lane offset per layer

    w_slab = jnp.zeros((max_rows, col), jnp.float32)
    bn_slab = jnp.zeros((max_rows, 8), jnp.float32)   # layer l: cols (2l, 2l+1) = (scale, shift)
    meta = []
    for l, ((cin_t, cout_t, Wl, sc, sh), c0) in enumerate(zip(built, col_offs)):
        w_slab = w_slab.at[:cout_t, c0:c0 + Wl.shape[1]].set(Wl)
        bn_slab = bn_slab.at[:cout_t, 2 * l].set(sc)
        bn_slab = bn_slab.at[:cout_t, 2 * l + 1].set(sh)
        meta.append((cin_t, cout_t, c0))
    return w_slab, bn_slab, tuple(meta)


# -----------------------------------------------------------------------------
# Fused kernel
# -----------------------------------------------------------------------------
def _post_processing_kernel(x_ref, mask_ref, w_ref, bn_ref, out_ref, rhs_ref,
                            *, offsets, meta):
    Ls = x_ref.shape[-1]
    # Ones rows feeding the folded conv-bias column (shared by all 4 layers).
    rhs_ref[0:_BIAS_ROWS, :] = jnp.ones((_BIAS_ROWS, Ls), jnp.float32)
    masks = mask_ref[...]                                      # (9, Ls)

    def conv_relu_bn(x, layer_idx):
        cin_t, cout_t, c0 = meta[layer_idx]
        # im2col into VMEM scratch: 8-aligned tap blocks -> plain vreg stores.
        for k, off in enumerate(offsets):
            r0 = _BIAS_ROWS + k * cin_t
            if off == 0:                                       # center tap: always valid
                rhs_ref[r0:r0 + cin_t, :] = x
            else:
                shifted = jnp.roll(x, -off, axis=1)            # lane rotate
                rhs_ref[r0:r0 + cin_t, :] = shifted * masks[k:k + 1, :]
        K = _BIAS_ROWS + 9 * cin_t
        w = w_ref[0:cout_t, c0:c0 + K]                         # 128-aligned slab slice
        y = jnp.dot(w, rhs_ref[0:K, :], preferred_element_type=jnp.float32)
        y = jnp.maximum(y, 0.0)                                # conv bias folded in; ReLU
        scale = bn_ref[0:cout_t, 2 * layer_idx:2 * layer_idx + 1]
        shift = bn_ref[0:cout_t, 2 * layer_idx + 1:2 * layer_idx + 2]
        return y * scale + shift                               # eval-mode BatchNorm2d
        # Dropout2d(p=0.1) is identity at inference -> nothing to do.

    x = x_ref[...].astype(jnp.float32)        # (2*C1p, Ls): stacked [seg ; edge], 8-padded
    h = conv_relu_bn(x, 0)                    # seg_conv1 (+) edge_conv1
    h = conv_relu_bn(h, 1)                    # seg_conv2 (+) edge_conv2
    h = conv_relu_bn(h, 2)                    # merge_conv1 (concat is the layout itself)
    h = conv_relu_bn(h, 3)                    # merge_conv2
    out_ref[...] = h.astype(out_ref.dtype)


# -----------------------------------------------------------------------------
# PostProcessingModule forward
# -----------------------------------------------------------------------------
@functools.partial(jax.jit, static_argnames=("dilation", "grid_steps"))
def post_processing_forward(params, seg, edge, dilation=1, grid_steps=1):
    """seg, edge: (N, C, H, W) NCHW.  Returns (N, out_channel, H, W).

    grid_steps=1 processes the whole batch in one step (best on v5e/v6e);
    grid_steps=2 shards the batch over v7x's two TensorCores.
    """
    N, C, H, W = seg.shape
    assert edge.shape == seg.shape
    assert N % grid_steps == 0
    S = H * W
    imgs_per_step = N // grid_steps
    Ls = imgs_per_step * S

    out_channel = params["merge_conv2"][0].shape[-1]
    C1p, Cop = _rup8(C), _rup8(out_channel)

    w_slab, bn_slab, meta = _pack_params(params, C, out_channel)
    masks, offsets = _build_tap_masks(H, W, dilation, imgs_per_step)
    k_max = max(_BIAS_ROWS + 9 * m[0] for m in meta)

    # Tiny XLA prep: stack + 8-pad the two branch inputs into one channel-major
    # slab whose lane axis is (image, spatial).  Keeps every kernel store lane-dense.
    xin = jnp.zeros((N, 2 * C1p, S), jnp.float32)
    xin = xin.at[:, 0:C, :].set(seg.reshape(N, C, S).astype(jnp.float32))
    xin = xin.at[:, C1p:C1p + C, :].set(edge.reshape(N, C, S).astype(jnp.float32))
    xin = jnp.transpose(xin, (1, 0, 2)).reshape(2 * C1p, N * S)

    kernel = functools.partial(_post_processing_kernel, offsets=offsets, meta=meta)

    out_flat = pl.pallas_call(
        kernel,
        out_shape=jax.ShapeDtypeStruct((Cop, N * S), jnp.float32),
        grid=(grid_steps,),
        in_specs=[
            pl.BlockSpec((2 * C1p, Ls), lambda g: (0, g)),     # stacked seg/edge input
            pl.BlockSpec(masks.shape, lambda g: (0, 0)),       # border masks (shared)
            pl.BlockSpec(w_slab.shape, lambda g: (0, 0)),      # all conv weights + biases
            pl.BlockSpec(bn_slab.shape, lambda g: (0, 0)),     # all BN scale/shift pairs
        ],
        out_specs=pl.BlockSpec((Cop, Ls), lambda g: (0, g)),
        scratch_shapes=[pltpu.VMEM((k_max, Ls), jnp.float32)],  # shared im2col scratch
        compiler_params=pltpu.CompilerParams(
            dimension_semantics=("parallel",)),
    )(xin, masks, w_slab, bn_slab)

    out = jnp.transpose(out_flat.reshape(Cop, N, S), (1, 0, 2))[:, :out_channel, :]
    return out.reshape(N, out_channel, H, W).astype(seg.dtype)


# -----------------------------------------------------------------------------
# Deterministic parameter initialization (synthetic; no checkpoint loading)
# -----------------------------------------------------------------------------
def _init_conv_block(key, cin, cout):
    kw, kb, kg, kbt, km, kv = jax.random.split(key, 6)
    w = 0.1 * jax.random.normal(kw, (3, 3, cin, cout), jnp.float32)     # HWIO
    b = 0.05 * jax.random.normal(kb, (cout,), jnp.float32)
    gamma = 1.0 + 0.1 * jax.random.normal(kg, (cout,), jnp.float32)
    beta = 0.1 * jax.random.normal(kbt, (cout,), jnp.float32)
    mean = 0.1 * jax.random.normal(km, (cout,), jnp.float32)
    var = 0.5 + 0.2 * jax.random.uniform(kv, (cout,), jnp.float32)
    return (w, b, gamma, beta, mean, var)


def init_post_processing_params(key, in_channel, out_channel):
    keys = jax.random.split(key, 6)
    return {
        "seg_conv1":   _init_conv_block(keys[0], in_channel,     in_channel * 2),
        "seg_conv2":   _init_conv_block(keys[1], in_channel * 2, in_channel * 4),
        "edge_conv1":  _init_conv_block(keys[2], in_channel,     in_channel * 2),
        "edge_conv2":  _init_conv_block(keys[3], in_channel * 2, in_channel * 4),
        "merge_conv1": _init_conv_block(keys[4], in_channel * 8, in_channel * 4),
        "merge_conv2": _init_conv_block(keys[5], in_channel * 4, out_channel),
    }


# -----------------------------------------------------------------------------
# Pure-JAX reference (for correctness check)
# -----------------------------------------------------------------------------
def _reference_conv_block(x, p, dilation):
    w, b, gamma, beta, mean, var = p
    y = jax.lax.conv_general_dilated(
        x, w, window_strides=(1, 1),
        padding=[(dilation, dilation), (dilation, dilation)],
        rhs_dilation=(dilation, dilation),
        dimension_numbers=("NCHW", "HWIO", "NCHW"),
        precision=jax.lax.Precision.HIGHEST)
    y = jnp.maximum(y + b[None, :, None, None], 0.0)
    scale = gamma / jnp.sqrt(var + _EPS)
    shift = beta - mean * scale
    return y * scale[None, :, None, None] + shift[None, :, None, None]


def reference_forward(params, seg, edge, *, dilation=1):
    rc = lambda x, p: _reference_conv_block(x, p, dilation)
    s1 = rc(seg, params["seg_conv1"])
    s2 = rc(s1, params["seg_conv2"])
    e1 = rc(edge, params["edge_conv1"])
    e2 = rc(e1, params["edge_conv2"])
    m = jnp.concatenate([s2, e2], axis=1)
    m1 = rc(m, params["merge_conv1"])
    m2 = rc(m1, params["merge_conv2"])
    return m2


# -----------------------------------------------------------------------------
if __name__ == "__main__":
    key = jax.random.PRNGKey(0)
    in_channel, out_channel = 4, 3
    N, H, W = 2, 16, 16
    dilation = 1

    k_seg, k_edge, k_params = jax.random.split(key, 3)
    seg = jax.random.normal(k_seg, (N, in_channel, H, W), jnp.float32)
    edge = jax.random.normal(k_edge, (N, in_channel, H, W), jnp.float32)
    params = init_post_processing_params(k_params, in_channel, out_channel)

    out = post_processing_forward(params, seg, edge, dilation=dilation)
    out = jax.block_until_ready(out)
    assert out.shape == (N, out_channel, H, W), out.shape

    ref = reference_forward(params, seg, edge, dilation=dilation)
    max_err = float(jnp.max(jnp.abs(out - ref)))
    assert jnp.allclose(out, ref, atol=1e-3, rtol=1e-3), max_err

    print("KERNEL_OK")
</pallas_src>

<mosaic_0001>
module attributes {stable_mosaic.version = 11 : i64} {
  func.func @_post_processing_kernel(%arg0: i32, %arg1: memref<16x512xf32, #tpu.memory_space<vmem>>, %arg2: memref<9x512xf32, #tpu.memory_space<vmem>>, %arg3: memref<32x1152xf32, #tpu.memory_space<vmem>>, %arg4: memref<32x8xf32, #tpu.memory_space<vmem>>, %arg5: memref<8x512xf32, #tpu.memory_space<vmem>>, %arg6: memref<296x512xf32, #tpu.memory_space<vmem>>) attributes {dimension_semantics = [#tpu.dimension_semantics<parallel>], iteration_bounds = array<i64: 1>, scalar_prefetch = 0 : i64, scratch_operands = 1 : i64, tpu.core_type = #tpu.core_type<tc>, window_params = [{transform_indices = @transform_0, window_bounds = array<i64: 16, 512>}, {pipeline_mode = #tpu.pipeline_mode<synchronous>, transform_indices = @transform_1, window_bounds = array<i64: 9, 512>}, {pipeline_mode = #tpu.pipeline_mode<synchronous>, transform_indices = @transform_2, window_bounds = array<i64: 32, 1152>}, {pipeline_mode = #tpu.pipeline_mode<synchronous>, transform_indices = @transform_3, window_bounds = array<i64: 32, 8>}, {transform_indices = @transform_4, window_bounds = array<i64: 8, 512>}]} {
    %cst = arith.constant 1.000000e+00 : f32
    %0 = vector.broadcast %cst : f32 to vector<8x512xf32>
    %c0 = arith.constant 0 : index
    %c0_0 = arith.constant 0 : index
    %1 = vector.load %arg6[%c0, %c0_0] : memref<296x512xf32, #tpu.memory_space<vmem>>, vector<8x512xf32>
    tpu.vector_store %arg6[%c0, %c0_0], %0 {strides = array<i32>} : memref<296x512xf32, #tpu.memory_space<vmem>>, vector<8x512xf32>,
    %c0_1 = arith.constant 0 : index
    %c0_2 = arith.constant 0 : index
    %2 = vector.load %arg2[%c0_1, %c0_2] : memref<9x512xf32, #tpu.memory_space<vmem>>, vector<9x512xf32>
    %c0_3 = arith.constant 0 : index
    %c0_4 = arith.constant 0 : index
    %3 = vector.load %arg1[%c0_3, %c0_4] : memref<16x512xf32, #tpu.memory_space<vmem>>, vector<16x512xf32>
    %4 = vector.extract_strided_slice %3 {offsets = [0, 495], sizes = [16, 17], strides = [1, 1]} : vector<16x512xf32> to vector<16x17xf32>
    %5 = vector.extract_strided_slice %3 {offsets = [0, 0], sizes = [16, 495], strides = [1, 1]} : vector<16x512xf32> to vector<16x495xf32>
    %6 = tpu.concatenate %4, %5 in 1 : vector<16x17xf32>, vector<16x495xf32> -> vector<16x512xf32>
    %7 = vector.extract_strided_slice %2 {offsets = [0, 0], sizes = [1, 512], strides = [1, 1]} : vector<9x512xf32> to vector<1x512xf32>
    %8 = vector.broadcast %7 : vector<1x512xf32> to vector<16x512xf32>
    %9 = arith.mulf %6, %8 : vector<16x512xf32>
    %c8 = arith.constant 8 : index
    %c0_5 = arith.constant 0 : index
    %10 = vector.load %arg6[%c8, %c0_5] : memref<296x512xf32, #tpu.memory_space<vmem>>, vector<16x512xf32>
    tpu.vector_store %arg6[%c8, %c0_5], %9 {strides = array<i32>} : memref<296x512xf32, #tpu.memory_space<vmem>>, vector<16x512xf32>,
    %11 = vector.extract_strided_slice %3 {offsets = [0, 496], sizes = [16, 16], strides = [1, 1]} : vector<16x512xf32> to vector<16x16xf32>
    %12 = vector.extract_strided_slice %3 {offsets = [0, 0], sizes = [16, 496], strides = [1, 1]} : vector<16x512xf32> to vector<16x496xf32>
    %13 = tpu.concatenate %11, %12 in 1 : vector<16x16xf32>, vector<16x496xf32> -> vector<16x512xf32>
    %14 = vector.extract_strided_slice %2 {offsets = [1, 0], sizes = [1, 512], strides = [1, 1]} : vector<9x512xf32> to vector<1x512xf32>
    %15 = vector.broadcast %14 : vector<1x512xf32> to vector<16x512xf32>
    %16 = arith.mulf %13, %15 : vector<16x512xf32>
    %c24 = arith.constant 24 : index
    %c0_6 = arith.constant 0 : index
    %17 = vector.load %arg6[%c24, %c0_6] : memref<296x512xf32, #tpu.memory_space<vmem>>, vector<16x512xf32>
    tpu.vector_store %arg6[%c24, %c0_6], %16 {strides = array<i32>} : memref<296x512xf32, #tpu.memory_space<vmem>>, vector<16x512xf32>,
    %18 = vector.extract_strided_slice %3 {offsets = [0, 497], sizes = [16, 15], strides = [1, 1]} : vector<16x512xf32> to vector<16x15xf32>
    %19 = vector.extract_strided_slice %3 {offsets = [0, 0], sizes = [16, 497], strides = [1, 1]} : vector<16x512xf32> to vector<16x497xf32>
    %20 = tpu.concatenate %18, %19 in 1 : vector<16x15xf32>, vector<16x497xf32> -> vector<16x512xf32>
    %21 = vector.extract_strided_slice %2 {offsets = [2, 0], sizes = [1, 512], strides = [1, 1]} : vector<9x512xf32> to vector<1x512xf32>
    %22 = vector.broadcast %21 : vector<1x512xf32> to vector<16x512xf32>
    %23 = arith.mulf %20, %22 : vector<16x512xf32>
    %c40 = arith.constant 40 : index
    %c0_7 = arith.constant 0 : index
    %24 = vector.load %arg6[%c40, %c0_7] : memref<296x512xf32, #tpu.memory_space<vmem>>, vector<16x512xf32>
    tpu.vector_store %arg6[%c40, %c0_7], %23 {strides = array<i32>} : memref<296x512xf32, #tpu.memory_space<vmem>>, vector<16x512xf32>,
    %25 = vector.extract_strided_slice %3 {offsets = [0, 511], sizes = [16, 1], strides = [1, 1]} : vector<16x512xf32> to vector<16x1xf32>
    %26 = vector.extract_strided_slice %3 {offsets = [0, 0], sizes = [16, 511], strides = [1, 1]} : vector<16x512xf32> to vector<16x511xf32>
    %27 = tpu.concatenate %25, %26 in 1 : vector<16x1xf32>, vector<16x511xf32> -> vector<16x512xf32>
    %28 = vector.extract_strided_slice %2 {offsets = [3, 0], sizes = [1, 512], strides = [1, 1]} : vector<9x512xf32> to vector<1x512xf32>
    %29 = vector.broadcast %28 : vector<1x512xf32> to vector<16x512xf32>
    %30 = arith.mulf %27, %29 : vector<16x512xf32>
    %c56 = arith.constant 56 : index
    %c0_8 = arith.constant 0 : index
    %31 = vector.load %arg6[%c56, %c0_8] : memref<296x512xf32, #tpu.memory_space<vmem>>, vector<16x512xf32>
    tpu.vector_store %arg6[%c56, %c0_8], %30 {strides = array<i32>} : memref<296x512xf32, #tpu.memory_space<vmem>>, vector<16x512xf32>,
    %c72 = arith.constant 72 : index
    %c0_9 = arith.constant 0 : index
    %32 = vector.load %arg6[%c72, %c0_9] : memref<296x512xf32, #tpu.memory_space<vmem>>, vector<16x512xf32>
    tpu.vector_store %arg6[%c72, %c0_9], %3 {strides = array<i32>} : memref<296x512xf32, #tpu.memory_space<vmem>>, vector<16x512xf32>,
    %33 = vector.extract_strided_slice %3 {offsets = [0, 1], sizes = [16, 511], strides = [1, 1]} : vector<16x512xf32> to vector<16x511xf32>
    %34 = vector.extract_strided_slice %3 {offsets = [0, 0], sizes = [16, 1], strides = [1, 1]} : vector<16x512xf32> to vector<16x1xf32>
    %35 = tpu.concatenate %33, %34 in 1 : vector<16x511xf32>, vector<16x1xf32> -> vector<16x512xf32>
    %36 = vector.extract_strided_slice %2 {offsets = [5, 0], sizes = [1, 512], strides = [1, 1]} : vector<9x512xf32> to vector<1x512xf32>
    %37 = vector.broadcast %36 : vector<1x512xf32> to vector<16x512xf32>
    %38 = arith.mulf %35, %37 : vector<16x512xf32>
    %c88 = arith.constant 88 : index
    %c0_10 = arith.constant 0 : index
    %39 = vector.load %arg6[%c88, %c0_10] : memref<296x512xf32, #tpu.memory_space<vmem>>, vector<16x512xf32>
    tpu.vector_store %arg6[%c88, %c0_10], %38 {strides = array<i32>} : memref<296x512xf32, #tpu.memory_space<vmem>>, vector<16x512xf32>,
    %40 = vector.extract_strided_slice %3 {offsets = [0, 15], sizes = [16, 497], strides = [1, 1]} : vector<16x512xf32> to vector<16x497xf32>
    %41 = vector.extract_strided_slice %3 {offsets = [0, 0], sizes = [16, 15], strides = [1, 1]} : vector<16x512xf32> to vector<16x15xf32>
    %42 = tpu.concatenate %40, %41 in 1 : vector<16x497xf32>, vector<16x15xf32> -> vector<16x512xf32>
    %43 = vector.extract_strided_slice %2 {offsets = [6, 0], sizes = [1, 512], strides = [1, 1]} : vector<9x512xf32> to vector<1x512xf32>
    %44 = vector.broadcast %43 : vector<1x512xf32> to vector<16x512xf32>
    %45 = arith.mulf %42, %44 : vector<16x512xf32>
    %c104 = arith.constant 104 : index
    %c0_11 = arith.constant 0 : index
    %46 = vector.load %arg6[%c104, %c0_11] : memref<296x512xf32, #tpu.memory_space<vmem>>, vector<16x512xf32>
    tpu.vector_store %arg6[%c104, %c0_11], %45 {strides = array<i32>} : memref<296x512xf32, #tpu.memory_space<vmem>>, vector<16x512xf32>,
    %47 = vector.extract_strided_slice %3 {offsets = [0, 16], sizes = [16, 496], strides = [1, 1]} : vector<16x512xf32> to vector<16x496xf32>
    %48 = vector.extract_strided_slice %3 {offsets = [0, 0], sizes = [16, 16], strides = [1, 1]} : vector<16x512xf32> to vector<16x16xf32>
    %49 = tpu.concatenate %47, %48 in 1 : vector<16x496xf32>, vector<16x16xf32> -> vector<16x512xf32>
    %50 = vector.extract_strided_slice %2 {offsets = [7, 0], sizes = [1, 512], strides = [1, 1]} : vector<9x512xf32> to vector<1x512xf32>
    %51 = vector.broadcast %50 : vector<1x512xf32> to vector<16x512xf32>
    %52 = arith.mulf %49, %51 : vector<16x512xf32>
    %c120 = arith.constant 120 : index
    %c0_12 = arith.constant 0 : index
    %53 = vector.load %arg6[%c120, %c0_12] : memref<296x512xf32, #tpu.memory_space<vmem>>, vector<16x512xf32>
    tpu.vector_store %arg6[%c120, %c0_12], %52 {strides = array<i32>} : memref<296x512xf32, #tpu.memory_space<vmem>>, vector<16x512xf32>,
    %54 = vector.extract_strided_slice %3 {offsets = [0, 17], sizes = [16, 495], strides = [1, 1]} : vector<16x512xf32> to vector<16x495xf32>
    %55 = vector.extract_strided_slice %3 {offsets = [0, 0], sizes = [16, 17], strides = [1, 1]} : vector<16x512xf32> to vector<16x17xf32>
    %56 = tpu.concatenate %54, %55 in 1 : vector<16x495xf32>, vector<16x17xf32> -> vector<16x512xf32>
    %57 = vector.extract_strided_slice %2 {offsets = [8, 0], sizes = [1, 512], strides = [1, 1]} : vector<9x512xf32> to vector<1x512xf32>
    %58 = vector.broadcast %57 : vector<1x512xf32> to vector<16x512xf32>
    %59 = arith.mulf %56, %58 : vector<16x512xf32>
    %c136 = arith.constant 136 : index
    %c0_13 = arith.constant 0 : index
    %60 = vector.load %arg6[%c136, %c0_13] : memref<296x512xf32, #tpu.memory_space<vmem>>, vector<16x512xf32>
    tpu.vector_store %arg6[%c136, %c0_13], %59 {strides = array<i32>} : memref<296x512xf32, #tpu.memory_space<vmem>>, vector<16x512xf32>,
    %c0_14 = arith.constant 0 : index
    %c0_15 = arith.constant 0 : index
    %61 = vector.load %arg3[%c0_14, %c0_15] : memref<32x1152xf32, #tpu.memory_space<vmem>>, vector<16x152xf32>
    %c0_16 = arith.constant 0 : index
    %c0_17 = arith.constant 0 : index
    %62 = vector.load %arg6[%c0_16, %c0_17] : memref<296x512xf32, #tpu.memory_space<vmem>>, vector<152x512xf32>
    %cst_18 = arith.constant dense<0.000000e+00> : vector<16x512xf32>
    %63 = tpu.matmul %61, %62, %cst_18 {dimension_numbers = #tpu.dot_dimension_numbers<[1], [0], [0], [1], [0, 0, 1, 1], [], []>} : vector<16x152xf32>, vector<152x512xf32>, vector<16x512xf32> -> vector<16x512xf32>
    %cst_19 = arith.constant 0.000000e+00 : f32
    %64 = vector.broadcast %cst_19 : f32 to vector<16x512xf32>
    %65 = arith.maximumf %63, %64 : vector<16x512xf32>
    %c0_20 = arith.constant 0 : index
    %c0_21 = arith.constant 0 : index
    %66 = vector.load %arg4[%c0_20, %c0_21] : memref<32x8xf32, #tpu.memory_space<vmem>>, vector<16x1xf32>
    %c0_22 = arith.constant 0 : index
    %c1 = arith.constant 1 : index
    %67 = vector.load %arg4[%c0_22, %c1] : memref<32x8xf32, #tpu.memory_space<vmem>>, vector<16x1xf32>
    %68 = vector.broadcast %66 : vector<16x1xf32> to vector<16x512xf32>
    %69 = arith.mulf %65, %68 : vector<16x512xf32>
    %70 = vector.broadcast %67 : vector<16x1xf32> to vector<16x512xf32>
    %71 = arith.addf %69, %70 : vector<16x512xf32>
    %72 = vector.extract_strided_slice %71 {offsets = [0, 495], sizes = [16, 17], strides = [1, 1]} : vector<16x512xf32> to vector<16x17xf32>
    %73 = vector.extract_strided_slice %71 {offsets = [0, 0], sizes = [16, 495], strides = [1, 1]} : vector<16x512xf32> to vector<16x495xf32>
    %74 = tpu.concatenate %72, %73 in 1 : vector<16x17xf32>, vector<16x495xf32> -> vector<16x512xf32>
    %75 = vector.extract_strided_slice %2 {offsets = [0, 0], sizes = [1, 512], strides = [1, 1]} : vector<9x512xf32> to vector<1x512xf32>
    %76 = vector.broadcast %75 : vector<1x512xf32> to vector<16x512xf32>
    %77 = arith.mulf %74, %76 : vector<16x512xf32>
    %c8_23 = arith.constant 8 : index
    %c0_24 = arith.constant 0 : index
    %78 = vector.load %arg6[%c8_23, %c0_24] : memref<296x512xf32, #tpu.memory_space<vmem>>, vector<16x512xf32>
    tpu.vector_store %arg6[%c8_23, %c0_24], %77 {strides = array<i32>} : memref<296x512xf32, #tpu.memory_space<vmem>>, vector<16x512xf32>,
    %79 = vector.extract_strided_slice %71 {offsets = [0, 496], sizes = [16, 16], strides = [1, 1]} : vector<16x512xf32> to vector<16x16xf32>
    %80 = vector.extract_strided_slice %71 {offsets = [0, 0], sizes = [16, 496], strides = [1, 1]} : vector<16x512xf32> to vector<16x496xf32>
    %81 = tpu.concatenate %79, %80 in 1 : vector<16x16xf32>, vector<16x496xf32> -> vector<16x512xf32>
    %82 = vector.extract_strided_slice %2 {offsets = [1, 0], sizes = [1, 512], strides = [1, 1]} : vector<9x512xf32> to vector<1x512xf32>
    %83 = vector.broadcast %82 : vector<1x512xf32> to vector<16x512xf32>
    %84 = arith.mulf %81, %83 : vector<16x512xf32>
    %c24_25 = arith.constant 24 : index
    %c0_26 = arith.constant 0 : index
    %85 = vector.load %arg6[%c24_25, %c0_26] : memref<296x512xf32, #tpu.memory_space<vmem>>, vector<16x512xf32>
    tpu.vector_store %arg6[%c24_25, %c0_26], %84 {strides = array<i32>} : memref<296x512xf32, #tpu.memory_space<vmem>>, vector<16x512xf32>,
    %86 = vector.extract_strided_slice %71 {offsets = [0, 497], sizes = [16, 15], strides = [1, 1]} : vector<16x512xf32> to vector<16x15xf32>
    %87 = vector.extract_strided_slice %71 {offsets = [0, 0], sizes = [16, 497], strides = [1, 1]} : vector<16x512xf32> to vector<16x497xf32>
    %88 = tpu.concatenate %86, %87 in 1 : vector<16x15xf32>, vector<16x497xf32> -> vector<16x512xf32>
    %89 = vector.extract_strided_slice %2 {offsets = [2, 0], sizes = [1, 512], strides = [1, 1]} : vector<9x512xf32> to vector<1x512xf32>
    %90 = vector.broadcast %89 : vector<1x512xf32> to vector<16x512xf32>
    %91 = arith.mulf %88, %90 : vector<16x512xf32>
    %c40_27 = arith.constant 40 : index
    %c0_28 = arith.constant 0 : index
    %92 = vector.load %arg6[%c40_27, %c0_28] : memref<296x512xf32, #tpu.memory_space<vmem>>, vector<16x512xf32>
    tpu.vector_store %arg6[%c40_27, %c0_28], %91 {strides = array<i32>} : memref<296x512xf32, #tpu.memory_space<vmem>>, vector<16x512xf32>,
    %93 = vector.extract_strided_slice %71 {offsets = [0, 511], sizes = [16, 1], strides = [1, 1]} : vector<16x512xf32> to vector<16x1xf32>
    %94 = vector.extract_strided_slice %71 {offsets = [0, 0], sizes = [16, 511], strides = [1, 1]} : vector<16x512xf32> to vector<16x511xf32>
    %95 = tpu.concatenate %93, %94 in 1 : vector<16x1xf32>, vector<16x511xf32> -> vector<16x512xf32>
    %96 = vector.extract_strided_slice %2 {offsets = [3, 0], sizes = [1, 512], strides = [1, 1]} : vector<9x512xf32> to vector<1x512xf32>
    %97 = vector.broadcast %96 : vector<1x512xf32> to vector<16x512xf32>
    %98 = arith.mulf %95, %97 : vector<16x512xf32>
    %c56_29 = arith.constant 56 : index
    %c0_30 = arith.constant 0 : index
    %99 = vector.load %arg6[%c56_29, %c0_30] : memref<296x512xf32, #tpu.memory_space<vmem>>, vector<16x512xf32>
    tpu.vector_store %arg6[%c56_29, %c0_30], %98 {strides = array<i32>} : memref<296x512xf32, #tpu.memory_space<vmem>>, vector<16x512xf32>,
    %c72_31 = arith.constant 72 : index
    %c0_32 = arith.constant 0 : index
    %100 = vector.load %arg6[%c72_31, %c0_32] : memref<296x512xf32, #tpu.memory_space<vmem>>, vector<16x512xf32>
    tpu.vector_store %arg6[%c72_31, %c0_32], %71 {strides = array<i32>} : memref<296x512xf32, #tpu.memory_space<vmem>>, vector<16x512xf32>,
    %101 = vector.extract_strided_slice %71 {offsets = [0, 1], sizes = [16, 511], strides = [1, 1]} : vector<16x512xf32> to vector<16x511xf32>
    %102 = vector.extract_strided_slice %71 {offsets = [0, 0], sizes = [16, 1], strides = [1, 1]} : vector<16x512xf32> to vector<16x1xf32>
    %103 = tpu.concatenate %101, %102 in 1 : vector<16x511xf32>, vector<16x1xf32> -> vector<16x512xf32>
    %104 = vector.extract_strided_slice %2 {offsets = [5, 0], sizes = [1, 512], strides = [1, 1]} : vector<9x512xf32> to vector<1x512xf32>
    %105 = vector.broadcast %104 : vector<1x512xf32> to vector<16x512xf32>
    %106 = arith.mulf %103, %105 : vector<16x512xf32>
    %c88_33 = arith.constant 88 : index
    %c0_34 = arith.constant 0 : index
    %107 = vector.load %arg6[%c88_33, %c0_34] : memref<296x512xf32, #tpu.memory_space<vmem>>, vector<16x512xf32>
    tpu.vector_store %arg6[%c88_33, %c0_34], %106 {strides = array<i32>} : memref<296x512xf32, #tpu.memory_space<vmem>>, vector<16x512xf32>,
    %108 = vector.extract_strided_slice %71 {offsets = [0, 15], sizes = [16, 497], strides = [1, 1]} : vector<16x512xf32> to vector<16x497xf32>
    %109 = vector.extract_strided_slice %71 {offsets = [0, 0], sizes = [16, 15], strides = [1, 1]} : vector<16x512xf32> to vector<16x15xf32>
    %110 = tpu.concatenate %108, %109 in 1 : vector<16x497xf32>, vector<16x15xf32> -> vector<16x512xf32>
    %111 = vector.extract_strided_slice %2 {offsets = [6, 0], sizes = [1, 512], strides = [1, 1]} : vector<9x512xf32> to vector<1x512xf32>
    %112 = vector.broadcast %111 : vector<1x512xf32> to vector<16x512xf32>
    %113 = arith.mulf %110, %112 : vector<16x512xf32>
    %c104_35 = arith.constant 104 : index
    %c0_36 = arith.constant 0 : index
    %114 = vector.load %arg6[%c104_35, %c0_36] : memref<296x512xf32, #tpu.memory_space<vmem>>, vector<16x512xf32>
    tpu.vector_store %arg6[%c104_35, %c0_36], %113 {strides = array<i32>} : memref<296x512xf32, #tpu.memory_space<vmem>>, vector<16x512xf32>,
    %115 = vector.extract_strided_slice %71 {offsets = [0, 16], sizes = [16, 496], strides = [1, 1]} : vector<16x512xf32> to vector<16x496xf32>
    %116 = vector.extract_strided_slice %71 {offsets = [0, 0], sizes = [16, 16], strides = [1, 1]} : vector<16x512xf32> to vector<16x16xf32>
    %117 = tpu.concatenate %115, %116 in 1 : vector<16x496xf32>, vector<16x16xf32> -> vector<16x512xf32>
    %118 = vector.extract_strided_slice %2 {offsets = [7, 0], sizes = [1, 512], strides = [1, 1]} : vector<9x512xf32> to vector<1x512xf32>
    %119 = vector.broadcast %118 : vector<1x512xf32> to vector<16x512xf32>
    %120 = arith.mulf %117, %119 : vector<16x512xf32>
    %c120_37 = arith.constant 120 : index
    %c0_38 = arith.constant 0 : index
    %121 = vector.load %arg6[%c120_37, %c0_38] : memref<296x512xf32, #tpu.memory_space<vmem>>, vector<16x512xf32>
    tpu.vector_store %arg6[%c120_37, %c0_38], %120 {strides = array<i32>} : memref<296x512xf32, #tpu.memory_space<vmem>>, vector<16x512xf32>,
    %122 = vector.extract_strided_slice %71 {offsets = [0, 17], sizes = [16, 495], strides = [1, 1]} : vector<16x512xf32> to vector<16x495xf32>
    %123 = vector.extract_strided_slice %71 {offsets = [0, 0], sizes = [16, 17], strides = [1, 1]} : vector<16x512xf32> to vector<16x17xf32>
    %124 = tpu.concatenate %122, %123 in 1 : vector<16x495xf32>, vector<16x17xf32> -> vector<16x512xf32>
    %125 = vector.extract_strided_slice %2 {offsets = [8, 0], sizes = [1, 512], strides = [1, 1]} : vector<9x512xf32> to vector<1x512xf32>
    %126 = vector.broadcast %125 : vector<1x512xf32> to vector<16x512xf32>
    %127 = arith.mulf %124, %126 : vector<16x512xf32>
    %c136_39 = arith.constant 136 : index
    %c0_40 = arith.constant 0 : index
    %128 = vector.load %arg6[%c136_39, %c0_40] : memref<296x512xf32, #tpu.memory_space<vmem>>, vector<16x512xf32>
    tpu.vector_store %arg6[%c136_39, %c0_40], %127 {strides = array<i32>} : memref<296x512xf32, #tpu.memory_space<vmem>>, vector<16x512xf32>,
    %c0_41 = arith.constant 0 : index
    %c256 = arith.constant 256 : index
    %129 = vector.load %arg3[%c0_41, %c256] : memref<32x1152xf32, #tpu.memory_space<vmem>>, vector<32x152xf32>
    %c0_42 = arith.constant 0 : index
    %c0_43 = arith.constant 0 : index
    %130 = vector.load %arg6[%c0_42, %c0_43] : memref<296x512xf32, #tpu.memory_space<vmem>>, vector<152x512xf32>
    %cst_44 = arith.constant dense<0.000000e+00> : vector<32x512xf32>
    %131 = tpu.matmul %129, %130, %cst_44 {dimension_numbers = #tpu.dot_dimension_numbers<[1], [0], [0], [1], [0, 0, 1, 1], [], []>} : vector<32x152xf32>, vector<152x512xf32>, vector<32x512xf32> -> vector<32x512xf32>
    %cst_45 = arith.constant 0.000000e+00 : f32
    %132 = vector.broadcast %cst_45 : f32 to vector<32x512xf32>
    %133 = arith.maximumf %131, %132 : vector<32x512xf32>
    %c0_46 = arith.constant 0 : index
    %c2 = arith.constant 2 : index
    %134 = vector.load %arg4[%c0_46, %c2] : memref<32x8xf32, #tpu.memory_space<vmem>>, vector<32x1xf32>
    %c0_47 = arith.constant 0 : index
    %c3 = arith.constant 3 : index
    %135 = vector.load %arg4[%c0_47, %c3] : memref<32x8xf32, #tpu.memory_space<vmem>>, vector<32x1xf32>
    %136 = vector.broadcast %134 : vector<32x1xf32> to vector<32x512xf32>
    %137 = arith.mulf %133, %136 : vector<32x512xf32>
    %138 = vector.broadcast %135 : vector<32x1xf32> to vector<32x512xf32>
    %139 = arith.addf %137, %138 : vector<32x512xf32>
    %140 = vector.extract_strided_slice %139 {offsets = [0, 495], sizes = [32, 17], strides = [1, 1]} : vector<32x512xf32> to vector<32x17xf32>
    %141 = vector.extract_strided_slice %139 {offsets = [0, 0], sizes = [32, 495], strides = [1, 1]} : vector<32x512xf32> to vector<32x495xf32>
    %142 = tpu.concatenate %140, %141 in 1 : vector<32x17xf32>, vector<32x495xf32> -> vector<32x512xf32>
    %143 = vector.extract_strided_slice %2 {offsets = [0, 0], sizes = [1, 512], strides = [1, 1]} : vector<9x512xf32> to vector<1x512xf32>
    %144 = vector.broadcast %143 : vector<1x512xf32> to vector<32x512xf32>
    %145 = arith.mulf %142, %144 : vector<32x512xf32>
    %c8_48 = arith.constant 8 : index
    %c0_49 = arith.constant 0 : index
    %146 = vector.load %arg6[%c8_48, %c0_49] : memref<296x512xf32, #tpu.memory_space<vmem>>, vector<32x512xf32>
    tpu.vector_store %arg6[%c8_48, %c0_49], %145 {strides = array<i32>} : memref<296x512xf32, #tpu.memory_space<vmem>>, vector<32x512xf32>,
    %147 = vector.extract_strided_slice %139 {offsets = [0, 496], sizes = [32, 16], strides = [1, 1]} : vector<32x512xf32> to vector<32x16xf32>
    %148 = vector.extract_strided_slice %139 {offsets = [0, 0], sizes = [32, 496], strides = [1, 1]} : vector<32x512xf32> to vector<32x496xf32>
    %149 = tpu.concatenate %147, %148 in 1 : vector<32x16xf32>, vector<32x496xf32> -> vector<32x512xf32>
    %150 = vector.extract_strided_slice %2 {offsets = [1, 0], sizes = [1, 512], strides = [1, 1]} : vector<9x512xf32> to vector<1x512xf32>
    %151 = vector.broadcast %150 : vector<1x512xf32> to vector<32x512xf32>
    %152 = arith.mulf %149, %151 : vector<32x512xf32>
    %c40_50 = arith.constant 40 : index
    %c0_51 = arith.constant 0 : index
    %153 = vector.load %arg6[%c40_50, %c0_51] : memref<296x512xf32, #tpu.memory_space<vmem>>, vector<32x512xf32>
    tpu.vector_store %arg6[%c40_50, %c0_51], %152 {strides = array<i32>} : memref<296x512xf32, #tpu.memory_space<vmem>>, vector<32x512xf32>,
    %154 = vector.extract_strided_slice %139 {offsets = [0, 497], sizes = [32, 15], strides = [1, 1]} : vector<32x512xf32> to vector<32x15xf32>
    %155 = vector.extract_strided_slice %139 {offsets = [0, 0], sizes = [32, 497], strides = [1, 1]} : vector<32x512xf32> to vector<32x497xf32>
    %156 = tpu.concatenate %154, %155 in 1 : vector<32x15xf32>, vector<32x497xf32> -> vector<32x512xf32>
    %157 = vector.extract_strided_slice %2 {offsets = [2, 0], sizes = [1, 512], strides = [1, 1]} : vector<9x512xf32> to vector<1x512xf32>
    %158 = vector.broadcast %157 : vector<1x512xf32> to vector<32x512xf32>
    %159 = arith.mulf %156, %158 : vector<32x512xf32>
    %c72_52 = arith.constant 72 : index
    %c0_53 = arith.constant 0 : index
    %160 = vector.load %arg6[%c72_52, %c0_53] : memref<296x512xf32, #tpu.memory_space<vmem>>, vector<32x512xf32>
    tpu.vector_store %arg6[%c72_52, %c0_53], %159 {strides = array<i32>} : memref<296x512xf32, #tpu.memory_space<vmem>>, vector<32x512xf32>,
    %161 = vector.extract_strided_slice %139 {offsets = [0, 511], sizes = [32, 1], strides = [1, 1]} : vector<32x512xf32> to vector<32x1xf32>
    %162 = vector.extract_strided_slice %139 {offsets = [0, 0], sizes = [32, 511], strides = [1, 1]} : vector<32x512xf32> to vector<32x511xf32>
    %163 = tpu.concatenate %161, %162 in 1 : vector<32x1xf32>, vector<32x511xf32> -> vector<32x512xf32>
    %164 = vector.extract_strided_slice %2 {offsets = [3, 0], sizes = [1, 512], strides = [1, 1]} : vector<9x512xf32> to vector<1x512xf32>
    %165 = vector.broadcast %164 : vector<1x512xf32> to vector<32x512xf32>
    %166 = arith.mulf %163, %165 : vector<32x512xf32>
    %c104_54 = arith.constant 104 : index
    %c0_55 = arith.constant 0 : index
    %167 = vector.load %arg6[%c104_54, %c0_55] : memref<296x512xf32, #tpu.memory_space<vmem>>, vector<32x512xf32>
    tpu.vector_store %arg6[%c104_54, %c0_55], %166 {strides = array<i32>} : memref<296x512xf32, #tpu.memory_space<vmem>>, vector<32x512xf32>,
    %c136_56 = arith.constant 136 : index
    %c0_57 = arith.constant 0 : index
    %168 = vector.load %arg6[%c136_56, %c0_57] : memref<296x512xf32, #tpu.memory_space<vmem>>, vector<32x512xf32>
    tpu.vector_store %arg6[%c136_56, %c0_57], %139 {strides = array<i32>} : memref<296x512xf32, #tpu.memory_space<vmem>>, vector<32x512xf32>,
    %169 = vector.extract_strided_slice %139 {offsets = [0, 1], sizes = [32, 511], strides = [1, 1]} : vector<32x512xf32> to vector<32x511xf32>
    %170 = vector.extract_strided_slice %139 {offsets = [0, 0], sizes = [32, 1], strides = [1, 1]} : vector<32x512xf32> to vector<32x1xf32>
    %171 = tpu.concatenate %169, %170 in 1 : vector<32x511xf32>, vector<32x1xf32> -> vector<32x512xf32>
    %172 = vector.extract_strided_slice %2 {offsets = [5, 0], sizes = [1, 512], strides = [1, 1]} : vector<9x512xf32> to vector<1x512xf32>
    %173 = vector.broadcast %172 : vector<1x512xf32> to vector<32x512xf32>
    %174 = arith.mulf %171, %173 : vector<32x512xf32>
    %c168 = arith.constant 168 : index
    %c0_58 = arith.constant 0 : index
    %175 = vector.load %arg6[%c168, %c0_58] : memref<296x512xf32, #tpu.memory_space<vmem>>, vector<32x512xf32>
    tpu.vector_store %arg6[%c168, %c0_58], %174 {strides = array<i32>} : memref<296x512xf32, #tpu.memory_space<vmem>>, vector<32x512xf32>,
    %176 = vector.extract_strided_slice %139 {offsets = [0, 15], sizes = [32, 497], strides = [1, 1]} : vector<32x512xf32> to vector<32x497xf32>
    %177 = vector.extract_strided_slice %139 {offsets = [0, 0], sizes = [32, 15], strides = [1, 1]} : vector<32x512xf32> to vector<32x15xf32>
    %178 = tpu.concatenate %176, %177 in 1 : vector<32x497xf32>, vector<32x15xf32> -> vector<32x512xf32>
    %179 = vector.extract_strided_slice %2 {offsets = [6, 0], sizes = [1, 512], strides = [1, 1]} : vector<9x512xf32> to vector<1x512xf32>
    %180 = vector.broadcast %179 : vector<1x512xf32> to vector<32x512xf32>
    %181 = arith.mulf %178, %180 : vector<32x512xf32>
    %c200 = arith.constant 200 : index
    %c0_59 = arith.constant 0 : index
    %182 = vector.load %arg6[%c200, %c0_59] : memref<296x512xf32, #tpu.memory_space<vmem>>, vector<32x512xf32>
    tpu.vector_store %arg6[%c200, %c0_59], %181 {strides = array<i32>} : memref<296x512xf32, #tpu.memory_space<vmem>>, vector<32x512xf32>,
    %183 = vector.extract_strided_slice %139 {offsets = [0, 16], sizes = [32, 496], strides = [1, 1]} : vector<32x512xf32> to vector<32x496xf32>
    %184 = vector.extract_strided_slice %139 {offsets = [0, 0], sizes = [32, 16], strides = [1, 1]} : vector<32x512xf32> to vector<32x16xf32>
    %185 = tpu.concatenate %183, %184 in 1 : vector<32x496xf32>, vector<32x16xf32> -> vector<32x512xf32>
    %186 = vector.extract_strided_slice %2 {offsets = [7, 0], sizes = [1, 512], strides = [1, 1]} : vector<9x512xf32> to vector<1x512xf32>
    %187 = vector.broadcast %186 : vector<1x512xf32> to vector<32x512xf32>
    %188 = arith.mulf %185, %187 : vector<32x512xf32>
    %c232 = arith.constant 232 : index
    %c0_60 = arith.constant 0 : index
    %189 = vector.load %arg6[%c232, %c0_60] : memref<296x512xf32, #tpu.memory_space<vmem>>, vector<32x512xf32>
    tpu.vector_store %arg6[%c232, %c0_60], %188 {strides = array<i32>} : memref<296x512xf32, #tpu.memory_space<vmem>>, vector<32x512xf32>,
    %190 = vector.extract_strided_slice %139 {offsets = [0, 17], sizes = [32, 495], strides = [1, 1]} : vector<32x512xf32> to vector<32x495xf32>
    %191 = vector.extract_strided_slice %139 {offsets = [0, 0], sizes = [32, 17], strides = [1, 1]} : vector<32x512xf32> to vector<32x17xf32>
    %192 = tpu.concatenate %190, %191 in 1 : vector<32x495xf32>, vector<32x17xf32> -> vector<32x512xf32>
    %193 = vector.extract_strided_slice %2 {offsets = [8, 0], sizes = [1, 512], strides = [1, 1]} : vector<9x512xf32> to vector<1x512xf32>
    %194 = vector.broadcast %193 : vector<1x512xf32> to vector<32x512xf32>
    %195 = arith.mulf %192, %194 : vector<32x512xf32>
    %c264 = arith.constant 264 : index
    %c0_61 = arith.constant 0 : index
    %196 = vector.load %arg6[%c264, %c0_61] : memref<296x512xf32, #tpu.memory_space<vmem>>, vector<32x512xf32>
    tpu.vector_store %arg6[%c264, %c0_61], %195 {strides = array<i32>} : memref<296x512xf32, #tpu.memory_space<vmem>>, vector<32x512xf32>,
    %c0_62 = arith.constant 0 : index
    %c512 = arith.constant 512 : index
    %197 = vector.load %arg3[%c0_62, %c512] : memref<32x1152xf32, #tpu.memory_space<vmem>>, vector<16x296xf32>
    %c0_63 = arith.constant 0 : index
    %c0_64 = arith.constant 0 : index
    %198 = vector.load %arg6[%c0_63, %c0_64] : memref<296x512xf32, #tpu.memory_space<vmem>>, vector<296x512xf32>
    %cst_65 = arith.constant dense<0.000000e+00> : vector<16x512xf32>
    %199 = tpu.matmul %197, %198, %cst_65 {dimension_numbers = #tpu.dot_dimension_numbers<[1], [0], [0], [1], [0, 0, 1, 1], [], []>} : vector<16x296xf32>, vector<296x512xf32>, vector<16x512xf32> -> vector<16x512xf32>
    %cst_66 = arith.constant 0.000000e+00 : f32
    %200 = vector.broadcast %cst_66 : f32 to vector<16x512xf32>
    %201 = arith.maximumf %199, %200 : vector<16x512xf32>
    %c0_67 = arith.constant 0 : index
    %c4 = arith.constant 4 : index
    %202 = vector.load %arg4[%c0_67, %c4] : memref<32x8xf32, #tpu.memory_space<vmem>>, vector<16x1xf32>
    %c0_68 = arith.constant 0 : index
    %c5 = arith.constant 5 : index
    %203 = vector.load %arg4[%c0_68, %c5] : memref<32x8xf32, #tpu.memory_space<vmem>>, vector<16x1xf32>
    %204 = vector.broadcast %202 : vector<16x1xf32> to vector<16x512xf32>
    %205 = arith.mulf %201, %204 : vector<16x512xf32>
    %206 = vector.broadcast %203 : vector<16x1xf32> to vector<16x512xf32>
    %207 = arith.addf %205, %206 : vector<16x512xf32>
    %208 = vector.extract_strided_slice %207 {offsets = [0, 495], sizes = [16, 17], strides = [1, 1]} : vector<16x512xf32> to vector<16x17xf32>
    %209 = vector.extract_strided_slice %207 {offsets = [0, 0], sizes = [16, 495], strides = [1, 1]} : vector<16x512xf32> to vector<16x495xf32>
    %210 = tpu.concatenate %208, %209 in 1 : vector<16x17xf32>, vector<16x495xf32> -> vector<16x512xf32>
    %211 = vector.extract_strided_slice %2 {offsets = [0, 0], sizes = [1, 512], strides = [1, 1]} : vector<9x512xf32> to vector<1x512xf32>
    %212 = vector.broadcast %211 : vector<1x512xf32> to vector<16x512xf32>
    %213 = arith.mulf %210, %212 : vector<16x512xf32>
    %c8_69 = arith.constant 8 : index
    %c0_70 = arith.constant 0 : index
    %214 = vector.load %arg6[%c8_69, %c0_70] : memref<296x512xf32, #tpu.memory_space<vmem>>, vector<16x512xf32>
    tpu.vector_store %arg6[%c8_69, %c0_70], %213 {strides = array<i32>} : memref<296x512xf32, #tpu.memory_space<vmem>>, vector<16x512xf32>,
    %215 = vector.extract_strided_slice %207 {offsets = [0, 496], sizes = [16, 16], strides = [1, 1]} : vector<16x512xf32> to vector<16x16xf32>
    %216 = vector.extract_strided_slice %207 {offsets = [0, 0], sizes = [16, 496], strides = [1, 1]} : vector<16x512xf32> to vector<16x496xf32>
    %217 = tpu.concatenate %215, %216 in 1 : vector<16x16xf32>, vector<16x496xf32> -> vector<16x512xf32>
    %218 = vector.extract_strided_slice %2 {offsets = [1, 0], sizes = [1, 512], strides = [1, 1]} : vector<9x512xf32> to vector<1x512xf32>
    %219 = vector.broadcast %218 : vector<1x512xf32> to vector<16x512xf32>
    %220 = arith.mulf %217, %219 : vector<16x512xf32>
    %c24_71 = arith.constant 24 : index
    %c0_72 = arith.constant 0 : index
    %221 = vector.load %arg6[%c24_71, %c0_72] : memref<296x512xf32, #tpu.memory_space<vmem>>, vector<16x512xf32>
    tpu.vector_store %arg6[%c24_71, %c0_72], %220 {strides = array<i32>} : memref<296x512xf32, #tpu.memory_space<vmem>>, vector<16x512xf32>,
    %222 = vector.extract_strided_slice %207 {offsets = [0, 497], sizes = [16, 15], strides = [1, 1]} : vector<16x512xf32> to vector<16x15xf32>
    %223 = vector.extract_strided_slice %207 {offsets = [0, 0], sizes = [16, 497], strides = [1, 1]} : vector<16x512xf32> to vector<16x497xf32>
    %224 = tpu.concatenate %222, %223 in 1 : vector<16x15xf32>, vector<16x497xf32> -> vector<16x512xf32>
    %225 = vector.extract_strided_slice %2 {offsets = [2, 0], sizes = [1, 512], strides = [1, 1]} : vector<9x512xf32> to vector<1x512xf32>
    %226 = vector.broadcast %225 : vector<1x512xf32> to vector<16x512xf32>
    %227 = arith.mulf %224, %226 : vector<16x512xf32>
    %c40_73 = arith.constant 40 : index
    %c0_74 = arith.constant 0 : index
    %228 = vector.load %arg6[%c40_73, %c0_74] : memref<296x512xf32, #tpu.memory_space<vmem>>, vector<16x512xf32>
    tpu.vector_store %arg6[%c40_73, %c0_74], %227 {strides = array<i32>} : memref<296x512xf32, #tpu.memory_space<vmem>>, vector<16x512xf32>,
    %229 = vector.extract_strided_slice %207 {offsets = [0, 511], sizes = [16, 1], strides = [1, 1]} : vector<16x512xf32> to vector<16x1xf32>
    %230 = vector.extract_strided_slice %207 {offsets = [0, 0], sizes = [16, 511], strides = [1, 1]} : vector<16x512xf32> to vector<16x511xf32>
    %231 = tpu.concatenate %229, %230 in 1 : vector<16x1xf32>, vector<16x511xf32> -> vector<16x512xf32>
    %232 = vector.extract_strided_slice %2 {offsets = [3, 0], sizes = [1, 512], strides = [1, 1]} : vector<9x512xf32> to vector<1x512xf32>
    %233 = vector.broadcast %232 : vector<1x512xf32> to vector<16x512xf32>
    %234 = arith.mulf %231, %233 : vector<16x512xf32>
    %c56_75 = arith.constant 56 : index
    %c0_76 = arith.constant 0 : index
    %235 = vector.load %arg6[%c56_75, %c0_76] : memref<296x512xf32, #tpu.memory_space<vmem>>, vector<16x512xf32>
    tpu.vector_store %arg6[%c56_75, %c0_76], %234 {strides = array<i32>} : memref<296x512xf32, #tpu.memory_space<vmem>>, vector<16x512xf32>,
    %c72_77 = arith.constant 72 : index
    %c0_78 = arith.constant 0 : index
    %236 = vector.load %arg6[%c72_77, %c0_78] : memref<296x512xf32, #tpu.memory_space<vmem>>, vector<16x512xf32>
    tpu.vector_store %arg6[%c72_77, %c0_78], %207 {strides = array<i32>} : memref<296x512xf32, #tpu.memory_space<vmem>>, vector<16x512xf32>,
    %237 = vector.extract_strided_slice %207 {offsets = [0, 1], sizes = [16, 511], strides = [1, 1]} : vector<16x512xf32> to vector<16x511xf32>
    %238 = vector.extract_strided_slice %207 {offsets = [0, 0], sizes = [16, 1], strides = [1, 1]} : vector<16x512xf32> to vector<16x1xf32>
    %239 = tpu.concatenate %237, %238 in 1 : vector<16x511xf32>, vector<16x1xf32> -> vector<16x512xf32>
    %240 = vector.extract_strided_slice %2 {offsets = [5, 0], sizes = [1, 512], strides = [1, 1]} : vector<9x512xf32> to vector<1x512xf32>
    %241 = vector.broadcast %240 : vector<1x512xf32> to vector<16x512xf32>
    %242 = arith.mulf %239, %241 : vector<16x512xf32>
    %c88_79 = arith.constant 88 : index
    %c0_80 = arith.constant 0 : index
    %243 = vector.load %arg6[%c88_79, %c0_80] : memref<296x512xf32, #tpu.memory_space<vmem>>, vector<16x512xf32>
    tpu.vector_store %arg6[%c88_79, %c0_80], %242 {strides = array<i32>} : memref<296x512xf32, #tpu.memory_space<vmem>>, vector<16x512xf32>,
    %244 = vector.extract_strided_slice %207 {offsets = [0, 15], sizes = [16, 497], strides = [1, 1]} : vector<16x512xf32> to vector<16x497xf32>
    %245 = vector.extract_strided_slice %207 {offsets = [0, 0], sizes = [16, 15], strides = [1, 1]} : vector<16x512xf32> to vector<16x15xf32>
    %246 = tpu.concatenate %244, %245 in 1 : vector<16x497xf32>, vector<16x15xf32> -> vector<16x512xf32>
    %247 = vector.extract_strided_slice %2 {offsets = [6, 0], sizes = [1, 512], strides = [1, 1]} : vector<9x512xf32> to vector<1x512xf32>
    %248 = vector.broadcast %247 : vector<1x512xf32> to vector<16x512xf32>
    %249 = arith.mulf %246, %248 : vector<16x512xf32>
    %c104_81 = arith.constant 104 : index
    %c0_82 = arith.constant 0 : index
    %250 = vector.load %arg6[%c104_81, %c0_82] : memref<296x512xf32, #tpu.memory_space<vmem>>, vector<16x512xf32>
    tpu.vector_store %arg6[%c104_81, %c0_82], %249 {strides = array<i32>} : memref<296x512xf32, #tpu.memory_space<vmem>>, vector<16x512xf32>,
    %251 = vector.extract_strided_slice %207 {offsets = [0, 16], sizes = [16, 496], strides = [1, 1]} : vector<16x512xf32> to vector<16x496xf32>
    %252 = vector.extract_strided_slice %207 {offsets = [0, 0], sizes = [16, 16], strides = [1, 1]} : vector<16x512xf32> to vector<16x16xf32>
    %253 = tpu.concatenate %251, %252 in 1 : vector<16x496xf32>, vector<16x16xf32> -> vector<16x512xf32>
    %254 = vector.extract_strided_slice %2 {offsets = [7, 0], sizes = [1, 512], strides = [1, 1]} : vector<9x512xf32> to vector<1x512xf32>
    %255 = vector.broadcast %254 : vector<1x512xf32> to vector<16x512xf32>
    %256 = arith.mulf %253, %255 : vector<16x512xf32>
    %c120_83 = arith.constant 120 : index
    %c0_84 = arith.constant 0 : index
    %257 = vector.load %arg6[%c120_83, %c0_84] : memref<296x512xf32, #tpu.memory_space<vmem>>, vector<16x512xf32>
    tpu.vector_store %arg6[%c120_83, %c0_84], %256 {strides = array<i32>} : memref<296x512xf32, #tpu.memory_space<vmem>>, vector<16x512xf32>,
    %258 = vector.extract_strided_slice %207 {offsets = [0, 17], sizes = [16, 495], strides = [1, 1]} : vector<16x512xf32> to vector<16x495xf32>
    %259 = vector.extract_strided_slice %207 {offsets = [0, 0], sizes = [16, 17], strides = [1, 1]} : vector<16x512xf32> to vector<16x17xf32>
    %260 = tpu.concatenate %258, %259 in 1 : vector<16x495xf32>, vector<16x17xf32> -> vector<16x512xf32>
    %261 = vector.extract_strided_slice %2 {offsets = [8, 0], sizes = [1, 512], strides = [1, 1]} : vector<9x512xf32> to vector<1x512xf32>
    %262 = vector.broadcast %261 : vector<1x512xf32> to vector<16x512xf32>
    %263 = arith.mulf %260, %262 : vector<16x512xf32>
    %c136_85 = arith.constant 136 : index
    %c0_86 = arith.constant 0 : index
    %264 = vector.load %arg6[%c136_85, %c0_86] : memref<296x512xf32, #tpu.memory_space<vmem>>, vector<16x512xf32>
    tpu.vector_store %arg6[%c136_85, %c0_86], %263 {strides = array<i32>} : memref<296x512xf32, #tpu.memory_space<vmem>>, vector<16x512xf32>,
    %c0_87 = arith.constant 0 : index
    %c896 = arith.constant 896 : index
    %265 = vector.load %arg3[%c0_87, %c896] : memref<32x1152xf32, #tpu.memory_space<vmem>>, vector<8x152xf32>
    %c0_88 = arith.constant 0 : index
    %c0_89 = arith.constant 0 : index
    %266 = vector.load %arg6[%c0_88, %c0_89] : memref<296x512xf32, #tpu.memory_space<vmem>>, vector<152x512xf32>
    %cst_90 = arith.constant dense<0.000000e+00> : vector<8x512xf32>
    %267 = tpu.matmul %265, %266, %cst_90 {dimension_numbers = #tpu.dot_dimension_numbers<[1], [0], [0], [1], [0, 0, 1, 1], [], []>} : vector<8x152xf32>, vector<152x512xf32>, vector<8x512xf32> -> vector<8x512xf32>
    %cst_91 = arith.constant 0.000000e+00 : f32
    %268 = vector.broadcast %cst_91 : f32 to vector<8x512xf32>
    %269 = arith.maximumf %267, %268 : vector<8x512xf32>
    %c0_92 = arith.constant 0 : index
    %c6 = arith.constant 6 : index
    %270 = vector.load %arg4[%c0_92, %c6] : memref<32x8xf32, #tpu.memory_space<vmem>>, vector<8x1xf32>
    %c0_93 = arith.constant 0 : index
    %c7 = arith.constant 7 : index
    %271 = vector.load %arg4[%c0_93, %c7] : memref<32x8xf32, #tpu.memory_space<vmem>>, vector<8x1xf32>
    %272 = vector.broadcast %270 : vector<8x1xf32> to vector<8x512xf32>
    %273 = arith.mulf %269, %272 : vector<8x512xf32>
    %274 = vector.broadcast %271 : vector<8x1xf32> to vector<8x512xf32>
    %275 = arith.addf %273, %274 : vector<8x512xf32>
    %c0_94 = arith.constant 0 : index
    %c0_95 = arith.constant 0 : index
    %276 = vector.load %arg5[%c0_94, %c0_95] : memref<8x512xf32, #tpu.memory_space<vmem>>, vector<8x512xf32>
    tpu.vector_store %arg5[%c0_94, %c0_95], %275 {strides = array<i32>} : memref<8x512xf32, #tpu.memory_space<vmem>>, vector<8x512xf32>,
    return
  }
  func.func @transform_0(%arg0: i32) -> (i32, i32) {
    %c0_i32 = arith.constant 0 : i32
    %c0_i32_0 = arith.constant 0 : i32
    return %c0_i32, %arg0 : i32, i32
  }
  func.func @transform_1(%arg0: i32) -> (i32, i32) {
    %c0_i32 = arith.constant 0 : i32
    %c0_i32_0 = arith.constant 0 : i32
    %c0_i32_1 = arith.constant 0 : i32
    return %c0_i32, %c0_i32_0 : i32, i32
  }
  func.func @transform_2(%arg0: i32) -> (i32, i32) {
    %c0_i32 = arith.constant 0 : i32
    %c0_i32_0 = arith.constant 0 : i32
    %c0_i32_1 = arith.constant 0 : i32
    return %c0_i32, %c0_i32_0 : i32, i32
  }
  func.func @transform_3(%arg0: i32) -> (i32, i32) {
    %c0_i32 = arith.constant 0 : i32
    %c0_i32_0 = arith.constant 0 : i32
    %c0_i32_1 = arith.constant 0 : i32
    return %c0_i32, %c0_i32_0 : i32, i32
  }
  func.func @transform_4(%arg0: i32) -> (i32, i32) {
    %c0_i32 = arith.constant 0 : i32
    %c0_i32_0 = arith.constant 0 : i32
    return %c0_i32, %arg0 : i32, i32
  }
}

</mosaic_0001>

<bundles_post_ra>
// kernel: post_processing_forward.1
= control target key start
LH: loop header
LB: loop body
LE: loop exit
PB: predicated region body
PF: predicated region fallthrough
CT: control target
= control target key end

     0   :  { %s3730_s19 = smov 112   ;;  %s3731_s24 = smov 113   ;;  %v80_v8 = vlaneseq  ;;  %vm669_vm0 = vcmask 195584   ;;  %vm471_vm1 = vcmask 916480   ;;  %vm404_vm2 = vcmask 924672   ;;  %s6348_s0 = inlined_call_operand.vmem [shape: f32[16,512], index: 0, kind: input, shape index: {}]   ;;  %s6349_s1 = inlined_call_operand.vmem [shape: f32[9,512], index: 1, kind: input, shape index: {}]   ;;  %s6350_s2 = inlined_call_operand.vmem [shape: f32[32,1152], index: 2, kind: input, shape index: {}]   ;;  %s6351_s3 = inlined_call_operand.vmem [shape: f32[32,8], index: 3, kind: input, shape index: {}]   ;;  %s6352_s4 = inlined_call_operand.vmem [shape: f32[8,512], index: 4, kind: output, shape index: {}]  }
   0x1   :  { %v3776_v0 = vld [vmem:[%s6348_s0 + $0x8] sm:$0xff]  ;;  %v3781_v1 = vld [vmem:[%s6348_s0] sm:$0xff]  ;;  %v3790_v2 = vld [vmem:[%s6348_s0 + $0x10] sm:$0xff]  ;;  %s3732_s7 = smov 127   ;;  %s3734_s8 = smov 15   ;;  %v3738_v30 = vmov 0  }
   0x2   :  { %457 = vrot.lane.b32.xlu0 %v3776_v0, %s3730_s19  ;;  %455 = vrot.lane.b32.xlu1 %v3781_v1, %s3730_s19  ;;  %v3795_v3 = vld [vmem:[%s6348_s0 + $0x28] sm:$0xff]  ;;  %v3804_v4 = vld [vmem:[%s6348_s0 + $0x30] sm:$0xff]  ;;  %s3735_s9 = smov 16   ;;  %s3736_s10 = smov 17   ;;  %v3925_v9 = vshrl.u32 %v80_v8, 7  ;;  %v3739_v57 = vmov 1  }
   0x3   :  { %v3809_v5 = vld [vmem:[%s6348_s0 + $0x18] sm:$0xff]  ;;  %v3818_v6 = vld [vmem:[%s6348_s0 + $0x20] sm:$0xff]  ;;  %s3737_s11 = smov 111   ;;  %v3934_v10 = vld [vmem:[%s6349_s1 + $0x8] sm:$0xff]  ;;  %3707 = vset.pattern.permute.xlu1 %v3738_v30  ;;  %3706 = vset.pattern.permute.xlu0 %v3738_v30  ;;  %vm337_vm3 = vcmask 1039360   ;;  %vm264_vm4 = vcmask 7168  }
   0x4   :  { %v3827_v7 = vld [vmem:[%s6348_s0 + $0x38] sm:$0xff]  ;;  %s3733_s0 = smov 1   ;;  %v492_v11 = vsub.s32 7, %v3925_v9  ;;  %v590_v12 = vld [vmem:[%s6350_s2 + $0x8] sm:$0xff]  ;;  %v3943_v15 = vld [vmem:[%s6349_s1] sm:$0xff]  ;;  %v425_v16 = vsub.s32 6, %v3925_v9 }
   0x5   :  { %3670 = vmatprep.mubr.msk.f32.mxu0 %vm669_vm0, %v590_v12  ;;  %3672 = vmatprep.mubr.msk.f32.mxu1 %vm669_vm0, %v590_v12  ;;  %v3961_v19 = vld [vmem:[%s6349_s1 + $0x18] sm:$0xff]  ;;  %v3966_v20 = vld [vmem:[%s6349_s1 + $0x10] sm:$0xff]  ;;  %v4001_v40 = vld [vmem:[%s6351_s3 + $0x8] sm:$0xff]  ;;  %v358_v56 = vsub.s32 5, %v3925_v9  ;;  %vm197_vm5 = vcmask 121856   ;;  %vm130_vm6 = vcmask 130048  }
   0x6   :  { %459 = vrot.lane.b32.xlu0 %v3790_v2, %s3730_s19  ;;  %398 = vrot.lane.b32.xlu1 %v3795_v3, %s3731_s24  ;;  %v3953_v17 = vrot.slane %v3934_v10, %v492_v11  ;;  %v3956_v18 = vrot.slane %v3943_v15, %v492_v11  ;;  %v3971_v25 = vrot.slane %v3934_v10, %v425_v16  ;;  %v4006_v41 = vld [vmem:[%s6351_s3] sm:$0xff]  ;;  %vm63_vm7 = vcmask 138240  }
   0x7   :  { %v3979_v27 = vrot.slane %v3961_v19, %v492_v11  ;;  %v3982_v28 = vrot.slane %v3966_v20, %v492_v11  ;;  %v3989_v36 = vrot.slane %v3943_v15, %v425_v16  ;;  %v4011_v46 = vrot.slane %v3961_v19, %v425_v16 }
   0x8   :  { %6529 = vst [vmem:[#allocation3_spill] sm:$0xff] %v3953_v17  ;;  %6530 = vst [vmem:[#allocation4_spill] sm:$0xff] %v3956_v18  ;;  %v4014_v47 = vrot.slane %v3966_v20, %v425_v16  ;;  %v4030_v62 = vrot.slane %v3934_v10, %v358_v56  ;;  %v4044_v30 = vrot.slane %v3961_v19, %v358_v56  ;;  %vm538_vm8 = vcmask 908288  }
   0x9   :  { %6531 = vst [vmem:[#allocation5_spill] sm:$0xff] %v3971_v25  ;;  %6532 = vst [vmem:[#allocation6_spill] sm:$0xff] %v3979_v27  ;;  %vm2638_vm9 = vcmask 326656  }
   0xa   :  { %400 = vrot.lane.b32.xlu0 %v3804_v4, %s3731_s24  ;;  %461 = vrot.lane.b32.xlu1 %v3809_v5, %s3730_s19  ;;  %6533 = vst [vmem:[#allocation7_spill] sm:$0xff] %v3982_v28  ;;  %6534 = vst [vmem:[#allocation8_spill] sm:$0xff] %v3989_v36 }
   0xb   :  { %6535 = vst [vmem:[#allocation9_spill] sm:$0xff] %v4011_v46  ;;  %6536 = vst [vmem:[#allocation10_spill] sm:$0xff] %v4014_v47 }
   0xc   :  { %6537 = vst [vmem:[#allocation11_spill] sm:$0xff] %v4030_v62  ;;  %6539 = vst [vmem:[#allocation13_spill] sm:$0xff] %v4044_v30 }
   0xe   :  { %396 = vrot.lane.b32.xlu0 %v3818_v6, %s3731_s24  ;;  %390 = vrot.lane.b32.xlu1 %v3776_v0, %s3731_s24 }
  0x12   :  { %392 = vrot.lane.b32.xlu0 %v3790_v2, %s3731_s24  ;;  %402 = vrot.lane.b32.xlu1 %v3827_v7, %s3731_s24 }
  0x16   :  { %388 = vrot.lane.b32.xlu0 %v3781_v1, %s3731_s24  ;;  %331 = vrot.lane.b32.xlu1 %v3795_v3, %s3732_s7 }
  0x1a   :  { %333 = vrot.lane.b32.xlu0 %v3804_v4, %s3732_s7  ;;  %394 = vrot.lane.b32.xlu1 %v3809_v5, %s3731_s24 }
  0x1e   :  { %329 = vrot.lane.b32.xlu0 %v3818_v6, %s3732_s7  ;;  %323 = vrot.lane.b32.xlu1 %v3776_v0, %s3732_s7 }
  0x22   :  { %325 = vrot.lane.b32.xlu0 %v3790_v2, %s3732_s7  ;;  %335 = vrot.lane.b32.xlu1 %v3827_v7, %s3732_s7 }
  0x26   :  { %321 = vrot.lane.b32.xlu0 %v3781_v1, %s3732_s7  ;;  %327 = vrot.lane.b32.xlu1 %v3809_v5, %s3732_s7 }
  0x2a   :  { %258 = vrot.lane.b32.xlu0 %v3818_v6, %s3733_s0  ;;  %260 = vrot.lane.b32.xlu1 %v3795_v3, %s3733_s0 }
  0x2e   :  { %248 = vrot.lane.b32.xlu0 %v3827_v7, %s3733_s0  ;;  %252 = vrot.lane.b32.xlu1 %v3781_v1, %s3733_s0 }
  0x32   :  { %254 = vrot.lane.b32.xlu0 %v3776_v0, %s3733_s0  ;;  %262 = vrot.lane.b32.xlu1 %v3804_v4, %s3733_s0 }
  0x36   :  { %246 = vrot.lane.b32.xlu0 %v3809_v5, %s3733_s0  ;;  %191 = vrot.lane.b32.xlu1 %v3818_v6, %s3734_s8 }
  0x3a   :  { %193 = vrot.lane.b32.xlu0 %v3795_v3, %s3734_s8  ;;  %256 = vrot.lane.b32.xlu1 %v3790_v2, %s3733_s0 }
  0x3e   :  { %181 = vrot.lane.b32.xlu0 %v3827_v7, %s3734_s8  ;;  %185 = vrot.lane.b32.xlu1 %v3781_v1, %s3734_s8 }
  0x42   :  { %187 = vrot.lane.b32.xlu0 %v3776_v0, %s3734_s8  ;;  %195 = vrot.lane.b32.xlu1 %v3804_v4, %s3734_s8 }
  0x46   :  { %179 = vrot.lane.b32.xlu0 %v3809_v5, %s3734_s8  ;;  %124 = vrot.lane.b32.xlu1 %v3818_v6, %s3735_s9 }
  0x4a   :  { %126 = vrot.lane.b32.xlu0 %v3795_v3, %s3735_s9  ;;  %189 = vrot.lane.b32.xlu1 %v3790_v2, %s3734_s8 }
  0x4e   :  { %114 = vrot.lane.b32.xlu0 %v3827_v7, %s3735_s9  ;;  %118 = vrot.lane.b32.xlu1 %v3781_v1, %s3735_s9 }
  0x52   :  { %120 = vrot.lane.b32.xlu0 %v3776_v0, %s3735_s9  ;;  %128 = vrot.lane.b32.xlu1 %v3804_v4, %s3735_s9 }
  0x56   :  { %112 = vrot.lane.b32.xlu0 %v3809_v5, %s3735_s9  ;;  %57 = vrot.lane.b32.xlu1 %v3818_v6, %s3736_s10 }
  0x5a   :  { %59 = vrot.lane.b32.xlu0 %v3795_v3, %s3736_s10  ;;  %122 = vrot.lane.b32.xlu1 %v3790_v2, %s3735_s9 }
  0x5e   :  { %41 = vrot.lane.b32.xlu0 %v3827_v7, %s3736_s10  ;;  %51 = vrot.lane.b32.xlu1 %v3781_v1, %s3736_s10 }
  0x62   :  { %53 = vrot.lane.b32.xlu0 %v3776_v0, %s3736_s10  ;;  %61 = vrot.lane.b32.xlu1 %v3804_v4, %s3736_s10 }
  0x66   :  { %39 = vrot.lane.b32.xlu0 %v3809_v5, %s3736_s10  ;;  %55 = vrot.lane.b32.xlu1 %v3790_v2, %s3736_s10 }
  0x6a   :  { %532 = vrot.lane.b32.xlu0 %v3795_v3, %s3737_s11  ;;  %534 = vrot.lane.b32.xlu1 %v3804_v4, %s3737_s11 }
  0x6e   :  { %530 = vrot.lane.b32.xlu0 %v3818_v6, %s3737_s11  ;;  %524 = vrot.lane.b32.xlu1 %v3776_v0, %s3737_s11 }
  0x72   :  { %526 = vrot.lane.b32.xlu0 %v3790_v2, %s3737_s11  ;;  %536 = vrot.lane.b32.xlu1 %v3827_v7, %s3737_s11 }
  0x74   :  { %v458_v13 = vpop.permute.xlu0 %457  ;;  %v456_v14 = vpop.permute.xlu1 %455 }
  0x75   :  { %v472_v23 = vsel %vm471_vm1, %v456_v14, %v458_v13 }
  0x76   :  { %522 = vrot.lane.b32.xlu0 %v3781_v1, %s3737_s11  ;;  %465 = vrot.lane.b32.xlu1 %v3795_v3, %s3730_s19  ;;  %v506_v29 = vmul.f32 %v3956_v18, %v472_v23 }
  0x78   :  { %v460_v21 = vpop.permute.xlu0 %459  ;;  %v399_v22 = vpop.permute.xlu1 %398 }
  0x79   :  { %v473_v24 = vsel %vm471_vm1, %v458_v13, %v460_v21 }
  0x7a   :  { %467 = vrot.lane.b32.xlu0 %v3804_v4, %s3730_s19  ;;  %528 = vrot.lane.b32.xlu1 %v3809_v5, %s3737_s11  ;;  %v507_v26 = vmul.f32 %v3953_v17, %v473_v24 }
  0x7c   :  { %676 = vmatprep.subr.mxu0 %v507_v26  ;;  %v401_v31 = vpop.permute.xlu0 %400  ;;  %v462_v32 = vpop.permute.xlu1 %461 }
  0x7d   :  { %v409_v33 = vsel %vm404_vm2, %v399_v22, %v401_v31  ;;  %677 = vmatpush1.msra.mxu0 %v506_v29  ;;  %v488_v34 = vsel %vm471_vm1, %v462_v32, %v456_v14  ;;  %v474_v35 = vsel %vm471_vm1, %v460_v21, %v462_v32 }
  0x7e   :  { %463 = vrot.lane.b32.xlu0 %v3818_v6, %s3730_s19  ;;  %469 = vrot.lane.b32.xlu1 %v3827_v7, %s3730_s19  ;;  %v444_v37 = vmul.f32 %v3971_v25, %v409_v33  ;;  %v509_v38 = vmul.f32 %v3979_v27, %v488_v34  ;;  %v508_v39 = vmul.f32 %v3982_v28, %v474_v35 }
  0x80   :  { %v397_v42 = vpop.permute.xlu0 %396  ;;  %678 = vmatprep.subr.mxu0 %v444_v37  ;;  %753 = vmatprep.subr.mxu1 %v509_v38  ;;  %v391_v43 = vpop.permute.xlu1 %390 }
  0x81   :  { %v408_v44 = vsel %vm404_vm2, %v397_v42, %v399_v22  ;;  %754 = vmatpush1.msra.mxu1 %v508_v39  ;;  %v4039_v22 = vrot.slane %v3943_v15, %v358_v56 }
  0x82   :  { %v443_v45 = vmul.f32 %v3989_v36, %v408_v44  ;;  %847 = vperm.xlu1 %3707, %v4001_v40   ;;  %842 = vperm.xlu0 %3706, %v4006_v41  }
  0x83   :  { %6538 = vst [vmem:[#allocation12_spill] sm:$0xff] %v4039_v22 }
  0x84   :  { %v393_v48 = vpop.permute.xlu0 %392  ;;  %679 = vmatpush1.msra.mxu0 %v443_v45  ;;  %v403_v49 = vpop.permute.xlu1 %402 }
  0x85   :  { %v406_v50 = vsel %vm404_vm2, %v391_v43, %v393_v48  ;;  %v410_v51 = vsel %vm404_vm2, %v401_v31, %v403_v49  ;;  %v422_v52 = vsel %vm404_vm2, %v403_v49, %v397_v42  ;;  %v4047_v31 = vrot.slane %v3966_v20, %v358_v56 }
  0x86   :  { %v440_v53 = vmul.f32 %v3971_v25, %v406_v50  ;;  %v446_v54 = vmul.f32 %v4011_v46, %v422_v52  ;;  %v445_v55 = vmul.f32 %v4014_v47, %v410_v51  ;;  %3708 = vset.pattern.permute.xlu1 %v3739_v57  ;;  %3709 = vset.pattern.permute.xlu0 %v3739_v57 }
  0x87   :  { %859 = vperm.xlu1 %3708, %v4006_v41   ;;  %863 = vperm.xlu0 %3709, %v4001_v40   ;;  %6540 = vst [vmem:[#allocation14_spill] sm:$0xff] %v4047_v31 }
  0x88   :  { %v389_v58 = vpop.permute.xlu0 %388  ;;  %680 = vmatprep.subr.mxu0 %v440_v53  ;;  %755 = vmatprep.subr.mxu1 %v446_v54  ;;  %v332_v59 = vpop.permute.xlu1 %331 }
  0x89   :  { %v405_v60 = vsel %vm404_vm2, %v389_v58, %v391_v43  ;;  %756 = vmatpush1.msra.mxu1 %v445_v55  ;;  %v283_v43 = vsub.s32 3, %v3925_v9 }
  0x8a   :  { %v439_v61 = vmul.f32 %v3989_v36, %v405_v60 }
  0x8b   :  { %v4063_v54 = vrot.slane %v3934_v10, %v283_v43 }
  0x8c   :  { %v334_v63 = vpop.permute.xlu0 %333  ;;  %681 = vmatpush1.msra.mxu0 %v439_v61  ;;  %v395_v8 = vpop.permute.xlu1 %394 }
  0x8d   :  { %v342_v11 = vsel %vm337_vm3, %v332_v59, %v334_v63  ;;  %v407_v12 = vsel %vm404_vm2, %v393_v48, %v395_v8  ;;  %v421_v13 = vsel %vm404_vm2, %v395_v8, %v389_v58  ;;  %6541 = vst [vmem:[#allocation15_spill] sm:$0xff] %v4063_v54 }
  0x8e   :  { %v377_v14 = vmul.f32 %v4030_v62, %v342_v11  ;;  %v442_v16 = vmul.f32 %v4011_v46, %v421_v13  ;;  %v441_v21 = vmul.f32 %v4014_v47, %v407_v12  ;;  %v216_v13 = vsub.s32 2, %v3925_v9 }
  0x90   :  { %v330_v23 = vpop.permute.xlu0 %329  ;;  %682 = vmatprep.subr.mxu0 %v377_v14  ;;  %757 = vmatprep.subr.mxu1 %v442_v16  ;;  %v324_v24 = vpop.permute.xlu1 %323 }
  0x91   :  { %v341_v26 = vsel %vm337_vm3, %v330_v23, %v332_v59  ;;  %758 = vmatpush1.msra.mxu1 %v441_v21  ;;  %v4070_v59 = vrot.slane %v3943_v15, %v283_v43 }
  0x92   :  { %v376_v29 = vmul.f32 %v4039_v22, %v341_v26 }
  0x93   :  { %6542 = vst [vmem:[#allocation16_spill] sm:$0xff] %v4070_v59 }
  0x94   :  { %v326_v32 = vpop.permute.xlu0 %325  ;;  %683 = vmatpush1.msra.mxu0 %v376_v29  ;;  %v336_v33 = vpop.permute.xlu1 %335 }
  0x95   :  { %v339_v34 = vsel %vm337_vm3, %v324_v24, %v326_v32  ;;  %v343_v35 = vsel %vm337_vm3, %v334_v63, %v336_v33  ;;  %v355_v37 = vsel %vm337_vm3, %v336_v33, %v330_v23  ;;  %v4081_v63 = vrot.slane %v3961_v19, %v283_v43 }
  0x96   :  { %v373_v38 = vmul.f32 %v4030_v62, %v339_v34  ;;  %v379_v39 = vmul.f32 %v4044_v30, %v355_v37  ;;  %v378_v42 = vmul.f32 %v4047_v31, %v343_v35 }
  0x97   :  { %6543 = vst [vmem:[#allocation17_spill] sm:$0xff] %v4081_v63 }
  0x98   :  { %v322_v44 = vpop.permute.xlu0 %321  ;;  %684 = vmatprep.subr.mxu0 %v373_v38  ;;  %759 = vmatprep.subr.mxu1 %v379_v39  ;;  %v328_v45 = vpop.permute.xlu1 %327  ;;  %v4105_v39 = vrot.slane %v3943_v15, %v216_v13 }
  0x99   :  { %v338_v48 = vsel %vm337_vm3, %v322_v44, %v324_v24  ;;  %v340_v49 = vsel %vm337_vm3, %v326_v32, %v328_v45  ;;  %v354_v50 = vsel %vm337_vm3, %v328_v45, %v322_v44  ;;  %760 = vmatpush1.msra.mxu1 %v378_v42  ;;  %v4096_v24 = vrot.slane %v3934_v10, %v216_v13 }
  0x9a   :  { %v372_v51 = vmul.f32 %v4039_v22, %v338_v48  ;;  %v375_v52 = vmul.f32 %v4044_v30, %v354_v50  ;;  %v374_v53 = vmul.f32 %v4047_v31, %v340_v49  ;;  %6545 = vst [vmem:[#allocation19_spill] sm:$0xff] %v4105_v39  ;;  %v4110_v48 = vrot.slane %v3961_v19, %v216_v13 }
  0x9b   :  { %6544 = vst [vmem:[#allocation18_spill] sm:$0xff] %v4096_v24  ;;  %v4113_v49 = vrot.slane %v3966_v20, %v216_v13 }
  0x9c   :  { %v259_v55 = vpop.permute.xlu0 %258  ;;  %685 = vmatpush1.msra.mxu0 %v372_v51  ;;  %761 = vmatprep.subr.mxu1 %v375_v52  ;;  %v261_v56 = vpop.permute.xlu1 %260  ;;  %6546 = vst [vmem:[#allocation20_spill] sm:$0xff] %v4110_v48 }
  0x9d   :  { %v268_v57 = vsel %vm264_vm4, %v259_v55, %v261_v56  ;;  %686 = vmatprep.subr.mxu0 %v3795_v3  ;;  %762 = vmatpush1.msra.mxu1 %v374_v53  ;;  %6547 = vst [vmem:[#allocation21_spill] sm:$0xff] %v4113_v49 }
  0x9e   :  { %687 = vmatpush1.msra.mxu0 %v3818_v6  ;;  %v302_v58 = vmul.f32 %v4063_v54, %v268_v57  ;;  %763 = vmatprep.subr.mxu1 %v3827_v7 }
  0x9f   :  { %688 = vmatprep.subr.mxu0 %v3776_v0  ;;  %764 = vmatpush1.msra.mxu1 %v3804_v4  ;;  %v4084_v0 = vrot.slane %v3966_v20, %v283_v43 }
  0xa0   :  { %v249_v60 = vpop.permute.xlu0 %248  ;;  %689 = vmatpush1.msra.mxu0 %v3781_v1  ;;  %v253_v61 = vpop.permute.xlu1 %252  ;;  %765 = vmatprep.subr.mxu1 %v3809_v5 }
  0xa1   :  { %v280_v3 = vsel %vm264_vm4, %v249_v60, %v259_v55  ;;  %690 = vmatprep.subr.mxu0 %v302_v58  ;;  %766 = vmatpush1.msra.mxu1 %v3790_v2 }
  0xa2   :  { %v301_v6 = vmul.f32 %v4070_v59, %v280_v3 }
  0xa4   :  { %v255_v4 = vpop.permute.xlu0 %254  ;;  %691 = vmatpush1.msra.mxu0 %v301_v6  ;;  %v263_v7 = vpop.permute.xlu1 %262 }
  0xa5   :  { %v265_v1 = vsel %vm264_vm4, %v253_v61, %v255_v4  ;;  %v269_v5 = vsel %vm264_vm4, %v261_v56, %v263_v7  ;;  %v270_v8 = vsel %vm264_vm4, %v263_v7, %v249_v60  ;;  %v149_v60 = vsub.s32 1, %v3925_v9 }
  0xa6   :  { %v298_v11 = vmul.f32 %v4063_v54, %v265_v1  ;;  %v304_v2 = vmul.f32 %v4081_v63, %v270_v8  ;;  %v303_v12 = vmul.f32 %v4084_v0, %v269_v5 }
  0xa7   :  { %v4125_v7 = vrot.slane %v3934_v10, %v149_v60 }
  0xa8   :  { %v247_v14 = vpop.permute.xlu0 %246  ;;  %692 = vmatprep.subr.mxu0 %v298_v11  ;;  %767 = vmatprep.subr.mxu1 %v304_v2  ;;  %v192_v16 = vpop.permute.xlu1 %191 }
  0xa9   :  { %v279_v21 = vsel %vm264_vm4, %v247_v14, %v253_v61  ;;  %768 = vmatpush1.msra.mxu1 %v303_v12  ;;  %6548 = vst [vmem:[#allocation22_spill] sm:$0xff] %v4125_v7 }
  0xaa   :  { %v297_v23 = vmul.f32 %v4070_v59, %v279_v21 }
  0xac   :  { %v194_v26 = vpop.permute.xlu0 %193  ;;  %693 = vmatpush1.msra.mxu0 %v297_v23  ;;  %v257_v29 = vpop.permute.xlu1 %256 }
  0xad   :  { %v201_v32 = vsel %vm197_vm5, %v192_v16, %v194_v26  ;;  %v266_v33 = vsel %vm264_vm4, %v255_v4, %v257_v29  ;;  %v267_v34 = vsel %vm264_vm4, %v257_v29, %v247_v14 }
  0xae   :  { %v235_v35 = vmul.f32 %v4096_v24, %v201_v32  ;;  %v300_v37 = vmul.f32 %v4081_v63, %v267_v34  ;;  %v299_v38 = vmul.f32 %v4084_v0, %v266_v33  ;;  %v4139_v32 = vrot.slane %v3961_v19, %v149_v60 }
  0xaf   :  { %v4142_v33 = vrot.slane %v3966_v20, %v149_v60 }
  0xb0   :  { %v182_v42 = vpop.permute.xlu0 %181  ;;  %694 = vmatprep.subr.mxu0 %v235_v35  ;;  %769 = vmatprep.subr.mxu1 %v300_v37  ;;  %v186_v43 = vpop.permute.xlu1 %185  ;;  %6550 = vst [vmem:[#allocation24_spill] sm:$0xff] %v4139_v32 }
  0xb1   :  { %v213_v44 = vsel %vm197_vm5, %v182_v42, %v192_v16  ;;  %770 = vmatpush1.msra.mxu1 %v299_v38  ;;  %v4134_v16 = vrot.slane %v3943_v15, %v149_v60  ;;  %6551 = vst [vmem:[#allocation25_spill] sm:$0xff] %v4142_v33 }
  0xb2   :  { %v234_v45 = vmul.f32 %v4105_v39, %v213_v44 }
  0xb3   :  { %6549 = vst [vmem:[#allocation23_spill] sm:$0xff] %v4134_v16 }
  0xb4   :  { %v188_v50 = vpop.permute.xlu0 %187  ;;  %695 = vmatpush1.msra.mxu0 %v234_v45  ;;  %v196_v51 = vpop.permute.xlu1 %195 }
  0xb5   :  { %v198_v52 = vsel %vm197_vm5, %v186_v43, %v188_v50  ;;  %v202_v53 = vsel %vm197_vm5, %v194_v26, %v196_v51  ;;  %v203_v55 = vsel %vm197_vm5, %v196_v51, %v182_v42 }
  0xb6   :  { %v231_v56 = vmul.f32 %v4096_v24, %v198_v52  ;;  %v237_v57 = vmul.f32 %v4110_v48, %v203_v55  ;;  %v236_v58 = vmul.f32 %v4113_v49, %v202_v53 }
  0xb8   :  { %v180_v61 = vpop.permute.xlu0 %179  ;;  %696 = vmatprep.subr.mxu0 %v231_v56  ;;  %771 = vmatprep.subr.mxu1 %v237_v57  ;;  %v125_v3 = vpop.permute.xlu1 %124 }
  0xb9   :  { %v212_v6 = vsel %vm197_vm5, %v180_v61, %v186_v43  ;;  %772 = vmatpush1.msra.mxu1 %v236_v58 }
  0xba   :  { %v230_v4 = vmul.f32 %v4105_v39, %v212_v6 }
  0xbc   :  { %v127_v1 = vpop.permute.xlu0 %126  ;;  %697 = vmatpush1.msra.mxu0 %v230_v4  ;;  %v190_v5 = vpop.permute.xlu1 %189 }
  0xbd   :  { %v134_v8 = vsel %vm130_vm6, %v125_v3, %v127_v1  ;;  %v199_v11 = vsel %vm197_vm5, %v188_v50, %v190_v5  ;;  %v200_v2 = vsel %vm197_vm5, %v190_v5, %v180_v61  ;;  %v82_v50 = vsub.s32 0, %v3925_v9 }
  0xbe   :  { %v168_v12 = vmul.f32 %v4125_v7, %v134_v8  ;;  %v233_v13 = vmul.f32 %v4110_v48, %v200_v2  ;;  %v232_v14 = vmul.f32 %v4113_v49, %v199_v11 }
  0xbf   :  { %v4154_v56 = vrot.slane %v3934_v10, %v82_v50  ;;  %v4168_v2 = vrot.slane %v3961_v19, %v82_v50 }
  0xc0   :  { %v115_v21 = vpop.permute.xlu0 %114  ;;  %698 = vmatprep.subr.mxu0 %v168_v12  ;;  %773 = vmatprep.subr.mxu1 %v233_v13  ;;  %v119_v23 = vpop.permute.xlu1 %118  ;;  %v4171_v12 = vrot.slane %v3966_v20, %v82_v50 }
  0xc1   :  { %v146_v26 = vsel %vm130_vm6, %v115_v21, %v125_v3  ;;  %774 = vmatpush1.msra.mxu1 %v232_v14  ;;  %6552 = vst [vmem:[#allocation26_spill] sm:$0xff] %v4154_v56  ;;  %6554 = vst [vmem:[#allocation28_spill] sm:$0xff] %v4168_v2 }
  0xc2   :  { %v167_v29 = vmul.f32 %v4134_v16, %v146_v26  ;;  %6555 = vst [vmem:[#allocation29_spill] sm:$0xff] %v4171_v12 }
  0xc4   :  { %v121_v34 = vpop.permute.xlu0 %120  ;;  %699 = vmatpush1.msra.mxu0 %v167_v29  ;;  %v129_v35 = vpop.permute.xlu1 %128 }
  0xc5   :  { %v131_v37 = vsel %vm130_vm6, %v119_v23, %v121_v34  ;;  %v135_v38 = vsel %vm130_vm6, %v127_v1, %v129_v35  ;;  %v136_v42 = vsel %vm130_vm6, %v129_v35, %v115_v21  ;;  %v4163_v1 = vrot.slane %v3943_v15, %v82_v50 }
  0xc6   :  { %v164_v43 = vmul.f32 %v4125_v7, %v131_v37  ;;  %v170_v44 = vmul.f32 %v4139_v32, %v136_v42  ;;  %v169_v45 = vmul.f32 %v4142_v33, %v135_v38 }
  0xc7   :  { %6553 = vst [vmem:[#allocation27_spill] sm:$0xff] %v4163_v1 }
  0xc8   :  { %v113_v51 = vpop.permute.xlu0 %112  ;;  %700 = vmatprep.subr.mxu0 %v164_v43  ;;  %775 = vmatprep.subr.mxu1 %v170_v44  ;;  %v58_v52 = vpop.permute.xlu1 %57 }
  0xc9   :  { %v145_v53 = vsel %vm130_vm6, %v113_v51, %v119_v23  ;;  %776 = vmatpush1.msra.mxu1 %v169_v45  ;;  %v4188_v45 = vld [vmem:[%s6349_s1 + $0x28] ss:$0 sm:$0xff] }
  0xca   :  { %v163_v55 = vmul.f32 %v4134_v16, %v145_v53  ;;  %6556 = vst [vmem:[#allocation30_spill] sm:$0xff] %v4188_v45  ;;  %v6353_v53 = vmov 1.0  }
  0xcc   :  { %v60_v57 = vpop.permute.xlu0 %59  ;;  %701 = vmatpush1.msra.mxu0 %v163_v55  ;;  %v123_v58 = vpop.permute.xlu1 %122 }
  0xcd   :  { %v67_v60 = vsel %vm63_vm7, %v58_v52, %v60_v57  ;;  %v132_v9 = vsel %vm130_vm6, %v121_v34, %v123_v58  ;;  %v133_v61 = vsel %vm130_vm6, %v123_v58, %v113_v51 }
  0xce   :  { %v101_v3 = vmul.f32 %v4154_v56, %v67_v60  ;;  %v166_v6 = vmul.f32 %v4139_v32, %v133_v61  ;;  %v165_v4 = vmul.f32 %v4142_v33, %v132_v9 }
  0xd0   :  { %v42_v10 = vpop.permute.xlu0 %41  ;;  %702 = vmatprep.subr.mxu0 %v101_v3  ;;  %777 = vmatprep.subr.mxu1 %v166_v6  ;;  %v52_v5 = vpop.permute.xlu1 %51  ;;  %v4206_v3 = vld [vmem:[%s6349_s1 + $0x38] ss:$0 sm:$0xff]  ;;  %v4211_v6 = vld [vmem:[%s6349_s1 + $0x30] ss:$0 sm:$0xff] }
  0xd1   :  { %v79_v8 = vsel %vm63_vm7, %v42_v10, %v58_v52  ;;  %778 = vmatpush1.msra.mxu1 %v165_v4  ;;  %6558 = vst [vmem:[#allocation32_spill] sm:$0xff] %v4206_v3  ;;  %6559 = vst [vmem:[#allocation33_spill] sm:$0xff] %v4211_v6 }
  0xd2   :  { %v100_v11 = vmul.f32 %v4163_v1, %v79_v8 }
  0xd4   :  { %v54_v13 = vpop.permute.xlu0 %53  ;;  %703 = vmatpush1.msra.mxu0 %v100_v11  ;;  %v62_v14 = vpop.permute.xlu1 %61 }
  0xd5   :  { %v64_v15 = vsel %vm63_vm7, %v52_v5, %v54_v13  ;;  %v68_v21 = vsel %vm63_vm7, %v60_v57, %v62_v14  ;;  %v69_v23 = vsel %vm63_vm7, %v62_v14, %v42_v10  ;;  %v4198_v57 = vld [vmem:[%s6349_s1 + $0x20] ss:$0 sm:$0xff] }
  0xd6   :  { %v97_v26 = vmul.f32 %v4154_v56, %v64_v15  ;;  %v103_v29 = vmul.f32 %v4168_v2, %v69_v23  ;;  %v102_v34 = vmul.f32 %v4171_v12, %v68_v21  ;;  %6557 = vst [vmem:[#allocation31_spill] sm:$0xff] %v4198_v57 }
  0xd8   :  { %v40_v19 = vpop.permute.xlu0 %39  ;;  %704 = vmatprep.subr.mxu0 %v97_v26  ;;  %779 = vmatprep.subr.mxu1 %v103_v29  ;;  %v56_v20 = vpop.permute.xlu1 %55 }
  0xd9   :  { %v78_v35 = vsel %vm63_vm7, %v40_v19, %v52_v5  ;;  %v65_v37 = vsel %vm63_vm7, %v54_v13, %v56_v20  ;;  %v66_v38 = vsel %vm63_vm7, %v56_v20, %v40_v19  ;;  %780 = vmatpush1.msra.mxu1 %v102_v34 }
  0xda   :  { %v96_v42 = vmul.f32 %v4163_v1, %v78_v35  ;;  %v99_v43 = vmul.f32 %v4168_v2, %v66_v38  ;;  %v98_v44 = vmul.f32 %v4171_v12, %v65_v37 }
  0xdc   :  { %v533_v50 = vpop.permute.xlu0 %532  ;;  %705 = vmatpush1.msra.mxu0 %v96_v42  ;;  %781 = vmatprep.subr.mxu1 %v99_v43  ;;  %v535_v51 = vpop.permute.xlu1 %534 }
  0xdd   :  { %v543_v52 = vsel %vm538_vm8, %v533_v50, %v535_v51  ;;  %782 = vmatpush1.msra.mxu1 %v98_v44  ;;  %706 = vmatprep.subr.mxu0 %v6353_v53 }
  0xde   :  { %707 = vmatpush1.msra.mxu0 %v6353_v53  ;;  %v578_v55 = vmul.f32 %v4188_v45, %v543_v52  ;;  %783 = vmatprep.subr.mxu1 %v6353_v53 }
  0xdf   :  { %784 = vmatpush1.msra.mxu1 %v6353_v53 }
  0xe0   :  { %v531_v58 = vpop.permute.xlu0 %530  ;;  %734 = vmatprep.subr.mxu0 %v578_v55  ;;  %v525_v60 = vpop.permute.xlu1 %524 }
  0xe1   :  { %v542_v9 = vsel %vm538_vm8, %v531_v58, %v533_v50 }
  0xe2   :  { %v577_v61 = vmul.f32 %v4198_v57, %v542_v9  ;;  %v589_v9 = vld [vmem:[%s6350_s2] sm:$0xff] }
  0xe4   :  { %v527_v4 = vpop.permute.xlu0 %526  ;;  %735 = vmatpush2.msra.mxu0 %v577_v61  ;;  %v537_v10 = vpop.permute.xlu1 %536 }
  0xe5   :  { %v540_v5 = vsel %vm538_vm8, %v525_v60, %v527_v4  ;;  %v544_v8 = vsel %vm538_vm8, %v535_v51, %v537_v10  ;;  %v556_v11 = vsel %vm538_vm8, %v537_v10, %v531_v58  ;;  %v591_v10 = vld [vmem:[%s6350_s2 + $0x48] sm:$0xff] }
  0xe6   :  { %v574_v13 = vmul.f32 %v4188_v45, %v540_v5  ;;  %v580_v14 = vmul.f32 %v4206_v3, %v556_v11  ;;  %v579_v15 = vmul.f32 %v4211_v6, %v544_v8 }
  0xe8   :  { %v523_v21 = vpop.permute.xlu0 %522  ;;  %736 = vmatprep.subr.mxu0 %v574_v13  ;;  %811 = vmatprep.subr.mxu1 %v580_v14  ;;  %v466_v23 = vpop.permute.xlu1 %465 }
  0xe9   :  { %v539_v26 = vsel %vm538_vm8, %v523_v21, %v525_v60  ;;  %812 = vmatpush2.msra.mxu1 %v579_v15 }
  0xea   :  { %v573_v29 = vmul.f32 %v4198_v57, %v539_v26 }
  0xec   :  { %v468_v34 = vpop.permute.xlu0 %467  ;;  %737 = vmatpush2.msra.mxu0 %v573_v29  ;;  %v529_v19 = vpop.permute.xlu1 %528 }
  0xed   :  { %v476_v20 = vsel %vm471_vm1, %v466_v23, %v468_v34  ;;  %v541_v35 = vsel %vm538_vm8, %v527_v4, %v529_v19  ;;  %v555_v37 = vsel %vm538_vm8, %v529_v19, %v523_v21  ;;  %v592_v4 = vld [vmem:[%s6350_s2 + $0x50] sm:$0xff] }
  0xee   :  { %v511_v38 = vmul.f32 %v3953_v17, %v476_v20  ;;  %v576_v42 = vmul.f32 %v4206_v3, %v555_v37  ;;  %v575_v43 = vmul.f32 %v4211_v6, %v541_v35 }
  0xf0   :  { %v464_v44 = vpop.permute.xlu0 %463  ;;  %738 = vmatprep.subr.mxu0 %v511_v38  ;;  %813 = vmatprep.subr.mxu1 %v576_v42  ;;  %v470_v50 = vpop.permute.xlu1 %469 }
  0xf1   :  { %v475_v51 = vsel %vm471_vm1, %v464_v44, %v466_v23  ;;  %v477_v52 = vsel %vm471_vm1, %v468_v34, %v470_v50  ;;  %v489_v55 = vsel %vm471_vm1, %v470_v50, %v464_v44  ;;  %814 = vmatpush2.msra.mxu1 %v575_v43 }
  0xf2   :  { %v510_v58 = vmul.f32 %v3956_v18, %v475_v51  ;;  %v513_v60 = vmul.f32 %v3979_v27, %v489_v55  ;;  %v512_v61 = vmul.f32 %v3982_v28, %v477_v52 }
  0xf4   :  { %739 = vmatpush2.msra.mxu0 %v510_v58  ;;  %815 = vmatprep.subr.mxu1 %v513_v60 }
  0xf5   :  { %741 = vmatmul.mubr.f32.vlgmr.msra.gmra.mxu0 %v589_v9  ;;  %816 = vmatpush2.msra.mxu1 %v512_v61 }
  0xf6   :  { %818 = vmatmul.mubr.f32.vlgmr.msra.gmra.mxu1 %v589_v9  ;;  %3671 = vmatprep.mubr.msk.f32.mxu0 %vm669_vm0, %v592_v4 }
  0xf7   :  { %3673 = vmatprep.mubr.msk.f32.mxu1 %vm669_vm0, %v592_v4 }
  0xf9   :  { %747 = vmatmul.mubr.f32.gmra.mxu0 %v591_v10 }
  0xfa   :  { %824 = vmatmul.mubr.f32.gmra.mxu1 %v591_v10 }
  0xfd   :  { %v4244_v5 = vpop.permute.xlu1 %847  ;;  %v843_v11 = vpop.permute.xlu0 %842 }
 0x102   :  { %v860_v21 = vpop.permute.xlu1 %859  ;;  %v864_v60 = vpop.permute.xlu0 %863 }
 0x1b5   :  { %v742_v8 = vpop.f32.mrf.mxu0 }
 0x1b6   :  { %v830_v13 = vmax.f32 %v742_v8, 0.0  ;;  %v819_v14 = vpop.f32.mrf.mxu1 }
 0x1b7   :  { %v832_v15 = vmax.f32 %v819_v14, 0.0  ;;  %v744_v19 = vpop.f32.mrf.mxu0 }
 0x1b8   :  { %v850_v23 = vmul.f32 %v843_v11, %v830_v13  ;;  %v831_v20 = vmax.f32 %v744_v19, 0.0  ;;  %v821_v35 = vpop.f32.mrf.mxu1 }
 0x1b9   :  { %v852_v26 = vmul.f32 %v843_v11, %v832_v15  ;;  %v833_v38 = vmax.f32 %v821_v35, 0.0  ;;  %v748_v52 = vpop.f32.mrf.mxu0 }
 0x1ba   :  { %v4246_v29 = vadd.f32 %v860_v21, %v850_v23  ;;  %v851_v37 = vmul.f32 %v843_v11, %v831_v20  ;;  %v825_v50 = vpop.f32.mrf.mxu1  ;;  %v834_v55 = vmax.f32 %v748_v52, 0.0  ;;  %v1291_v20 = vld [vmem:[%s6350_s2 + $0x18] sm:$0xff] }
 0x1bb   :  { %v4248_v34 = vadd.f32 %v860_v21, %v852_v26  ;;  %v853_v42 = vmul.f32 %v843_v11, %v833_v38  ;;  %v836_v51 = vmax.f32 %v825_v50, 0.0  ;;  %v750_v8 = vpop.f32.mrf.mxu0  ;;  %3674 = vmatprep.mubr.msk.f32.mxu0 %vm669_vm0, %v1291_v20  ;;  %3678 = vmatprep.mubr.msk.f32.mxu1 %vm669_vm0, %v1291_v20 }
 0x1bc   :  { %1190 = vrot.lane.b32.xlu0 %v4246_v29, %s3730_s19  ;;  %v4270_v43 = vadd.f32 %v860_v21, %v851_v37  ;;  %v854_v9 = vmul.f32 %v4244_v5, %v834_v55  ;;  %v827_v10 = vpop.f32.mrf.mxu1  ;;  %v835_v13 = vmax.f32 %v750_v8, 0.0  ;;  %v1583_v55 = vld [vmem:[%s6351_s3 + $0x18] sm:$0xff] }
 0x1bd   :  { %1194 = vrot.lane.b32.xlu1 %v4248_v34, %s3730_s19  ;;  %v4276_v44 = vadd.f32 %v860_v21, %v853_v42  ;;  %v856_v58 = vmul.f32 %v4244_v5, %v836_v51  ;;  %v837_v11 = vmax.f32 %v827_v10, 0.0 }
 0x1be   :  { %v4314_v4 = vadd.f32 %v864_v60, %v854_v9  ;;  %v855_v15 = vmul.f32 %v4244_v5, %v835_v13  ;;  %v3741_v9 = vmov 2   ;;  %v3742_v13 = vmov 3  }
 0x1bf   :  { %v4308_v61 = vadd.f32 %v864_v60, %v856_v58  ;;  %v857_v14 = vmul.f32 %v4244_v5, %v837_v11  ;;  %v1582_v58 = vld [vmem:[%s6351_s3 + $0x10] sm:$0xff]  ;;  %3711 = vset.pattern.permute.xlu1 %v3741_v9  ;;  %3710 = vset.pattern.permute.xlu0 %v3741_v9 }
 0x1c0   :  { %1144 = vrot.lane.b32.xlu0 %v4248_v34, %s3731_s24  ;;  %v4348_v23 = vadd.f32 %v864_v60, %v855_v15 }
 0x1c1   :  { %1038 = vrot.lane.b32.xlu1 %v4246_v29, %s3733_s0  ;;  %v4346_v21 = vadd.f32 %v864_v60, %v857_v14 }
 0x1c4   :  { %1140 = vrot.lane.b32.xlu0 %v4246_v29, %s3731_s24 }
 0x1c5   :  { %1042 = vrot.lane.b32.xlu1 %v4248_v34, %s3733_s0 }
 0x1c8   :  { %1094 = vrot.lane.b32.xlu0 %v4248_v34, %s3732_s7 }
 0x1c9   :  { %988 = vrot.lane.b32.xlu1 %v4246_v29, %s3734_s8 }
 0x1cc   :  { %1090 = vrot.lane.b32.xlu0 %v4246_v29, %s3732_s7 }
 0x1cd   :  { %992 = vrot.lane.b32.xlu1 %v4248_v34, %s3734_s8 }
 0x1d0   :  { %1040 = vrot.lane.b32.xlu0 %v4270_v43, %s3733_s0 }
 0x1d1   :  { %938 = vrot.lane.b32.xlu1 %v4246_v29, %s3735_s9 }
 0x1d4   :  { %1032 = vrot.lane.b32.xlu0 %v4276_v44, %s3733_s0 }
 0x1d5   :  { %942 = vrot.lane.b32.xlu1 %v4248_v34, %s3735_s9 }
 0x1d8   :  { %990 = vrot.lane.b32.xlu0 %v4270_v43, %s3734_s8 }
 0x1d9   :  { %888 = vrot.lane.b32.xlu1 %v4246_v29, %s3736_s10 }
 0x1dc   :  { %982 = vrot.lane.b32.xlu0 %v4276_v44, %s3734_s8 }
 0x1dd   :  { %1192 = vrot.lane.b32.xlu1 %v4270_v43, %s3730_s19 }
 0x1e0   :  { %940 = vrot.lane.b32.xlu0 %v4270_v43, %s3735_s9 }
 0x1e1   :  { %1196 = vrot.lane.b32.xlu1 %v4276_v44, %s3730_s19 }
 0x1e4   :  { %932 = vrot.lane.b32.xlu0 %v4276_v44, %s3735_s9 }
 0x1e5   :  { %1142 = vrot.lane.b32.xlu1 %v4270_v43, %s3731_s24 }
 0x1e8   :  { %890 = vrot.lane.b32.xlu0 %v4270_v43, %s3736_s10 }
 0x1e9   :  { %1146 = vrot.lane.b32.xlu1 %v4276_v44, %s3731_s24 }
 0x1ec   :  { %876 = vrot.lane.b32.xlu0 %v4276_v44, %s3736_s10 }
 0x1ed   :  { %1092 = vrot.lane.b32.xlu1 %v4270_v43, %s3732_s7 }
 0x1f0   :  { %1152 = vrot.lane.b32.xlu0 %v4308_v61, %s3731_s24 }
 0x1f1   :  { %1096 = vrot.lane.b32.xlu1 %v4276_v44, %s3732_s7 }
 0x1f4   :  { %1148 = vrot.lane.b32.xlu0 %v4314_v4, %s3731_s24 }
 0x1f5   :  { %1048 = vrot.lane.b32.xlu1 %v4308_v61, %s3733_s0 }
 0x1f8   :  { %1102 = vrot.lane.b32.xlu0 %v4308_v61, %s3732_s7 }
 0x1f9   :  { %994 = vrot.lane.b32.xlu1 %v4314_v4, %s3734_s8 }
 0x1fc   :  { %1098 = vrot.lane.b32.xlu0 %v4314_v4, %s3732_s7 }
 0x1fd   :  { %998 = vrot.lane.b32.xlu1 %v4308_v61, %s3734_s8 }
 0x200   :  { %1044 = vrot.lane.b32.xlu0 %v4314_v4, %s3733_s0 }
 0x201   :  { %944 = vrot.lane.b32.xlu1 %v4314_v4, %s3735_s9 }
 0x204   :  { %1248 = vrot.lane.b32.xlu0 %v4314_v4, %s3737_s11 }
 0x205   :  { %948 = vrot.lane.b32.xlu1 %v4308_v61, %s3735_s9 }
 0x208   :  { %1244 = vrot.lane.b32.xlu0 %v4248_v34, %s3737_s11 }
 0x209   :  { %894 = vrot.lane.b32.xlu1 %v4314_v4, %s3736_s10 }
 0x20c   :  { %1240 = vrot.lane.b32.xlu0 %v4246_v29, %s3737_s11 }
 0x20d   :  { %898 = vrot.lane.b32.xlu1 %v4308_v61, %s3736_s10 }
 0x210   :  { %1034 = vrot.lane.b32.xlu0 %v4346_v21, %s3733_s0 }
 0x211   :  { %1150 = vrot.lane.b32.xlu1 %v4348_v23, %s3731_s24 }
 0x214   :  { %996 = vrot.lane.b32.xlu0 %v4348_v23, %s3734_s8 }
 0x215   :  { %1154 = vrot.lane.b32.xlu1 %v4346_v21, %s3731_s24 }
 0x218   :  { %984 = vrot.lane.b32.xlu0 %v4346_v21, %s3734_s8 }
 0x219   :  { %1100 = vrot.lane.b32.xlu1 %v4348_v23, %s3732_s7 }
 0x21c   :  { %946 = vrot.lane.b32.xlu0 %v4348_v23, %s3735_s9 }
 0x21d   :  { %1104 = vrot.lane.b32.xlu1 %v4346_v21, %s3732_s7 }
 0x220   :  { %934 = vrot.lane.b32.xlu0 %v4346_v21, %s3735_s9 }
 0x221   :  { %892 = vrot.lane.b32.xlu1 %v4248_v34, %s3736_s10 }
 0x224   :  { %896 = vrot.lane.b32.xlu0 %v4348_v23, %s3736_s10 }
 0x225   :  { %1046 = vrot.lane.b32.xlu1 %v4348_v23, %s3733_s0 }
 0x228   :  { %878 = vrot.lane.b32.xlu0 %v4346_v21, %s3736_s10 }
 0x229   :  { %1252 = vrot.lane.b32.xlu1 %v4308_v61, %s3737_s11 }
 0x22c   :  { %1250 = vrot.lane.b32.xlu0 %v4348_v23, %s3737_s11 }
 0x22d   :  { %1242 = vrot.lane.b32.xlu1 %v4270_v43, %s3737_s11 }
 0x22e   :  { %v1191_v5 = vpop.permute.xlu0 %1190 }
 0x22f   :  { %v1195_v26 = vpop.permute.xlu1 %1194 }
 0x230   :  { %1202 = vrot.lane.b32.xlu0 %v4308_v61, %s3730_s19 }
 0x231   :  { %1246 = vrot.lane.b32.xlu1 %v4276_v44, %s3737_s11 }
 0x232   :  { %v4386_v19 = vpop.permute.xlu0 %1144 }
 0x233   :  { %v4391_v35 = vpop.permute.xlu1 %1038 }
 0x234   :  { %1198 = vrot.lane.b32.xlu0 %v4314_v4, %s3730_s19 }
 0x235   :  { %1254 = vrot.lane.b32.xlu1 %v4346_v21, %s3737_s11 }
 0x236   :  { %v4399_v37 = vpop.permute.xlu0 %1140 }
 0x237   :  { %v4401_v38 = vpop.permute.xlu1 %1042 }
 0x238   :  { %1596 = vperm.xlu0 %3710, %v1582_v58  }
 0x239   :  { %1200 = vrot.lane.b32.xlu1 %v4348_v23, %s3730_s19 }
 0x23a   :  { %v4405_v42 = vpop.permute.xlu0 %1094 }
 0x23b   :  { %v4407_v50 = vpop.permute.xlu1 %988 }
 0x23c   :  { %3712 = vset.pattern.permute.xlu0 %v3742_v13 }
 0x23d   :  { %1204 = vrot.lane.b32.xlu1 %v4346_v21, %s3730_s19  ;;  %1629 = vperm.xlu0 %3712, %v1582_v58  }
 0x23e   :  { %v4411_v51 = vpop.permute.xlu0 %1090 }
 0x23f   :  { %v4413_v52 = vpop.permute.xlu1 %992 }
 0x241   :  { %1601 = vperm.xlu1 %3711, %v1583_v55   ;;  %1625 = vperm.xlu0 %3712, %v4001_v40  }
 0x242   :  { %v4421_v60 = vpop.permute.xlu0 %1040 }
 0x243   :  { %v4423_v10 = vpop.permute.xlu1 %938 }
 0x245   :  { %1591 = vperm.xlu1 %3711, %v4001_v40  }
 0x246   :  { %v4425_v8 = vpop.permute.xlu0 %1032 }
 0x247   :  { %v4427_v11 = vpop.permute.xlu1 %942 }
 0x249   :  { %3713 = vset.pattern.permute.xlu1 %v3742_v13 }
 0x24a   :  { %v4430_v14 = vpop.permute.xlu0 %990  ;;  %1633 = vperm.xlu1 %3713, %v1583_v55  }
 0x24b   :  { %v4432_v15 = vpop.permute.xlu1 %888 }
 0x24c   :  { %6560 = vst [vmem:[#allocation34_spill] sm:$0xff] %v4432_v15 }
 0x24e   :  { %v4435_v20 = vpop.permute.xlu0 %982  ;;  %3714 = vset.pattern.permute.xlu1 %v3741_v9 }
 0x24f   :  { %v1193_v53 = vpop.permute.xlu1 %1192  ;;  %1586 = vperm.xlu1 %3714, %v4006_v41  }
 0x250   :  { %v1206_v6 = vsel %vm471_vm1, %v1191_v5, %v1193_v53  ;;  %v1207_v57 = vsel %vm471_vm1, %v1193_v53, %v1195_v26 }
 0x251   :  { %v1224_v3 = vmul.f32 %v1206_v6, %v3956_v18  ;;  %v1225_v58 = vmul.f32 %v1207_v57, %v3953_v17 }
 0x252   :  { %v4442_v45 = vpop.permute.xlu0 %940 }
 0x253   :  { %1386 = vmatprep.subr.mxu0 %v1225_v58  ;;  %v1197_v55 = vpop.permute.xlu1 %1196  ;;  %3715 = vset.pattern.permute.xlu1 %v3742_v13 }
 0x254   :  { %v1208_v40 = vsel %vm471_vm1, %v1195_v26, %v1197_v55  ;;  %v1222_v1 = vsel %vm471_vm1, %v1197_v55, %v1191_v5  ;;  %1387 = vmatpush1.msra.mxu0 %v1224_v3  ;;  %1621 = vperm.xlu1 %3715, %v4006_v41  }
 0x255   :  { %v1226_v12 = vmul.f32 %v1208_v40, %v3982_v28  ;;  %v1227_v53 = vmul.f32 %v1222_v1, %v3979_v27 }
 0x256   :  { %v4448_v9 = vpop.permute.xlu0 %932 }
 0x257   :  { %6561 = vst [vmem:[#allocation35_spill] sm:$0xff] %v4448_v9  ;;  %v1143_v57 = vpop.permute.xlu1 %1142  ;;  %1475 = vmatprep.subr.mxu1 %v1227_v53 }
 0x258   :  { %1476 = vmatpush1.msra.mxu1 %v1226_v12  ;;  %v1157_v7 = vsel %vm404_vm2, %v1143_v57, %v4386_v19  ;;  %v1156_v33 = vsel %vm404_vm2, %v4399_v37, %v1143_v57 }
 0x25a   :  { %v4451_v6 = vpop.permute.xlu0 %890 }
 0x25b   :  { %6562 = vst [vmem:[#allocation36_spill] sm:$0xff] %v4451_v6  ;;  %v1147_v58 = vpop.permute.xlu1 %1146 }
 0x25c   :  { %v1172_v48 = vsel %vm404_vm2, %v1147_v58, %v4399_v37 }
 0x25d   :  { %v1177_v37 = vmul.f32 %v1172_v48, %v4011_v46 }
 0x25e   :  { %v4453_v18 = vpop.permute.xlu0 %876 }
 0x25f   :  { %6563 = vst [vmem:[#allocation37_spill] sm:$0xff] %v4453_v18  ;;  %v1093_v26 = vpop.permute.xlu1 %1092 }
 0x262   :  { %v1153_v5 = vpop.permute.xlu0 %1152 }
 0x263   :  { %v1097_v3 = vpop.permute.xlu1 %1096 }
 0x266   :  { %v1149_v55 = vpop.permute.xlu0 %1148 }
 0x267   :  { %v4455_v40 = vpop.permute.xlu1 %1048 }
 0x26a   :  { %v1103_v1 = vpop.permute.xlu0 %1102 }
 0x26b   :  { %v4457_v13 = vpop.permute.xlu1 %994 }
 0x26e   :  { %v1099_v27 = vpop.permute.xlu0 %1098 }
 0x26f   :  { %v4459_v28 = vpop.permute.xlu1 %998 }
 0x272   :  { %v4461_v41 = vpop.permute.xlu0 %1044 }
 0x273   :  { %v4463_v12 = vpop.permute.xlu1 %944 }
 0x274   :  { %6564 = vst [vmem:[#allocation38_spill] sm:$0xff] %v4463_v12  ;;  %v1174_v12 = vmul.f32 %v1156_v33, %v3989_v36 }
 0x276   :  { %v4465_v53 = vpop.permute.xlu0 %1248 }
 0x277   :  { %6565 = vst [vmem:[#allocation39_spill] sm:$0xff] %v4465_v53  ;;  %v4467_v17 = vpop.permute.xlu1 %948 }
 0x278   :  { %6566 = vst [vmem:[#allocation40_spill] sm:$0xff] %v4467_v17  ;;  %v1175_v17 = vmul.f32 %v1157_v7, %v3971_v25 }
 0x27a   :  { %v4469_v2 = vpop.permute.xlu0 %1244 }
 0x27b   :  { %6567 = vst [vmem:[#allocation41_spill] sm:$0xff] %v4469_v2  ;;  %v4471_v56 = vpop.permute.xlu1 %894 }
 0x27c   :  { %6568 = vst [vmem:[#allocation42_spill] sm:$0xff] %v4471_v56 }
 0x27e   :  { %v4473_v18 = vpop.permute.xlu0 %1240 }
 0x27f   :  { %6569 = vst [vmem:[#allocation43_spill] sm:$0xff] %v4473_v18  ;;  %v4475_v15 = vpop.permute.xlu1 %898 }
 0x280   :  { %6570 = vst [vmem:[#allocation44_spill] sm:$0xff] %v4475_v15 }
 0x282   :  { %v4477_v6 = vpop.permute.xlu0 %1034 }
 0x283   :  { %v1151_v32 = vpop.permute.xlu1 %1150 }
 0x284   :  { %v1159_v16 = vsel %vm404_vm2, %v1149_v55, %v1151_v32  ;;  %v1160_v53 = vsel %vm404_vm2, %v1151_v32, %v1153_v5 }
 0x285   :  { %v1178_v2 = vmul.f32 %v1159_v16, %v3989_v36  ;;  %v1179_v56 = vmul.f32 %v1160_v53, %v3971_v25  ;;  %v1158_v16 = vsel %vm404_vm2, %v4386_v19, %v1147_v58 }
 0x286   :  { %v4487_v18 = vpop.permute.xlu0 %996 }
 0x287   :  { %v1155_v15 = vpop.permute.xlu1 %1154  ;;  %1388 = vmatprep.subr.mxu0 %v1179_v56 }
 0x288   :  { %v1161_v32 = vsel %vm404_vm2, %v1153_v5, %v1155_v15  ;;  %v1173_v9 = vsel %vm404_vm2, %v1155_v15, %v1149_v55  ;;  %1389 = vmatpush1.msra.mxu0 %v1178_v2  ;;  %v1176_v5 = vmul.f32 %v1158_v16, %v4014_v47  ;;  %v1107_v2 = vsel %vm337_vm3, %v1093_v26, %v4405_v42 }
 0x289   :  { %v1180_v57 = vmul.f32 %v1161_v32, %v4014_v47  ;;  %1390 = vmatprep.subr.mxu0 %v1175_v17  ;;  %v1181_v56 = vmul.f32 %v1173_v9, %v4011_v46  ;;  %v1106_v17 = vsel %vm337_vm3, %v4411_v51, %v1093_v26  ;;  %v1122_v32 = vsel %vm337_vm3, %v1097_v3, %v4411_v51 }
 0x28a   :  { %1391 = vmatpush1.msra.mxu0 %v1174_v12  ;;  %v4499_v7 = vpop.permute.xlu0 %984  ;;  %v1125_v12 = vmul.f32 %v1107_v2, %v4030_v62  ;;  %v1124_v53 = vmul.f32 %v1106_v17, %v4039_v22  ;;  %v1001_v2 = vsel %vm197_vm5, %v4430_v14, %v4413_v52 }
 0x28b   :  { %v1101_v33 = vpop.permute.xlu1 %1100  ;;  %1477 = vmatprep.subr.mxu1 %v1181_v56 }
 0x28c   :  { %v1109_v15 = vsel %vm337_vm3, %v1099_v27, %v1101_v33  ;;  %v1110_v19 = vsel %vm337_vm3, %v1101_v33, %v1103_v1  ;;  %1478 = vmatpush1.msra.mxu1 %v1180_v57  ;;  %v1108_v57 = vsel %vm337_vm3, %v4405_v42, %v1097_v3  ;;  %v1052_v42 = vsel %vm264_vm4, %v4401_v38, %v4425_v8 }
 0x28d   :  { %v1128_v9 = vmul.f32 %v1109_v15, %v4039_v22  ;;  %1479 = vmatprep.subr.mxu1 %v1177_v37  ;;  %v1129_v58 = vmul.f32 %v1110_v19, %v4030_v62  ;;  %v1050_v37 = vsel %vm264_vm4, %v4391_v35, %v4421_v60  ;;  %v1127_v3 = vmul.f32 %v1122_v32, %v4044_v30 }
 0x28e   :  { %1480 = vmatpush1.msra.mxu1 %v1176_v5  ;;  %v4511_v48 = vpop.permute.xlu0 %946  ;;  %v1069_v17 = vmul.f32 %v1052_v42, %v4081_v63  ;;  %v1002_v32 = vsel %vm197_vm5, %v4413_v52, %v4435_v20  ;;  %v6575_v42 = vld [vmem:[#allocation25_spill] sm:$0xff] }
 0x28f   :  { %v1105_v55 = vpop.permute.xlu1 %1104  ;;  %1392 = vmatprep.subr.mxu0 %v1129_v58 }
 0x290   :  { %v1111_v16 = vsel %vm337_vm3, %v1103_v1, %v1105_v55  ;;  %v1123_v26 = vsel %vm337_vm3, %v1105_v55, %v1099_v27  ;;  %1393 = vmatpush1.msra.mxu0 %v1128_v9  ;;  %v1051_v27 = vsel %vm264_vm4, %v4421_v60, %v4401_v38  ;;  %v1064_v1 = vsel %vm264_vm4, %v4425_v8, %v4391_v35 }
 0x291   :  { %v1130_v56 = vmul.f32 %v1111_v16, %v4047_v31  ;;  %1394 = vmatprep.subr.mxu0 %v1125_v12  ;;  %v1131_v33 = vmul.f32 %v1123_v26, %v4044_v30  ;;  %v1126_v60 = vmul.f32 %v1108_v57, %v4047_v31  ;;  %v1068_v38 = vmul.f32 %v1051_v27, %v4084_v0  ;;  %v6572_v57 = vld [vmem:[#allocation20_spill] sm:$0xff] }
 0x292   :  { %1395 = vmatpush1.msra.mxu0 %v1124_v53  ;;  %v4526_v5 = vpop.permute.xlu0 %934  ;;  %v1055_v35 = vsel %vm264_vm4, %v4455_v40, %v4477_v6  ;;  %v1066_v15 = vmul.f32 %v1064_v1, %v4070_v59  ;;  %v1015_v53 = vsel %vm197_vm5, %v4499_v7, %v4457_v13 }
 0x293   :  { %v4534_v51 = vpop.permute.xlu1 %892  ;;  %1396 = vmatprep.subr.mxu0 %v4348_v23  ;;  %1481 = vmatprep.subr.mxu1 %v1131_v33  ;;  %v1000_v23 = vsel %vm197_vm5, %v4407_v50, %v4430_v14  ;;  %v4560_v14 = vmul.f32 %v1001_v2, %v4113_v49  ;;  %v1073_v12 = vmul.f32 %v1055_v35, %v4081_v63  ;;  %v6573_v33 = vld [vmem:[#allocation38_spill] sm:$0xff] }
 0x294   :  { %1397 = vmatpush1.msra.mxu0 %v4314_v4  ;;  %1482 = vmatpush1.msra.mxu1 %v1130_v56  ;;  %v1067_v4 = vmul.f32 %v1050_v37, %v4063_v54  ;;  %v1017_v55 = vmul.f32 %v1000_v23, %v4096_v24  ;;  %v6574_v37 = vld [vmem:[#allocation40_spill] sm:$0xff]  ;;  %v965_v1 = vsel %vm130_vm6, %v4526_v5, %v6573_v33  ;;  %v6576_v23 = vld [vmem:[#allocation23_spill] sm:$0xff] }
 0x295   :  { %1398 = vmatprep.subr.mxu0 %v4270_v43  ;;  %1483 = vmatprep.subr.mxu1 %v1127_v3  ;;  %v1065_v43 = vsel %vm264_vm4, %v4477_v6, %v4461_v41  ;;  %v955_v27 = vsel %vm130_vm6, %v6574_v37, %v4526_v5 }
 0x296   :  { %1399 = vmatpush1.msra.mxu0 %v4246_v29  ;;  %1484 = vmatpush1.msra.mxu1 %v1126_v60  ;;  %v4555_v8 = vpop.permute.xlu0 %896  ;;  %v1014_v29 = vsel %vm197_vm5, %v4435_v20, %v4407_v50  ;;  %v1020_v20 = vmul.f32 %v1015_v53, %v4105_v39  ;;  %v1019_v60 = vmul.f32 %v1002_v32, %v6572_v57  ;;  %v6583_v53 = vld [vmem:[#allocation37_spill] sm:$0xff]  ;;  %v6584_v32 = vld [vmem:[#allocation26_spill] sm:$0xff] }
 0x297   :  { %v1047_v19 = vpop.permute.xlu1 %1046  ;;  %1485 = vmatprep.subr.mxu1 %v4346_v21  ;;  %v1004_v21 = vsel %vm197_vm5, %v4487_v18, %v4459_v28  ;;  %v1016_v16 = vmul.f32 %v1014_v29, %v4105_v39  ;;  %v970_v29 = vmul.f32 %v965_v1, %v6576_v23 }
 0x298   :  { %v1053_v9 = vsel %vm264_vm4, %v4461_v41, %v1047_v19  ;;  %v1054_v58 = vsel %vm264_vm4, %v1047_v19, %v4455_v40  ;;  %1486 = vmatpush1.msra.mxu1 %v4308_v61  ;;  %v1070_v41 = vmul.f32 %v1065_v43, %v4070_v59  ;;  %v1003_v61 = vsel %vm197_vm5, %v4457_v13, %v4487_v18  ;;  %v6578_v19 = vld [vmem:[#allocation24_spill] sm:$0xff] }
 0x299   :  { %v1072_v6 = vmul.f32 %v1054_v58, %v4084_v0  ;;  %1487 = vmatprep.subr.mxu1 %v4276_v44  ;;  %v1071_v50 = vmul.f32 %v1053_v9, %v4063_v54  ;;  %v1005_v40 = vsel %vm197_vm5, %v4459_v28, %v4499_v7  ;;  %v950_v18 = vsel %vm130_vm6, %v4423_v10, %v4442_v45  ;;  %v6579_v9 = vld [vmem:[#allocation42_spill] sm:$0xff]  ;;  %v6580_v58 = vld [vmem:[#allocation44_spill] sm:$0xff] }
 0x29a   :  { %1488 = vmatpush1.msra.mxu1 %v4248_v34  ;;  %v879_v44 = vpop.permute.xlu0 %878  ;;  %v951_v28 = vsel %vm130_vm6, %v4442_v45, %v4427_v11  ;;  %v6571_v34 = vld [vmem:[#allocation35_spill] sm:$0xff]  ;;  %v1022_v52 = vmul.f32 %v1004_v21, %v4113_v49  ;;  %v1021_v7 = vmul.f32 %v1003_v61, %v4096_v24  ;;  %v1023_v56 = vmul.f32 %v1005_v40, %v6572_v57  ;;  %v6582_v61 = vld [vmem:[#allocation34_spill] sm:$0xff] }
 0x29b   :  { %v4601_v26 = vpop.permute.xlu1 %1252  ;;  %1400 = vmatprep.subr.mxu0 %v1071_v50  ;;  %1489 = vmatprep.subr.mxu1 %v1073_v12  ;;  %v964_v13 = vsel %vm130_vm6, %v6571_v34, %v4423_v10  ;;  %v953_v45 = vsel %vm130_vm6, %v6573_v33, %v4511_v48  ;;  %v954_v10 = vsel %vm130_vm6, %v4511_v48, %v6574_v37 }
 0x29c   :  { %1401 = vmatpush1.msra.mxu0 %v1070_v41  ;;  %1490 = vmatpush1.msra.mxu1 %v1072_v6  ;;  %v968_v3 = vmul.f32 %v951_v28, %v6575_v42  ;;  %v952_v48 = vsel %vm130_vm6, %v4427_v11, %v6571_v34  ;;  %v966_v35 = vmul.f32 %v964_v13, %v6576_v23  ;;  %v6581_v41 = vld [vmem:[#allocation36_spill] sm:$0xff]  ;;  %v6586_v34 = vld [vmem:[#allocation29_spill] sm:$0xff] }
 0x29d   :  { %1402 = vmatprep.subr.mxu0 %v1067_v4  ;;  %1491 = vmatprep.subr.mxu1 %v1069_v17  ;;  %v972_v43 = vmul.f32 %v954_v10, %v6575_v42  ;;  %v973_v17 = vmul.f32 %v955_v27, %v6578_v19  ;;  %v903_v11 = vsel %vm63_vm7, %v6579_v9, %v4555_v8  ;;  %v6588_v27 = vld [vmem:[#allocation39_spill] sm:$0xff] }
 0x29e   :  { %1403 = vmatpush1.msra.mxu0 %v1066_v15  ;;  %1492 = vmatpush1.msra.mxu1 %v1068_v38  ;;  %v1251_v4 = vpop.permute.xlu0 %1250  ;;  %v6577_v38 = vld [vmem:[#allocation22_spill] sm:$0xff]  ;;  %v905_v21 = vsel %vm63_vm7, %v6580_v58, %v879_v44  ;;  %v915_v6 = vsel %vm63_vm7, %v879_v44, %v6579_v9  ;;  %v969_v12 = vmul.f32 %v952_v48, %v6578_v19  ;;  %v6589_v48 = vld [vmem:[#allocation43_spill] sm:$0xff] }
 0x29f   :  { %v1243_v2 = vpop.permute.xlu1 %1242  ;;  %1404 = vmatprep.subr.mxu0 %v1021_v7  ;;  %1493 = vmatprep.subr.mxu1 %v1023_v56  ;;  %v967_v15 = vmul.f32 %v950_v18, %v6577_v38  ;;  %v971_v5 = vmul.f32 %v953_v45, %v6577_v38  ;;  %v900_v40 = vsel %vm63_vm7, %v6582_v61, %v6581_v41  ;;  %v6585_v18 = vld [vmem:[#allocation28_spill] sm:$0xff] }
 0x2a0   :  { %1405 = vmatpush1.msra.mxu0 %v1020_v20  ;;  %1494 = vmatpush1.msra.mxu1 %v1022_v52  ;;  %v901_v44 = vsel %vm63_vm7, %v6581_v41, %v4534_v51  ;;  %v923_v28 = vmul.f32 %v905_v21, %v6585_v18  ;;  %v6587_v52 = vld [vmem:[#allocation27_spill] sm:$0xff]  ;;  %v1260_v10 = vsel %vm538_vm8, %v1251_v4, %v4601_v26 }
 0x2a1   :  { %1406 = vmatprep.subr.mxu0 %v1017_v55  ;;  %1495 = vmatprep.subr.mxu1 %v1019_v60  ;;  %v904_v55 = vsel %vm63_vm7, %v4555_v8, %v6580_v58  ;;  %v902_v8 = vsel %vm63_vm7, %v4534_v51, %v6583_v53  ;;  %v920_v20 = vmul.f32 %v915_v6, %v6587_v52  ;;  %v6594_v21 = vld [vmem:[#allocation31_spill] sm:$0xff]  ;;  %v6595_v6 = vld [vmem:[#allocation33_spill] sm:$0xff] }
 0x2a2   :  { %1407 = vmatpush1.msra.mxu0 %v1016_v16  ;;  %1496 = vmatpush1.msra.mxu1 %v4560_v14  ;;  %v914_v14 = vsel %vm63_vm7, %v6583_v53, %v6582_v61  ;;  %v921_v16 = vmul.f32 %v903_v11, %v6584_v32  ;;  %v922_v13 = vmul.f32 %v904_v55, %v6586_v34  ;;  %v1203_v7 = vpop.permute.xlu0 %1202  ;;  %v6593_v11 = vld [vmem:[#allocation32_spill] sm:$0xff] }
 0x2a3   :  { %v1247_v50 = vpop.permute.xlu1 %1246  ;;  %1408 = vmatprep.subr.mxu0 %v971_v5  ;;  %1497 = vmatprep.subr.mxu1 %v973_v17  ;;  %v916_v56 = vmul.f32 %v914_v14, %v6587_v52  ;;  %v917_v51 = vmul.f32 %v900_v40, %v6584_v32  ;;  %v919_v45 = vmul.f32 %v902_v8, %v6585_v18 }
 0x2a4   :  { %1409 = vmatpush1.msra.mxu0 %v970_v29  ;;  %1498 = vmatpush1.msra.mxu1 %v972_v43  ;;  %v918_v37 = vmul.f32 %v901_v44, %v6586_v34  ;;  %v1272_v5 = vsel %vm538_vm8, %v1247_v50, %v6589_v48  ;;  %v6591_v29 = vmov 1.0   ;;  %v6596_v44 = vld [vmem:[#allocation3_spill] sm:$0xff] }
 0x2a5   :  { %1410 = vmatprep.subr.mxu0 %v967_v15  ;;  %1499 = vmatprep.subr.mxu1 %v969_v12  ;;  %v6590_v15 = vld [vmem:[#allocation41_spill] sm:$0xff]  ;;  %v1277_v40 = vmul.f32 %v6593_v11, %v1272_v5 }
 0x2a6   :  { %1411 = vmatpush1.msra.mxu0 %v966_v35  ;;  %1500 = vmatpush1.msra.mxu1 %v968_v3  ;;  %v1259_v3 = vsel %vm538_vm8, %v6588_v27, %v1251_v4  ;;  %v1256_v35 = vsel %vm538_vm8, %v6589_v48, %v1243_v2  ;;  %v1257_v43 = vsel %vm538_vm8, %v1243_v2, %v6590_v15  ;;  %v1199_v2 = vpop.permute.xlu0 %1198  ;;  %v1296_v48 = vld [vmem:[%s6350_s2 + $0xe8] sm:$0xff] }
 0x2a7   :  { %v1255_v33 = vpop.permute.xlu1 %1254  ;;  %1412 = vmatprep.subr.mxu0 %v921_v16  ;;  %1501 = vmatprep.subr.mxu1 %v923_v28  ;;  %v1258_v17 = vsel %vm538_vm8, %v6590_v15, %v1247_v50  ;;  %v1278_v55 = vmul.f32 %v6594_v21, %v1259_v3  ;;  %v1274_v53 = vmul.f32 %v6594_v21, %v1256_v35  ;;  %v6597_v28 = vld [vmem:[#allocation4_spill] sm:$0xff]  ;;  %v1294_v3 = vld [vmem:[%s6350_s2 + $0xa0] sm:$0xff] }
 0x2a8   :  { %v1273_v1 = vsel %vm538_vm8, %v1255_v33, %v6588_v27  ;;  %1413 = vmatpush1.msra.mxu0 %v920_v20  ;;  %1502 = vmatpush1.msra.mxu1 %v922_v13  ;;  %v1261_v60 = vsel %vm538_vm8, %v4601_v26, %v1255_v33  ;;  %v6592_v26 = vld [vmem:[#allocation30_spill] sm:$0xff]  ;;  %v1276_v14 = vmul.f32 %v6595_v6, %v1258_v17  ;;  %v1290_v33 = vld [vmem:[%s6350_s2 + $0x10] sm:$0xff]  ;;  %v1293_v27 = vld [vmem:[%s6350_s2 + $0x60] sm:$0xff] }
 0x2a9   :  { %1414 = vmatprep.subr.mxu0 %v917_v51  ;;  %1503 = vmatprep.subr.mxu1 %v919_v45  ;;  %v1279_v9 = vmul.f32 %v6592_v26, %v1260_v10  ;;  %v1281_v58 = vmul.f32 %v6593_v11, %v1273_v1  ;;  %v1280_v12 = vmul.f32 %v6595_v6, %v1261_v60  ;;  %v6598_v51 = vld [vmem:[#allocation7_spill] sm:$0xff]  ;;  %v1295_v1 = vld [vmem:[%s6350_s2 + $0xa8] sm:$0xff]  ;;  %v1297_v60 = vld [vmem:[%s6350_s2 + $0xf0] sm:$0xff] }
 0x2aa   :  { %1415 = vmatpush1.msra.mxu0 %v916_v56  ;;  %1504 = vmatpush1.msra.mxu1 %v918_v37  ;;  %v1275_v61 = vmul.f32 %v6592_v26, %v1257_v43  ;;  %v6599_v37 = vld [vmem:[#allocation6_spill] sm:$0xff] }
 0x2ab   :  { %v1201_v4 = vpop.permute.xlu1 %1200  ;;  %1416 = vmatprep.subr.mxu0 %v6591_v29  ;;  %1505 = vmatprep.subr.mxu1 %v6591_v29 }
 0x2ac   :  { %v1210_v41 = vsel %vm471_vm1, %v1201_v4, %v1203_v7  ;;  %1417 = vmatpush1.msra.mxu0 %v6591_v29  ;;  %1506 = vmatpush1.msra.mxu1 %v6591_v29  ;;  %v1209_v50 = vsel %vm471_vm1, %v1199_v2, %v1201_v4 }
 0x2ad   :  { %1444 = vmatprep.subr.mxu0 %v1279_v9  ;;  %1533 = vmatprep.subr.mxu1 %v1281_v58  ;;  %v1229_v16 = vmul.f32 %v1210_v41, %v6596_v44  ;;  %v1228_v13 = vmul.f32 %v1209_v50, %v6597_v28 }
 0x2ae   :  { %1445 = vmatpush2.msra.mxu0 %v1278_v55  ;;  %1534 = vmatpush2.msra.mxu1 %v1280_v12 }
 0x2af   :  { %v1205_v8 = vpop.permute.xlu1 %1204  ;;  %1446 = vmatprep.subr.mxu0 %v1275_v61  ;;  %1535 = vmatprep.subr.mxu1 %v1277_v40 }
 0x2b0   :  { %v1211_v20 = vsel %vm471_vm1, %v1203_v7, %v1205_v8  ;;  %v1223_v56 = vsel %vm471_vm1, %v1205_v8, %v1199_v2  ;;  %1447 = vmatpush2.msra.mxu0 %v1274_v53  ;;  %1536 = vmatpush2.msra.mxu1 %v1276_v14  ;;  %v1292_v7 = vld [vmem:[%s6350_s2 + $0x58] sm:$0xff] }
 0x2b1   :  { %v1230_v45 = vmul.f32 %v1211_v20, %v6598_v51  ;;  %1448 = vmatprep.subr.mxu0 %v1229_v16  ;;  %v1231_v10 = vmul.f32 %v1223_v56, %v6599_v37 }
 0x2b2   :  { %1449 = vmatpush2.msra.mxu0 %v1228_v13 }
 0x2b3   :  { %1451 = vmatmul.mubr.f32.vlgmr.msra.gmra.mxu0 %v1290_v33  ;;  %1537 = vmatprep.subr.mxu1 %v1231_v10  ;;  %v4777_v8 = vpop.permute.xlu0 %1596 }
 0x2b4   :  { %1538 = vmatpush2.msra.mxu1 %v1230_v45  ;;  %3675 = vmatprep.mubr.msk.f32.mxu0 %vm669_vm0, %v1293_v27 }
 0x2b5   :  { %1540 = vmatmul.mubr.f32.vlgmr.msra.gmra.mxu1 %v1290_v33 }
 0x2b6   :  { %3679 = vmatprep.mubr.msk.f32.mxu1 %vm669_vm0, %v1293_v27 }
 0x2b7   :  { %1457 = vmatmul.mubr.f32.gmra.mxu0 %v1292_v7 }
 0x2b8   :  { %3676 = vmatprep.mubr.msk.f32.mxu0 %vm669_vm0, %v1295_v1  ;;  %v4785_v13 = vpop.permute.xlu0 %1629 }
 0x2b9   :  { %1546 = vmatmul.mubr.f32.gmra.mxu1 %v1292_v7 }
 0x2ba   :  { %3680 = vmatprep.mubr.msk.f32.mxu1 %vm669_vm0, %v1295_v1 }
 0x2bb   :  { %1463 = vmatmul.mubr.f32.gmra.mxu0 %v1294_v3 }
 0x2bc   :  { %3677 = vmatprep.mubr.msk.f32.mxu0 %vm669_vm0, %v1297_v60  ;;  %v4731_v35 = vpop.permute.xlu1 %1601  ;;  %v1626_v45 = vpop.permute.xlu0 %1625 }
 0x2bd   :  { %1552 = vmatmul.mubr.f32.gmra.mxu1 %v1294_v3 }
 0x2be   :  { %3681 = vmatprep.mubr.msk.f32.mxu1 %vm669_vm0, %v1297_v60 }
 0x2bf   :  { %1469 = vmatmul.mubr.f32.gmra.mxu0 %v1296_v48 }
 0x2c0   :  { %v4733_v15 = vpop.permute.xlu1 %1591 }
 0x2c1   :  { %1558 = vmatmul.mubr.f32.gmra.mxu1 %v1296_v48 }
 0x2c5   :  { %v4735_v43 = vpop.permute.xlu1 %1633 }
 0x2ca   :  { %v1587_v5 = vpop.permute.xlu1 %1586 }
 0x2cf   :  { %v1622_v9 = vpop.permute.xlu1 %1621 }
 0x373   :  { %v1452_v17 = vpop.f32.mrf.mxu0 }
 0x374   :  { %v1564_v4 = vmax.f32 %v1452_v17, 0.0 }
 0x375   :  { %v1541_v26 = vpop.f32.mrf.mxu1  ;;  %v1454_v6 = vpop.f32.mrf.mxu0 }
 0x376   :  { %v1604_v11 = vmul.f32 %v1587_v5, %v1564_v4  ;;  %v1566_v58 = vmax.f32 %v1541_v26, 0.0  ;;  %v1565_v12 = vmax.f32 %v1454_v6, 0.0 }
 0x377   :  { %v1543_v41 = vpop.f32.mrf.mxu1  ;;  %v1458_v16 = vpop.f32.mrf.mxu0 }
 0x378   :  { %v1606_v21 = vmul.f32 %v1587_v5, %v1566_v58  ;;  %v4737_v55 = vadd.f32 %v1622_v9, %v1604_v11  ;;  %v1605_v50 = vmul.f32 %v1587_v5, %v1565_v12  ;;  %v1567_v61 = vmax.f32 %v1543_v41, 0.0 }
 0x379   :  { %v1568_v20 = vmax.f32 %v1458_v16, 0.0  ;;  %v1547_v56 = vpop.f32.mrf.mxu1  ;;  %v1460_v3 = vpop.f32.mrf.mxu0 }
 0x37a   :  { %6600 = vst [vmem:[#allocation35_spill] sm:$0xff] %v4737_v55  ;;  %v4739_v2 = vadd.f32 %v1622_v9, %v1606_v21  ;;  %1980 = vrot.lane.b32.xlu0 %v4737_v55, %s3733_s0  ;;  %v4765_v40 = vadd.f32 %v1622_v9, %v1605_v50  ;;  %v1607_v53 = vmul.f32 %v1587_v5, %v1567_v61  ;;  %v1570_v10 = vmax.f32 %v1547_v56, 0.0 }
 0x37b   :  { %v1608_v33 = vmul.f32 %v4733_v15, %v1568_v20  ;;  %v1549_v60 = vpop.f32.mrf.mxu1  ;;  %v1569_v48 = vmax.f32 %v1460_v3, 0.0 }
 0x37c   :  { %6601 = vst [vmem:[#allocation38_spill] sm:$0xff] %v4739_v2  ;;  %2388 = vrot.lane.b32.xlu1 %v4739_v2, %s3737_s11  ;;  %6602 = vst [vmem:[#allocation40_spill] sm:$0xff] %v4765_v40  ;;  %v4773_v14 = vadd.f32 %v1622_v9, %v1607_v53  ;;  %v1610_v7 = vmul.f32 %v4733_v15, %v1570_v10  ;;  %v1571_v5 = vmax.f32 %v1549_v60, 0.0 }
 0x37d   :  { %v4796_v27 = vadd.f32 %v1626_v45, %v1608_v33  ;;  %v1609_v17 = vmul.f32 %v4733_v15, %v1569_v48  ;;  %v1553_v21 = vpop.f32.mrf.mxu1 }
 0x37e   :  { %1880 = vrot.lane.b32.xlu0 %v4737_v55, %s3734_s8  ;;  %6603 = vst [vmem:[#allocation23_spill] sm:$0xff] %v4773_v14  ;;  %v4805_v1 = vadd.f32 %v1626_v45, %v1610_v7  ;;  %v1611_v4 = vmul.f32 %v4733_v15, %v1571_v5  ;;  %v1464_v15 = vpop.f32.mrf.mxu0  ;;  %v1574_v6 = vmax.f32 %v1553_v21, 0.0 }
 0x37f   :  { %6604 = vst [vmem:[#allocation22_spill] sm:$0xff] %v4796_v27  ;;  %v4833_v26 = vadd.f32 %v1626_v45, %v1609_v17  ;;  %v1572_v11 = vmax.f32 %v1464_v15, 0.0  ;;  %v1555_v60 = vpop.f32.mrf.mxu1 }
 0x380   :  { %2384 = vrot.lane.b32.xlu1 %v4737_v55, %s3737_s11  ;;  %6605 = vst [vmem:[#allocation42_spill] sm:$0xff] %v4805_v1  ;;  %v4837_v9 = vadd.f32 %v1626_v45, %v1611_v4  ;;  %v1614_v41 = vmul.f32 %v4777_v8, %v1574_v6  ;;  %v1466_v53 = vpop.f32.mrf.mxu0  ;;  %v1575_v48 = vmax.f32 %v1555_v60, 0.0 }
 0x381   :  { %6606 = vst [vmem:[#allocation44_spill] sm:$0xff] %v4833_v26  ;;  %v1612_v58 = vmul.f32 %v4777_v8, %v1572_v11  ;;  %v1573_v16 = vmax.f32 %v1466_v53, 0.0 }
 0x382   :  { %1984 = vrot.lane.b32.xlu0 %v4739_v2, %s3733_s0  ;;  %6607 = vst [vmem:[#allocation36_spill] sm:$0xff] %v4837_v9  ;;  %v4871_v50 = vadd.f32 %v4785_v13, %v1614_v41  ;;  %v1615_v4 = vmul.f32 %v4777_v8, %v1575_v48 }
 0x383   :  { %v4861_v12 = vadd.f32 %v4785_v13, %v1612_v58  ;;  %v1613_v33 = vmul.f32 %v4777_v8, %v1573_v16  ;;  %v1470_v16 = vpop.f32.mrf.mxu0 }
 0x384   :  { %2288 = vrot.lane.b32.xlu1 %v4739_v2, %s3730_s19  ;;  %6609 = vst [vmem:[#allocation37_spill] sm:$0xff] %v4871_v50  ;;  %v4929_v58 = vadd.f32 %v4785_v13, %v1615_v4  ;;  %v1576_v48 = vmax.f32 %v1470_v16, 0.0 }
 0x385   :  { %6608 = vst [vmem:[#allocation34_spill] sm:$0xff] %v4861_v12  ;;  %v4905_v7 = vadd.f32 %v4785_v13, %v1613_v33  ;;  %v1559_v13 = vpop.f32.mrf.mxu1  ;;  %v1472_v29 = vpop.f32.mrf.mxu0 }
 0x386   :  { %1780 = vrot.lane.b32.xlu0 %v4737_v55, %s3735_s9  ;;  %6616 = vst [vmem:[#allocation33_spill] sm:$0xff] %v4929_v58  ;;  %v1578_v33 = vmax.f32 %v1559_v13, 0.0  ;;  %v1616_v13 = vmul.f32 %v4731_v35, %v1576_v48  ;;  %v1577_v52 = vmax.f32 %v1472_v29, 0.0 }
 0x387   :  { %6612 = vst [vmem:[#allocation41_spill] sm:$0xff] %v4905_v7 }
 0x388   :  { %1684 = vrot.lane.b32.xlu1 %v4739_v2, %s3736_s10  ;;  %v1618_v31 = vmul.f32 %v4731_v35, %v1578_v33  ;;  %v4977_v33 = vadd.f32 %v4735_v43, %v1616_v13 }
 0x38a   :  { %1884 = vrot.lane.b32.xlu0 %v4739_v2, %s3734_s8  ;;  %v4970_v16 = vadd.f32 %v4735_v43, %v1618_v31  ;;  %6621 = vst [vmem:[#allocation49_spill] sm:$0xff] %v4977_v33 }
 0x38c   :  { %2188 = vrot.lane.b32.xlu1 %v4739_v2, %s3731_s24  ;;  %6620 = vst [vmem:[#allocation48_spill] sm:$0xff] %v4970_v16 }
 0x38e   :  { %1680 = vrot.lane.b32.xlu0 %v4737_v55, %s3736_s10 }
 0x390   :  { %2184 = vrot.lane.b32.xlu1 %v4737_v55, %s3731_s24 }
 0x392   :  { %1784 = vrot.lane.b32.xlu0 %v4739_v2, %s3735_s9 }
 0x394   :  { %1982 = vrot.lane.b32.xlu1 %v4765_v40, %s3733_s0 }
 0x396   :  { %2284 = vrot.lane.b32.xlu0 %v4737_v55, %s3730_s19 }
 0x398   :  { %1882 = vrot.lane.b32.xlu1 %v4765_v40, %s3734_s8 }
 0x39a   :  { %1968 = vrot.lane.b32.xlu0 %v4773_v14, %s3733_s0 }
 0x39c   :  { %1868 = vrot.lane.b32.xlu1 %v4773_v14, %s3734_s8 }
 0x39e   :  { %2386 = vrot.lane.b32.xlu0 %v4765_v40, %s3737_s11 }
 0x3a0   :  { %1782 = vrot.lane.b32.xlu1 %v4765_v40, %s3735_s9 }
 0x3a2   :  { %2286 = vrot.lane.b32.xlu0 %v4765_v40, %s3730_s19 }
 0x3a4   :  { %1768 = vrot.lane.b32.xlu1 %v4773_v14, %s3735_s9 }
 0x3a6   :  { %2186 = vrot.lane.b32.xlu0 %v4765_v40, %s3731_s24 }
 0x3a8   :  { %1682 = vrot.lane.b32.xlu1 %v4765_v40, %s3736_s10 }
 0x3aa   :  { %1986 = vrot.lane.b32.xlu0 %v4796_v27, %s3733_s0 }
 0x3ac   :  { %1656 = vrot.lane.b32.xlu1 %v4773_v14, %s3736_s10 }
 0x3ae   :  { %1886 = vrot.lane.b32.xlu0 %v4796_v27, %s3734_s8 }
 0x3b0   :  { %2396 = vrot.lane.b32.xlu1 %v4805_v1, %s3737_s11 }
 0x3b2   :  { %1990 = vrot.lane.b32.xlu0 %v4805_v1, %s3733_s0 }
 0x3b4   :  { %2392 = vrot.lane.b32.xlu1 %v4796_v27, %s3737_s11 }
 0x3b6   :  { %1786 = vrot.lane.b32.xlu0 %v4796_v27, %s3735_s9 }
 0x3b8   :  { %2296 = vrot.lane.b32.xlu1 %v4805_v1, %s3730_s19 }
 0x3ba   :  { %1890 = vrot.lane.b32.xlu0 %v4805_v1, %s3734_s8 }
 0x3bc   :  { %1690 = vrot.lane.b32.xlu1 %v4805_v1, %s3736_s10 }
 0x3be   :  { %1686 = vrot.lane.b32.xlu0 %v4796_v27, %s3736_s10 }
 0x3c0   :  { %2196 = vrot.lane.b32.xlu1 %v4805_v1, %s3731_s24 }
 0x3c2   :  { %1790 = vrot.lane.b32.xlu0 %v4805_v1, %s3735_s9 }
 0x3c4   :  { %2192 = vrot.lane.b32.xlu1 %v4796_v27, %s3731_s24 }
 0x3c6   :  { %2292 = vrot.lane.b32.xlu0 %v4796_v27, %s3730_s19 }
 0x3c8   :  { %1988 = vrot.lane.b32.xlu1 %v4833_v26, %s3733_s0 }
 0x3ca   :  { %1970 = vrot.lane.b32.xlu0 %v4837_v9, %s3733_s0 }
 0x3cc   :  { %1888 = vrot.lane.b32.xlu1 %v4833_v26, %s3734_s8 }
 0x3ce   :  { %2394 = vrot.lane.b32.xlu0 %v4833_v26, %s3737_s11 }
 0x3d0   :  { %1870 = vrot.lane.b32.xlu1 %v4837_v9, %s3734_s8 }
 0x3d2   :  { %2294 = vrot.lane.b32.xlu0 %v4833_v26, %s3730_s19 }
 0x3d4   :  { %1788 = vrot.lane.b32.xlu1 %v4833_v26, %s3735_s9 }
 0x3d6   :  { %2194 = vrot.lane.b32.xlu0 %v4833_v26, %s3731_s24 }
 0x3d8   :  { %1770 = vrot.lane.b32.xlu1 %v4837_v9, %s3735_s9 }
 0x3da   :  { %2298 = vrot.lane.b32.xlu0 %v4837_v9, %s3730_s19 }
 0x3dc   :  { %1688 = vrot.lane.b32.xlu1 %v4833_v26, %s3736_s10 }
 0x3de   :  { %1992 = vrot.lane.b32.xlu0 %v4861_v12, %s3733_s0 }
 0x3e0   :  { %1658 = vrot.lane.b32.xlu1 %v4837_v9, %s3736_s10 }
 0x3e2   :  { %1892 = vrot.lane.b32.xlu0 %v4861_v12, %s3734_s8 }
 0x3e4   :  { %2404 = vrot.lane.b32.xlu1 %v4871_v50, %s3737_s11 }
 0x3e6   :  { %1996 = vrot.lane.b32.xlu0 %v4871_v50, %s3733_s0 }
 0x3e8   :  { %2400 = vrot.lane.b32.xlu1 %v4861_v12, %s3737_s11 }
 0x3ea   :  { %1792 = vrot.lane.b32.xlu0 %v4861_v12, %s3735_s9 }
 0x3ec   :  { %2304 = vrot.lane.b32.xlu1 %v4871_v50, %s3730_s19  ;;  %v4885_v61 = vpop.permute.xlu0 %1980 }
 0x3ee   :  { %v4887_v20 = vpop.permute.xlu1 %2388  ;;  %1896 = vrot.lane.b32.xlu0 %v4871_v50, %s3734_s8 }
 0x3ef   :  { %6610 = vst [vmem:[#allocation39_spill] sm:$0xff] %v4887_v20 }
 0x3f0   :  { %1696 = vrot.lane.b32.xlu1 %v4871_v50, %s3736_s10  ;;  %v4893_v56 = vpop.permute.xlu0 %1880 }
 0x3f2   :  { %v4896_v45 = vpop.permute.xlu1 %2384  ;;  %1692 = vrot.lane.b32.xlu0 %v4861_v12, %s3736_s10 }
 0x3f3   :  { %6611 = vst [vmem:[#allocation43_spill] sm:$0xff] %v4896_v45 }
 0x3f4   :  { %2200 = vrot.lane.b32.xlu1 %v4861_v12, %s3731_s24  ;;  %v4902_v10 = vpop.permute.xlu0 %1984 }
 0x3f6   :  { %v4907_v3 = vpop.permute.xlu1 %2288  ;;  %1796 = vrot.lane.b32.xlu0 %v4871_v50, %s3735_s9 }
 0x3f7   :  { %6613 = vst [vmem:[#allocation30_spill] sm:$0xff] %v4907_v3 }
 0x3f8   :  { %1994 = vrot.lane.b32.xlu1 %v4905_v7, %s3733_s0  ;;  %v4913_v5 = vpop.permute.xlu0 %1780 }
 0x3fa   :  { %v4915_v17 = vpop.permute.xlu1 %1684  ;;  %2300 = vrot.lane.b32.xlu0 %v4861_v12, %s3730_s19 }
 0x3fb   :  { %6614 = vst [vmem:[#allocation32_spill] sm:$0xff] %v4915_v17  ;;  %v1617_v17 = vmul.f32 %v4731_v35, %v1577_v52 }
 0x3fc   :  { %1894 = vrot.lane.b32.xlu1 %v4905_v7, %s3734_s8  ;;  %v4922_v15 = vpop.permute.xlu0 %1884 }
 0x3fe   :  { %v4924_v11 = vpop.permute.xlu1 %2188  ;;  %2204 = vrot.lane.b32.xlu0 %v4871_v50, %s3731_s24 }
 0x3ff   :  { %6615 = vst [vmem:[#allocation31_spill] sm:$0xff] %v4924_v11 }
 0x400   :  { %1794 = vrot.lane.b32.xlu1 %v4905_v7, %s3735_s9  ;;  %v4933_v21 = vpop.permute.xlu0 %1680 }
 0x401   :  { %6617 = vst [vmem:[#allocation45_spill] sm:$0xff] %v4933_v21 }
 0x402   :  { %v4935_v6 = vpop.permute.xlu1 %2184  ;;  %1972 = vrot.lane.b32.xlu0 %v4929_v58, %s3733_s0 }
 0x403   :  { %6618 = vst [vmem:[#allocation46_spill] sm:$0xff] %v4935_v6 }
 0x404   :  { %1772 = vrot.lane.b32.xlu1 %v4929_v58, %s3735_s9  ;;  %v4941_v8 = vpop.permute.xlu0 %1784 }
 0x406   :  { %v4943_v41 = vpop.permute.xlu1 %1982  ;;  %2402 = vrot.lane.b32.xlu0 %v4905_v7, %s3737_s11 }
 0x408   :  { %1694 = vrot.lane.b32.xlu1 %v4905_v7, %s3736_s10  ;;  %v4949_v53 = vpop.permute.xlu0 %2284 }
 0x409   :  { %6619 = vst [vmem:[#allocation47_spill] sm:$0xff] %v4949_v53 }
 0x40a   :  { %v4951_v60 = vpop.permute.xlu1 %1882  ;;  %1872 = vrot.lane.b32.xlu0 %v4929_v58, %s3734_s8 }
 0x40c   :  { %1660 = vrot.lane.b32.xlu1 %v4929_v58, %s3736_s10  ;;  %v4957_v4 = vpop.permute.xlu0 %1968 }
 0x40e   :  { %v4960_v30 = vpop.permute.xlu1 %1868  ;;  %2302 = vrot.lane.b32.xlu0 %v4905_v7, %s3730_s19 }
 0x410   :  { %2202 = vrot.lane.b32.xlu1 %v4905_v7, %s3731_s24  ;;  %v4967_v46 = vpop.permute.xlu0 %2386 }
 0x412   :  { %v4972_v47 = vpop.permute.xlu1 %1782  ;;  %2306 = vrot.lane.b32.xlu0 %v4929_v58, %s3730_s19 }
 0x414   :  { %2412 = vrot.lane.b32.xlu1 %v4970_v16, %s3737_s11  ;;  %v4981_v48 = vpop.permute.xlu0 %2286 }
 0x416   :  { %v4983_v22 = vpop.permute.xlu1 %1768  ;;  %1898 = vrot.lane.b32.xlu0 %v4977_v33, %s3734_s8 }
 0x418   :  { %2408 = vrot.lane.b32.xlu1 %v4977_v33, %s3737_s11  ;;  %v4989_v31 = vpop.permute.xlu0 %2186 }
 0x41a   :  { %v4991_v62 = vpop.permute.xlu1 %1682  ;;  %1798 = vrot.lane.b32.xlu0 %v4977_v33, %s3735_s9 }
 0x41b   :  { %6622 = vst [vmem:[#allocation50_spill] sm:$0xff] %v4991_v62 }
 0x41c   :  { %2312 = vrot.lane.b32.xlu1 %v4970_v16, %s3730_s19  ;;  %v4997_v13 = vpop.permute.xlu0 %1986 }
 0x41e   :  { %v4999_v37 = vpop.permute.xlu1 %1656  ;;  %1902 = vrot.lane.b32.xlu0 %v4970_v16, %s3734_s8 }
 0x41f   :  { %6623 = vst [vmem:[#allocation51_spill] sm:$0xff] %v4999_v37  ;;  %v1561_v37 = vpop.f32.mrf.mxu1 }
 0x420   :  { %2308 = vrot.lane.b32.xlu1 %v4977_v33, %s3730_s19  ;;  %v5005_v51 = vpop.permute.xlu0 %1886  ;;  %v1579_v21 = vmax.f32 %v1561_v37, 0.0 }
 0x422   :  { %v5007_v18 = vpop.permute.xlu1 %2396  ;;  %1698 = vrot.lane.b32.xlu0 %v4977_v33, %s3736_s10  ;;  %v1619_v25 = vmul.f32 %v4731_v35, %v1579_v21 }
 0x423   :  { %6624 = vst [vmem:[#allocation52_spill] sm:$0xff] %v5007_v18 }
 0x424   :  { %1702 = vrot.lane.b32.xlu1 %v4970_v16, %s3736_s10  ;;  %v5013_v32 = vpop.permute.xlu0 %1990 }
 0x425   :  { %6625 = vst [vmem:[#allocation53_spill] sm:$0xff] %v5013_v32  ;;  %v5029_v32 = vadd.f32 %v4735_v43, %v1617_v17 }
 0x426   :  { %v5015_v34 = vpop.permute.xlu1 %2392  ;;  %1802 = vrot.lane.b32.xlu0 %v4970_v16, %s3735_s9 }
 0x427   :  { %6626 = vst [vmem:[#allocation54_spill] sm:$0xff] %v5015_v34  ;;  %6629 = vst [vmem:[#allocation57_spill] sm:$0xff] %v5029_v32 }
 0x428   :  { %2212 = vrot.lane.b32.xlu1 %v4970_v16, %s3731_s24  ;;  %v5022_v62 = vpop.permute.xlu0 %1786 }
 0x429   :  { %6627 = vst [vmem:[#allocation55_spill] sm:$0xff] %v5022_v62  ;;  %v6427_v62 = vmov 0.0  }
 0x42a   :  { %v5024_v29 = vpop.permute.xlu1 %2296  ;;  %2208 = vrot.lane.b32.xlu0 %v4977_v33, %s3731_s24  ;;  %2786 = vmatprep.mubr.f32.mxu1 %v6427_v62 }
 0x42b   :  { %6628 = vst [vmem:[#allocation56_spill] sm:$0xff] %v5024_v29  ;;  %v5042_v29 = vadd.f32 %v4735_v43, %v1619_v25 }
 0x42c   :  { %2112 = vrot.lane.b32.xlu1 %v4970_v16, %s3732_s7  ;;  %v5034_v52 = vpop.permute.xlu0 %1890 }
 0x42d   :  { %6630 = vst [vmem:[#allocation58_spill] sm:$0xff] %v5034_v52  ;;  %6632 = vst [vmem:[#allocation60_spill] sm:$0xff] %v5042_v29 }
 0x42e   :  { %v5036_v37 = vpop.permute.xlu1 %1690  ;;  %2410 = vrot.lane.b32.xlu0 %v5029_v32, %s3737_s11 }
 0x42f   :  { %6631 = vst [vmem:[#allocation59_spill] sm:$0xff] %v5036_v37 }
 0x430   :  { %1900 = vrot.lane.b32.xlu1 %v5029_v32, %s3734_s8  ;;  %v5046_v35 = vpop.permute.xlu0 %1686 }
 0x431   :  { %6633 = vst [vmem:[#allocation61_spill] sm:$0xff] %v5046_v35 }
 0x432   :  { %v5048_v17 = vpop.permute.xlu1 %2196  ;;  %1874 = vrot.lane.b32.xlu0 %v5042_v29, %s3734_s8 }
 0x433   :  { %6634 = vst [vmem:[#allocation62_spill] sm:$0xff] %v5048_v17 }
 0x434   :  { %2108 = vrot.lane.b32.xlu1 %v4977_v33, %s3732_s7  ;;  %v5054_v21 = vpop.permute.xlu0 %1790 }
 0x435   :  { %6635 = vst [vmem:[#allocation63_spill] sm:$0xff] %v5054_v21 }
 0x436   :  { %v5056_v37 = vpop.permute.xlu1 %2192  ;;  %2310 = vrot.lane.b32.xlu0 %v5029_v32, %s3730_s19 }
 0x437   :  { %6636 = vst [vmem:[#allocation64_spill] sm:$0xff] %v5056_v37 }
 0x438   :  { %1800 = vrot.lane.b32.xlu1 %v5029_v32, %s3735_s9  ;;  %v5062_v25 = vpop.permute.xlu0 %2292 }
 0x439   :  { %6637 = vst [vmem:[#allocation65_spill] sm:$0xff] %v5062_v25 }
 0x43a   :  { %v5064_v43 = vpop.permute.xlu1 %1988  ;;  %2290 = vrot.lane.b32.xlu0 %v4773_v14, %s3730_s19 }
 0x43c   :  { %1774 = vrot.lane.b32.xlu1 %v5042_v29, %s3735_s9  ;;  %v5070_v62 = vpop.permute.xlu0 %1970 }
 0x43e   :  { %v5072_v17 = vpop.permute.xlu1 %1888  ;;  %2102 = vrot.lane.b32.xlu0 %v4905_v7, %s3732_s7 }
 0x440   :  { %1700 = vrot.lane.b32.xlu1 %v5029_v32, %s3736_s10  ;;  %v5078_v37 = vpop.permute.xlu0 %2394 }
 0x442   :  { %v5080_v25 = vpop.permute.xlu1 %1870  ;;  %2094 = vrot.lane.b32.xlu0 %v4833_v26, %s3732_s7 }
 0x444   :  { %1662 = vrot.lane.b32.xlu1 %v5042_v29, %s3736_s10  ;;  %v5086_v21 = vpop.permute.xlu0 %2294 }
 0x445   :  { %6638 = vst [vmem:[#allocation66_spill] sm:$0xff] %v5086_v21 }
 0x446   :  { %v5088_v35 = vpop.permute.xlu1 %1788  ;;  %2206 = vrot.lane.b32.xlu0 %v4929_v58, %s3731_s24 }
 0x447   :  { %6639 = vst [vmem:[#allocation67_spill] sm:$0xff] %v5088_v35 }
 0x448   :  { %2104 = vrot.lane.b32.xlu1 %v4871_v50, %s3732_s7  ;;  %v5094_v7 = vpop.permute.xlu0 %2194 }
 0x449   :  { %6640 = vst [vmem:[#allocation68_spill] sm:$0xff] %v5094_v7 }
 0x44a   :  { %v5096_v52 = vpop.permute.xlu1 %1770  ;;  %2086 = vrot.lane.b32.xlu0 %v4765_v40, %s3732_s7 }
 0x44b   :  { %6641 = vst [vmem:[#allocation69_spill] sm:$0xff] %v5096_v52 }
 0x44c   :  { %2100 = vrot.lane.b32.xlu1 %v4861_v12, %s3732_s7  ;;  %v5102_v26 = vpop.permute.xlu0 %2298 }
 0x44d   :  { %6642 = vst [vmem:[#allocation70_spill] sm:$0xff] %v5102_v26 }
 0x44e   :  { %v5104_v21 = vpop.permute.xlu1 %1688  ;;  %2198 = vrot.lane.b32.xlu0 %v4837_v9, %s3731_s24 }
 0x44f   :  { %6643 = vst [vmem:[#allocation71_spill] sm:$0xff] %v5104_v21 }
 0x450   :  { %2096 = vrot.lane.b32.xlu1 %v4805_v1, %s3732_s7  ;;  %v1993_v50 = vpop.permute.xlu0 %1992 }
 0x452   :  { %v5110_v7 = vpop.permute.xlu1 %1658  ;;  %2210 = vrot.lane.b32.xlu0 %v5029_v32, %s3731_s24 }
 0x453   :  { %6644 = vst [vmem:[#allocation72_spill] sm:$0xff] %v5110_v7 }
 0x454   :  { %2092 = vrot.lane.b32.xlu1 %v4796_v27, %s3732_s7  ;;  %v5116_v40 = vpop.permute.xlu0 %1892 }
 0x456   :  { %v5118_v12 = vpop.permute.xlu1 %2404  ;;  %2190 = vrot.lane.b32.xlu0 %v4773_v14, %s3731_s24 }
 0x457   :  { %6645 = vst [vmem:[#allocation73_spill] sm:$0xff] %v5118_v12 }
 0x458   :  { %2088 = vrot.lane.b32.xlu1 %v4739_v2, %s3732_s7  ;;  %v5124_v1 = vpop.permute.xlu0 %1996 }
 0x45a   :  { %v5126_v26 = vpop.permute.xlu1 %2400  ;;  %2110 = vrot.lane.b32.xlu0 %v5029_v32, %s3732_s7 }
 0x45b   :  { %6646 = vst [vmem:[#allocation74_spill] sm:$0xff] %v5126_v26 }
 0x45c   :  { %2084 = vrot.lane.b32.xlu1 %v4737_v55, %s3732_s7  ;;  %v5132_v27 = vpop.permute.xlu0 %1792  ;;  %v5149_v55 = vld [vmem:[%s6350_s2 + $0x28] sm:$0xff] }
 0x45d   :  { %6647 = vst [vmem:[#allocation75_spill] sm:$0xff] %v5132_v27  ;;  %6651 = vst [vmem:[#allocation79_spill] sm:$0xff] %v5149_v55  ;;  %2709 = vmatprep.mubr.f32.mxu0 %v5149_v55 }
 0x45e   :  { %v5134_v7 = vpop.permute.xlu1 %2304  ;;  %2214 = vrot.lane.b32.xlu0 %v5042_v29, %s3731_s24 }
 0x45f   :  { %6648 = vst [vmem:[#allocation76_spill] sm:$0xff] %v5134_v7 }
 0x460   :  { %2098 = vrot.lane.b32.xlu1 %v4837_v9, %s3732_s7  ;;  %v5140_v2 = vpop.permute.xlu0 %1896 }
 0x461   :  { %6649 = vst [vmem:[#allocation77_spill] sm:$0xff] %v5140_v2 }
 0x462   :  { %v5142_v21 = vpop.permute.xlu1 %1696  ;;  %2106 = vrot.lane.b32.xlu0 %v4929_v58, %s3732_s7 }
 0x463   :  { %6650 = vst [vmem:[#allocation78_spill] sm:$0xff] %v5142_v21 }
 0x464   :  { %2114 = vrot.lane.b32.xlu1 %v5042_v29, %s3732_s7  ;;  %v5154_v7 = vpop.permute.xlu0 %1692 }
 0x465   :  { %6652 = vst [vmem:[#allocation80_spill] sm:$0xff] %v5154_v7 }
 0x466   :  { %v5156_v52 = vpop.permute.xlu1 %2200  ;;  %1998 = vrot.lane.b32.xlu0 %v4977_v33, %s3733_s0 }
 0x467   :  { %6653 = vst [vmem:[#allocation81_spill] sm:$0xff] %v5156_v52 }
 0x468   :  { %2000 = vrot.lane.b32.xlu1 %v5029_v32, %s3733_s0  ;;  %v5162_v21 = vpop.permute.xlu0 %1796 }
 0x469   :  { %6654 = vst [vmem:[#allocation82_spill] sm:$0xff] %v5162_v21 }
 0x46a   :  { %v5164_v2 = vpop.permute.xlu1 %1994  ;;  %2090 = vrot.lane.b32.xlu0 %v4773_v14, %s3732_s7 }
 0x46b   :  { %v2010_v55 = vsel %vm264_vm4, %v1993_v50, %v5164_v2 }
 0x46c   :  { %1974 = vrot.lane.b32.xlu1 %v5042_v29, %s3733_s0  ;;  %v5172_v52 = vpop.permute.xlu0 %2300  ;;  %v2045_v33 = vmul.f32 %v2010_v55, %v4063_v54  ;;  %v2007_v55 = vsel %vm264_vm4, %v4997_v13, %v5064_v43 }
 0x46d   :  { %6655 = vst [vmem:[#allocation83_spill] sm:$0xff] %v5172_v52  ;;  %v2041_v27 = vmul.f32 %v2007_v55, %v4063_v54 }
 0x46e   :  { %v5175_v7 = vpop.permute.xlu1 %1894  ;;  %2414 = vrot.lane.b32.xlu0 %v5042_v29, %s3737_s11  ;;  %2645 = vmatprep.subr.mxu0 %v2045_v33  ;;  %v2033_v33 = vsel %vm264_vm4, %v5070_v62, %v4997_v13  ;;  %v2032_v13 = vsel %vm264_vm4, %v4957_v4, %v4885_v61 }
 0x470   :  { %2406 = vrot.lane.b32.xlu1 %v4929_v58, %s3737_s11  ;;  %v5181_v32 = vpop.permute.xlu0 %2204 }
 0x471   :  { %6656 = vst [vmem:[#allocation84_spill] sm:$0xff] %v5181_v32 }
 0x472   :  { %v5183_v21 = vpop.permute.xlu1 %1794  ;;  %2398 = vrot.lane.b32.xlu0 %v4837_v9, %s3737_s11  ;;  %v2004_v9 = vsel %vm264_vm4, %v4885_v61, %v4943_v41  ;;  %v2962_v61 = vld [vmem:[%s6351_s3 + $0x8] sm:$0xff] }
 0x473   :  { %6657 = vst [vmem:[#allocation85_spill] sm:$0xff] %v5183_v21 }
 0x474   :  { %2390 = vrot.lane.b32.xlu1 %v4773_v14, %s3737_s11  ;;  %v5192_v52 = vpop.permute.xlu0 %1972  ;;  %v3744_v14 = vmov 4  }
 0x475   :  { %v2034_v58 = vsel %vm264_vm4, %v5192_v52, %v1993_v50  ;;  %3717 = vset.pattern.permute.xlu1 %v3744_v14  ;;  %3716 = vset.pattern.permute.xlu0 %v3744_v14  ;;  %v2961_v50 = vld [vmem:[%s6351_s3] sm:$0xff]  ;;  %v2036_v14 = vmul.f32 %v2032_v13, %v4070_v59 }
 0x476   :  { %v2044_v32 = vmul.f32 %v2034_v58, %v4070_v59  ;;  %v5203_v35 = vpop.permute.xlu1 %1772  ;;  %2002 = vrot.lane.b32.xlu0 %v4970_v16, %s3733_s0  ;;  %v2040_v58 = vmul.f32 %v2033_v33, %v4070_v59 }
 0x477   :  { %6658 = vst [vmem:[#allocation86_spill] sm:$0xff] %v5203_v35  ;;  %v2037_v35 = vmul.f32 %v2004_v9, %v4063_v54 }
 0x478   :  { %2314 = vrot.lane.b32.xlu1 %v5042_v29, %s3730_s19  ;;  %2646 = vmatpush1.msra.mxu0 %v2044_v32  ;;  %v5217_v16 = vpop.permute.xlu0 %2402 }
 0x479   :  { %2647 = vmatprep.subr.mxu0 %v2041_v27  ;;  %v3745_v27 = vmov 5  }
 0x47a   :  { %v5224_v55 = vpop.permute.xlu1 %1694  ;;  %2648 = vmatpush1.msra.mxu0 %v2040_v58  ;;  %2965 = vperm.xlu0 %3716, %v2961_v50  }
 0x47b   :  { %6659 = vst [vmem:[#allocation87_spill] sm:$0xff] %v5224_v55  ;;  %2649 = vmatprep.subr.mxu0 %v2037_v35  ;;  %v1904_v55 = vsel %vm197_vm5, %v4893_v56, %v4951_v60 }
 0x47c   :  { %2650 = vmatpush1.msra.mxu0 %v2036_v14  ;;  %v5226_v33 = vpop.permute.xlu0 %1872  ;;  %2970 = vperm.xlu1 %3717, %v2962_v61  }
 0x47e   :  { %v5228_v32 = vpop.permute.xlu1 %1660  ;;  %3719 = vset.pattern.permute.xlu0 %v3745_v27 }
 0x47f   :  { %6660 = vst [vmem:[#allocation88_spill] sm:$0xff] %v5228_v32  ;;  %2986 = vperm.xlu0 %3719, %v2962_v61  }
 0x480   :  { %v5230_v9 = vpop.permute.xlu0 %2302  ;;  %3718 = vset.pattern.permute.xlu1 %v3745_v27 }
 0x481   :  { %6661 = vst [vmem:[#allocation89_spill] sm:$0xff] %v5230_v9  ;;  %2982 = vperm.xlu1 %3718, %v2961_v50   ;;  %v1905_v9 = vsel %vm197_vm5, %v4951_v60, %v4922_v15  ;;  %v2416_v60 = vsel %vm538_vm8, %v4896_v45, %v4967_v46  ;;  %v1832_v45 = vsel %vm130_vm6, %v4983_v22, %v4913_v5 }
 0x482   :  { %v5232_v29 = vpop.permute.xlu1 %2202  ;;  %v5280_v21 = vmul.f32 %v1905_v9, %v4113_v49 }
 0x483   :  { %6662 = vst [vmem:[#allocation90_spill] sm:$0xff] %v5232_v29 }
 0x484   :  { %v5234_v13 = vpop.permute.xlu0 %2306 }
 0x485   :  { %6663 = vst [vmem:[#allocation91_spill] sm:$0xff] %v5234_v13  ;;  %v2005_v13 = vsel %vm264_vm4, %v4943_v41, %v4902_v10  ;;  %v1906_v41 = vsel %vm197_vm5, %v4922_v15, %v4960_v30 }
 0x486   :  { %v5236_v58 = vpop.permute.xlu1 %2412 }
 0x487   :  { %6664 = vst [vmem:[#allocation92_spill] sm:$0xff] %v5236_v58 }
 0x488   :  { %v5238_v35 = vpop.permute.xlu0 %1898 }
 0x48a   :  { %v5240_v14 = vpop.permute.xlu1 %2408 }
 0x48b   :  { %6665 = vst [vmem:[#allocation93_spill] sm:$0xff] %v5240_v14 }
 0x48c   :  { %v5242_v59 = vpop.permute.xlu0 %1798 }
 0x48e   :  { %v5244_v54 = vpop.permute.xlu1 %2312 }
 0x490   :  { %v5246_v32 = vpop.permute.xlu0 %1902 }
 0x491   :  { %6666 = vst [vmem:[#allocation94_spill] sm:$0xff] %v5246_v32 }
 0x492   :  { %v5248_v61 = vpop.permute.xlu1 %2308 }
 0x494   :  { %v5250_v27 = vpop.permute.xlu0 %1698 }
 0x495   :  { %6667 = vst [vmem:[#allocation95_spill] sm:$0xff] %v5250_v27  ;;  %v5268_v27 = vmul.f32 %v2005_v13, %v4084_v0  ;;  %v2417_v13 = vsel %vm538_vm8, %v4967_v46, %v4887_v20  ;;  %v5303_v46 = vmul.f32 %v1904_v55, %v4096_v24 }
 0x496   :  { %v5252_v50 = vpop.permute.xlu1 %1702 }
 0x497   :  { %6668 = vst [vmem:[#allocation96_spill] sm:$0xff] %v5252_v50  ;;  %v2006_v50 = vsel %vm264_vm4, %v4902_v10, %v4957_v4  ;;  %v1805_v10 = vsel %vm130_vm6, %v4972_v47, %v4941_v8  ;;  %v2317_v4 = vsel %vm471_vm1, %v4981_v48, %v4907_v3 }
 0x498   :  { %v5257_v29 = vpop.permute.xlu0 %1802 }
 0x499   :  { %6669 = vst [vmem:[#allocation97_spill] sm:$0xff] %v5257_v29  ;;  %v1932_v29 = vsel %vm197_vm5, %v4960_v30, %v4893_v56  ;;  %v1804_v30 = vsel %vm130_vm6, %v4913_v5, %v4972_v47  ;;  %v2316_v56 = vsel %vm471_vm1, %v4949_v53, %v4981_v48  ;;  %v5314_v47 = vmul.f32 %v2006_v50, %v4081_v63  ;;  %v3723_v48 = vld [vmem:[%s6349_s1 + $0x20] ss:$0 sm:$0xff]  ;;  %v3724_v50 = vld [vmem:[%s6349_s1 + $0x28] ss:$0 sm:$0xff] }
 0x49a   :  { %v5265_v32 = vpop.permute.xlu1 %2212  ;;  %v5306_v9 = vmul.f32 %v1932_v29, %v4105_v39  ;;  %v5317_v53 = vmul.f32 %v1906_v41, %v6572_v57  ;;  %v5322_v55 = vmul.f32 %v3723_v48, %v2416_v60  ;;  %v5325_v29 = vmul.f32 %v1805_v10, %v6575_v42 }
 0x49b   :  { %6670 = vst [vmem:[#allocation98_spill] sm:$0xff] %v5265_v32  ;;  %v1806_v5 = vsel %vm130_vm6, %v4941_v8, %v4983_v22  ;;  %v5334_v41 = vmul.f32 %v2316_v56, %v6597_v28  ;;  %v2216_v60 = vsel %vm404_vm2, %v4935_v6, %v4989_v31  ;;  %v5340_v10 = vmul.f32 %v1804_v30, %v6577_v38 }
 0x49c   :  { %v5291_v15 = vpop.permute.xlu0 %2208  ;;  %v5343_v32 = vmul.f32 %v2317_v4, %v6596_v44  ;;  %v5346_v22 = vmul.f32 %v1832_v45, %v6576_v23  ;;  %v2423_v8 = vsel %vm538_vm8, %v5217_v16, %v5118_v12  ;;  %v2422_v30 = vsel %vm538_vm8, %v5126_v26, %v5217_v16 }
 0x49d   :  { %6672 = vst [vmem:[#allocation100_spill] sm:$0xff] %v5334_v41  ;;  %v5361_v45 = vmul.f32 %v1806_v5, %v6578_v19  ;;  %v2217_v12 = vsel %vm404_vm2, %v4989_v31, %v4924_v11  ;;  %v2419_v5 = vsel %vm538_vm8, %v5015_v34, %v5078_v37  ;;  %v2460_v26 = vmul.f32 %v3723_v48, %v2422_v30  ;;  %v6675_v30 = vld [vmem:[#allocation50_spill] sm:$0xff] }
 0x49e   :  { %v5311_v20 = vpop.permute.xlu1 %2112 }
 0x49f   :  { %6671 = vst [vmem:[#allocation99_spill] sm:$0xff] %v5311_v20  ;;  %v2453_v20 = vmul.f32 %v3724_v50, %v2417_v13 }
 0x4a0   :  { %v2411_v3 = vpop.permute.xlu0 %2410 }
 0x4a1   :  { %v2425_v13 = vsel %vm538_vm8, %v5240_v14, %v2411_v3  ;;  %v2426_v56 = vsel %vm538_vm8, %v2411_v3, %v5236_v58  ;;  %v5367_v14 = vmul.f32 %v2216_v60, %v3989_v36  ;;  %v2420_v3 = vsel %vm538_vm8, %v5078_v37, %v5007_v18 }
 0x4a2   :  { %v2464_v6 = vmul.f32 %v3723_v48, %v2425_v13  ;;  %v5358_v4 = vpop.permute.xlu1 %1900  ;;  %v2465_v41 = vmul.f32 %v3724_v50, %v2426_v56  ;;  %v1910_v13 = vsel %vm197_vm5, %v5116_v40, %v5175_v7  ;;  %v2461_v56 = vmul.f32 %v3724_v50, %v2423_v8 }
 0x4a3   :  { %6673 = vst [vmem:[#allocation101_spill] sm:$0xff] %v5367_v14  ;;  %v1913_v16 = vsel %vm197_vm5, %v5238_v35, %v5358_v4  ;;  %v1907_v18 = vsel %vm197_vm5, %v5005_v51, %v5072_v17  ;;  %v1934_v58 = vsel %vm197_vm5, %v5226_v33, %v5116_v40  ;;  %v2457_v8 = vmul.f32 %v3724_v50, %v2420_v3  ;;  %v6676_v14 = vld [vmem:[#allocation45_spill] sm:$0xff] }
 0x4a4   :  { %2744 = vmatprep.subr.mxu1 %v2465_v41  ;;  %v5381_v31 = vpop.permute.xlu0 %1874  ;;  %v1949_v60 = vmul.f32 %v1913_v16, %v4096_v24  ;;  %v6674_v16 = vld [vmem:[#allocation5_spill] sm:$0xff]  ;;  %v1704_v36 = vsel %vm63_vm7, %v6676_v14, %v6675_v30  ;;  %v2456_v40 = vmul.f32 %v3723_v48, %v2419_v5  ;;  %v1944_v50 = vmul.f32 %v1934_v58, %v4105_v39 }
 0x4a5   :  { %v1935_v37 = vsel %vm197_vm5, %v5381_v31, %v5238_v35  ;;  %2745 = vmatpush1.msra.mxu1 %v2464_v6  ;;  %v5397_v11 = vmul.f32 %v2217_v12, %v6674_v16  ;;  %v1933_v35 = vsel %vm197_vm5, %v5080_v25, %v5005_v51  ;;  %v1945_v6 = vmul.f32 %v1910_v13, %v4096_v24 }
 0x4a6   :  { %v1948_v41 = vmul.f32 %v1935_v37, %v4105_v39  ;;  %v5394_v34 = vpop.permute.xlu1 %2108  ;;  %2651 = vmatprep.subr.mxu0 %v1949_v60  ;;  %2746 = vmatprep.subr.mxu1 %v2461_v56  ;;  %v6677_v37 = vld [vmem:[#allocation32_spill] sm:$0xff]  ;;  %v1941_v3 = vmul.f32 %v1907_v18, %v4096_v24  ;;  %v2012_v48 = vsel %vm264_vm4, %v5124_v1, %v5192_v52  ;;  %v6678_v56 = vld [vmem:[#allocation53_spill] sm:$0xff] }
 0x4a7   :  { %2747 = vmatpush1.msra.mxu1 %v2460_v26  ;;  %v1705_v60 = vsel %vm63_vm7, %v6675_v30, %v6677_v37  ;;  %v1940_v5 = vmul.f32 %v1933_v35, %v4105_v39  ;;  %v2008_v52 = vsel %vm264_vm4, %v5064_v43, %v6678_v56  ;;  %v2047_v43 = vmul.f32 %v2012_v48, %v4081_v63  ;;  %v6681_v35 = vld [vmem:[#allocation51_spill] sm:$0xff]  ;;  %v6683_v48 = vld [vmem:[#allocation85_spill] sm:$0xff] }
 0x4a8   :  { %2652 = vmatpush1.msra.mxu0 %v1948_v41  ;;  %2748 = vmatprep.subr.mxu1 %v2457_v8  ;;  %v2311_v12 = vpop.permute.xlu0 %2310  ;;  %v2011_v41 = vsel %vm264_vm4, %v5164_v2, %v5124_v1  ;;  %v5443_v2 = vld [vmem:[%s6350_s2 + $0x30] sm:$0xff] }
 0x4a9   :  { %v2325_v51 = vsel %vm471_vm1, %v5248_v61, %v2311_v12  ;;  %v2326_v26 = vsel %vm471_vm1, %v2311_v12, %v5244_v54  ;;  %2653 = vmatprep.subr.mxu0 %v1945_v6  ;;  %2749 = vmatpush1.msra.mxu1 %v2456_v40  ;;  %6679 = vst [vmem:[#allocation5_spill] sm:$0xff] %v5443_v2  ;;  %v6680_v1 = vld [vmem:[#allocation29_spill] sm:$0xff]  ;;  %v6682_v6 = vld [vmem:[#allocation26_spill] sm:$0xff] }
 0x4aa   :  { %v2364_v58 = vmul.f32 %v2325_v51, %v6597_v28  ;;  %v5420_v13 = vpop.permute.xlu1 %1800  ;;  %2654 = vmatpush1.msra.mxu0 %v1944_v50  ;;  %2750 = vmatprep.subr.mxu1 %v2453_v20  ;;  %v2365_v18 = vmul.f32 %v2326_v26, %v6596_v44  ;;  %v2009_v20 = vsel %vm264_vm4, %v6678_v56, %v5070_v62  ;;  %v6684_v51 = vld [vmem:[#allocation75_spill] sm:$0xff]  ;;  %v6692_v24 = vld [vmem:[#allocation77_spill] sm:$0xff] }
 0x4ab   :  { %v1813_v8 = vsel %vm130_vm6, %v5242_v59, %v5420_v13  ;;  %2655 = vmatprep.subr.mxu0 %v1941_v3  ;;  %2751 = vmatpush1.msra.mxu1 %v5322_v55  ;;  %v5446_v55 = vmul.f32 %v1705_v60, %v6680_v1  ;;  %v5451_v62 = vsel %vm63_vm7, %v6677_v37, %v6681_v35  ;;  %v6685_v37 = vld [vmem:[#allocation86_spill] sm:$0xff] }
 0x4ac   :  { %2656 = vmatpush1.msra.mxu0 %v1940_v5  ;;  %2752 = vmatprep.subr.mxu1 %v2365_v18  ;;  %v5436_v30 = vpop.permute.xlu0 %2290  ;;  %v1849_v40 = vmul.f32 %v1813_v8, %v6577_v38  ;;  %v5455_v50 = vmul.f32 %v1704_v36, %v6682_v6  ;;  %v2042_v12 = vmul.f32 %v2008_v52, %v4084_v0  ;;  %v6687_v18 = vld [vmem:[#allocation55_spill] sm:$0xff] }
 0x4ad   :  { %2657 = vmatprep.subr.mxu0 %v5303_v46  ;;  %2753 = vmatpush1.msra.mxu1 %v2364_v58  ;;  %v2046_v3 = vmul.f32 %v2011_v41, %v4084_v0  ;;  %v1810_v60 = vsel %vm130_vm6, %v6684_v51, %v6683_v48  ;;  %v1834_v46 = vsel %vm130_vm6, %v6685_v37, %v6684_v51  ;;  %v6686_v58 = vld [vmem:[#allocation67_spill] sm:$0xff] }
 0x4ae   :  { %v1775_v26 = vpop.permute.xlu1 %1774  ;;  %2658 = vmatpush1.msra.mxu0 %v5306_v9  ;;  %2799 = vmatprep.subr.mxu1 %v2047_v43  ;;  %v2043_v5 = vmul.f32 %v2009_v20, %v4081_v63  ;;  %v1807_v56 = vsel %vm130_vm6, %v6687_v18, %v6686_v58  ;;  %v6688_v9 = vld [vmem:[#allocation94_spill] sm:$0xff]  ;;  %v6691_v20 = vld [vmem:[#allocation69_spill] sm:$0xff] }
 0x4af   :  { %v1835_v36 = vsel %vm130_vm6, %v1775_v26, %v5242_v59  ;;  %2659 = vmatprep.subr.mxu0 %v1849_v40  ;;  %3682 = vmatmul.mubr.msk.f32.vlgmr.msra.gmra.mxu1 %vm2638_vm9, %v5443_v2  ;;  %v1915_v52 = vsel %vm197_vm5, %v6688_v9, %v5381_v31  ;;  %v6689_v59 = vmov 0.0   ;;  %v6690_v43 = vld [vmem:[#allocation58_spill] sm:$0xff]  ;;  %v1833_v51 = vsel %vm130_vm6, %v6691_v20, %v6687_v18 }
 0x4b0   :  { %v1848_v41 = vmul.f32 %v1835_v36, %v6576_v23  ;;  %2800 = vmatpush1.msra.mxu1 %v2046_v3  ;;  %v5478_v8 = vpop.permute.xlu0 %2102  ;;  %2792 = vmatprep.mubr.f32.mxu1 %v6689_v59  ;;  %v1908_v40 = vsel %vm197_vm5, %v5072_v17, %v6690_v43  ;;  %v1914_v39 = vsel %vm197_vm5, %v5358_v4, %v6688_v9  ;;  %v6695_v9 = vld [vmem:[#allocation80_spill] sm:$0xff] }
 0x4b1   :  { %2801 = vmatprep.subr.mxu1 %v2043_v5  ;;  %v1845_v31 = vmul.f32 %v1810_v60, %v6577_v38  ;;  %v1909_v3 = vsel %vm197_vm5, %v6690_v43, %v5080_v25  ;;  %v1844_v36 = vmul.f32 %v1834_v46, %v6576_v23  ;;  %v1912_v17 = vsel %vm197_vm5, %v6692_v24, %v5226_v33  ;;  %v6693_v33 = vld [vmem:[#allocation95_spill] sm:$0xff]  ;;  %v6696_v43 = vld [vmem:[#allocation88_spill] sm:$0xff] }
 0x4b2   :  { %2802 = vmatpush1.msra.mxu1 %v2042_v12  ;;  %v5498_v2 = vpop.permute.xlu1 %1700  ;;  %2660 = vmatpush1.msra.mxu0 %v1848_v41  ;;  %v1911_v4 = vsel %vm197_vm5, %v5175_v7, %v6692_v24  ;;  %v1951_v60 = vmul.f32 %v1915_v52, %v6572_v57  ;;  %v1841_v25 = vmul.f32 %v1807_v56, %v6577_v38  ;;  %v6694_v56 = vld [vmem:[#allocation87_spill] sm:$0xff] }
 0x4b3   :  { %2803 = vmatprep.subr.mxu1 %v5314_v47  ;;  %2661 = vmatprep.subr.mxu0 %v1845_v31  ;;  %v1840_v46 = vmul.f32 %v1833_v51, %v6576_v23  ;;  %v1950_v5 = vmul.f32 %v1914_v39, %v4113_v49  ;;  %v1713_v12 = vsel %vm63_vm7, %v6693_v33, %v5498_v2  ;;  %v6697_v51 = vld [vmem:[#allocation71_spill] sm:$0xff]  ;;  %v6698_v31 = vld [vmem:[#allocation61_spill] sm:$0xff] }
 0x4b4   :  { %2804 = vmatpush1.msra.mxu1 %v5268_v27  ;;  %2662 = vmatpush1.msra.mxu0 %v1844_v36  ;;  %v5512_v18 = vpop.permute.xlu0 %2094  ;;  %v1732_v24 = vsel %vm63_vm7, %v6681_v35, %v6676_v14  ;;  %v1942_v7 = vmul.f32 %v1908_v40, %v4113_v49  ;;  %v1947_v47 = vmul.f32 %v1912_v17, %v6572_v57  ;;  %v6699_v17 = vld [vmem:[#allocation97_spill] sm:$0xff] }
 0x4b5   :  { %2805 = vmatprep.subr.mxu1 %v1951_v60  ;;  %2663 = vmatprep.subr.mxu0 %v1841_v25  ;;  %v1946_v39 = vmul.f32 %v1911_v4, %v4113_v49  ;;  %v1710_v52 = vsel %vm63_vm7, %v6695_v9, %v6694_v56  ;;  %v1943_v41 = vmul.f32 %v1909_v3, %v6572_v57  ;;  %v6700_v3 = vld [vmem:[#allocation27_spill] sm:$0xff] }
 0x4b6   :  { %2806 = vmatpush1.msra.mxu1 %v1950_v5  ;;  %v1663_v27 = vpop.permute.xlu1 %1662  ;;  %2664 = vmatpush1.msra.mxu0 %v1840_v46  ;;  %v1734_v14 = vsel %vm63_vm7, %v6696_v43, %v6695_v9  ;;  %v1749_v40 = vmul.f32 %v1713_v12, %v6682_v6  ;;  %v1707_v36 = vsel %vm63_vm7, %v6698_v31, %v6697_v51  ;;  %v6701_v46 = vld [vmem:[#allocation72_spill] sm:$0xff]  ;;  %v6702_v12 = vld [vmem:[#allocation82_spill] sm:$0xff] }
 0x4b7   :  { %v1735_v35 = vsel %vm63_vm7, %v1663_v27, %v6693_v33  ;;  %2807 = vmatprep.subr.mxu1 %v1947_v47  ;;  %2665 = vmatprep.subr.mxu0 %v5340_v10  ;;  %v1815_v4 = vsel %vm130_vm6, %v6699_v17, %v1775_v26  ;;  %v1733_v10 = vsel %vm63_vm7, %v6701_v46, %v6698_v31  ;;  %v6706_v31 = vld [vmem:[#allocation56_spill] sm:$0xff] }
 0x4b8   :  { %v1748_v60 = vmul.f32 %v1735_v35, %v6700_v3  ;;  %2808 = vmatpush1.msra.mxu1 %v1946_v39  ;;  %2666 = vmatpush1.msra.mxu0 %v5346_v22  ;;  %v5538_v25 = vpop.permute.xlu0 %2206  ;;  %v1814_v5 = vsel %vm130_vm6, %v5420_v13, %v6699_v17  ;;  %v1745_v33 = vmul.f32 %v1710_v52, %v6682_v6  ;;  %v6703_v52 = vld [vmem:[#allocation63_spill] sm:$0xff]  ;;  %v6707_v17 = vld [vmem:[#allocation76_spill] sm:$0xff] }
 0x4b9   :  { %2809 = vmatprep.subr.mxu1 %v1943_v41  ;;  %2667 = vmatprep.subr.mxu0 %v1749_v40  ;;  %v1736_v26 = vmul.f32 %v1732_v24, %v6700_v3  ;;  %v1812_v22 = vsel %vm130_vm6, %v6702_v12, %v6685_v37  ;;  %v1744_v47 = vmul.f32 %v1734_v14, %v6700_v3 }
 0x4ba   :  { %2810 = vmatpush1.msra.mxu1 %v1942_v7  ;;  %v5552_v39 = vpop.permute.xlu1 %2104  ;;  %2668 = vmatpush1.msra.mxu0 %v1748_v60  ;;  %v1811_v13 = vsel %vm130_vm6, %v6683_v48, %v6702_v12  ;;  %v1851_v9 = vmul.f32 %v1815_v4, %v6578_v19  ;;  %v1741_v24 = vmul.f32 %v1707_v36, %v6682_v6  ;;  %v6704_v48 = vld [vmem:[#allocation66_spill] sm:$0xff]  ;;  %v6708_v4 = vld [vmem:[#allocation89_spill] sm:$0xff]  ;;  %v6710_v12 = vld [vmem:[#allocation28_spill] sm:$0xff] }
 0x4bb   :  { %2811 = vmatprep.subr.mxu1 %v5317_v53  ;;  %2669 = vmatprep.subr.mxu0 %v1745_v33  ;;  %v1809_v37 = vsel %vm130_vm6, %v6703_v52, %v6691_v20  ;;  %v1740_v7 = vmul.f32 %v1733_v10, %v6700_v3  ;;  %v1850_v41 = vmul.f32 %v1814_v5, %v6575_v42  ;;  %v6705_v53 = vld [vmem:[#allocation65_spill] sm:$0xff] }
 0x4bc   :  { %2812 = vmatpush1.msra.mxu1 %v5280_v21  ;;  %2670 = vmatpush1.msra.mxu0 %v1744_v47  ;;  %v5566_v14 = vpop.permute.xlu0 %2086  ;;  %v2319_v35 = vsel %vm471_vm1, %v6705_v53, %v6704_v48  ;;  %v1808_v40 = vsel %vm130_vm6, %v6686_v58, %v6703_v52  ;;  %v1847_v20 = vmul.f32 %v1812_v22, %v6578_v19  ;;  %v6709_v58 = vld [vmem:[#allocation83_spill] sm:$0xff] }
 0x4bd   :  { %2813 = vmatprep.subr.mxu1 %v1851_v9  ;;  %2671 = vmatprep.subr.mxu0 %v1741_v24  ;;  %v2320_v36 = vsel %vm471_vm1, %v6704_v48, %v6706_v31  ;;  %v1846_v21 = vmul.f32 %v1811_v13, %v6575_v42  ;;  %v2323_v60 = vsel %vm471_vm1, %v6708_v4, %v6707_v17  ;;  %v6711_v9 = vld [vmem:[#allocation96_spill] sm:$0xff] }
 0x4be   :  { %2814 = vmatpush1.msra.mxu1 %v1850_v41  ;;  %v5582_v10 = vpop.permute.xlu1 %2100  ;;  %2672 = vmatpush1.msra.mxu0 %v1740_v7  ;;  %v2322_v5 = vsel %vm471_vm1, %v6709_v58, %v6708_v4  ;;  %v1843_v33 = vmul.f32 %v1809_v37, %v6578_v19  ;;  %v5591_v22 = vmul.f32 %v5451_v62, %v6710_v12  ;;  %v6712_v37 = vmov 1.0   ;;  %v6713_v41 = vld [vmem:[#allocation68_spill] sm:$0xff]  ;;  %v6717_v4 = vld [vmem:[#allocation59_spill] sm:$0xff] }
 0x4bf   :  { %2815 = vmatprep.subr.mxu1 %v1847_v20  ;;  %2673 = vmatprep.subr.mxu0 %v5455_v50  ;;  %v2356_v47 = vmul.f32 %v2319_v35, %v6597_v28  ;;  %v1842_v13 = vmul.f32 %v1808_v40, %v6575_v42  ;;  %v1715_v24 = vsel %vm63_vm7, %v6711_v9, %v1663_v27  ;;  %v6714_v48 = vld [vmem:[#allocation64_spill] sm:$0xff]  ;;  %v6715_v27 = vld [vmem:[#allocation78_spill] sm:$0xff] }
 0x4c0   :  { %2816 = vmatpush1.msra.mxu1 %v1846_v21  ;;  %2674 = vmatpush1.msra.mxu0 %v1736_v26  ;;  %v5597_v52 = vpop.permute.xlu0 %2198  ;;  %v1714_v50 = vsel %vm63_vm7, %v5498_v2, %v6711_v9  ;;  %v2361_v62 = vmul.f32 %v2323_v60, %v6596_v44  ;;  %v2357_v7 = vmul.f32 %v2320_v36, %v6596_v44  ;;  %v6716_v2 = vld [vmem:[#allocation62_spill] sm:$0xff] }
 0x4c1   :  { %2817 = vmatprep.subr.mxu1 %v1843_v33  ;;  %2675 = vmatprep.subr.mxu0 %v6712_v37  ;;  %v2219_v35 = vsel %vm404_vm2, %v6714_v48, %v6713_v41  ;;  %v1712_v26 = vsel %vm63_vm7, %v6715_v27, %v6696_v43  ;;  %v2360_v40 = vmul.f32 %v2322_v5, %v6597_v28 }
 0x4c2   :  { %2818 = vmatpush1.msra.mxu1 %v1842_v13  ;;  %v5612_v20 = vpop.permute.xlu1 %2096  ;;  %2676 = vmatpush1.msra.mxu0 %v6712_v37  ;;  %v2220_v21 = vsel %vm404_vm2, %v6713_v41, %v6716_v2  ;;  %v1711_v36 = vsel %vm63_vm7, %v6694_v56, %v6715_v27  ;;  %v1751_v43 = vmul.f32 %v1715_v24, %v6710_v12  ;;  %v6718_v56 = vld [vmem:[#allocation98_spill] sm:$0xff] }
 0x4c3   :  { %2819 = vmatprep.subr.mxu1 %v5361_v45  ;;  %2677 = vmatprep.subr.mxu0 %v2361_v62  ;;  %v1708_v60 = vsel %vm63_vm7, %v6697_v51, %v6717_v4  ;;  %v1709_v5 = vsel %vm63_vm7, %v6717_v4, %v6701_v46  ;;  %v1750_v33 = vmul.f32 %v1714_v50, %v6680_v1  ;;  %v6719_v62 = vld [vmem:[#allocation84_spill] sm:$0xff]  ;;  %v6720_v46 = vld [vmem:[#allocation90_spill] sm:$0xff] }
 0x4c4   :  { %2820 = vmatpush1.msra.mxu1 %v5325_v29  ;;  %2678 = vmatpush2.msra.mxu0 %v2360_v40  ;;  %v2211_v13 = vpop.permute.xlu0 %2210  ;;  %v1747_v51 = vmul.f32 %v1712_v26, %v6710_v12  ;;  %v1746_v24 = vmul.f32 %v1711_v36, %v6680_v1  ;;  %v2223_v50 = vsel %vm404_vm2, %v6720_v46, %v6719_v62  ;;  %v6721_v27 = vld [vmem:[#allocation70_spill] sm:$0xff] }
 0x4c5   :  { %2821 = vmatprep.subr.mxu1 %v1751_v43  ;;  %v2225_v45 = vsel %vm404_vm2, %v5291_v15, %v2211_v13  ;;  %v2226_v9 = vsel %vm404_vm2, %v2211_v13, %v6718_v56  ;;  %2679 = vmatprep.subr.mxu0 %v2357_v7  ;;  %v2321_v40 = vsel %vm471_vm1, %v6706_v31, %v6721_v27  ;;  %v6722_v7 = vld [vmem:[#allocation81_spill] sm:$0xff]  ;;  %v6724_v13 = vld [vmem:[#allocation100_spill] sm:$0xff] }
 0x4c6   :  { %v2265_v29 = vmul.f32 %v2226_v9, %v6674_v16  ;;  %2822 = vmatpush1.msra.mxu1 %v1750_v33  ;;  %v5641_v41 = vpop.permute.xlu1 %2092  ;;  %2680 = vmatpush2.msra.mxu0 %v2356_v47  ;;  %v2222_v26 = vsel %vm404_vm2, %v6722_v7, %v6720_v46  ;;  %v1743_v36 = vmul.f32 %v1709_v5, %v6710_v12  ;;  %v6723_v47 = vld [vmem:[#allocation8_spill] sm:$0xff] }
 0x4c7   :  { %2823 = vmatprep.subr.mxu1 %v1747_v51  ;;  %2681 = vmatprep.subr.mxu0 %v5343_v32  ;;  %v2349_v43 = vsel %vm471_vm1, %v6721_v27, %v6705_v53  ;;  %v1742_v4 = vmul.f32 %v1708_v60, %v6680_v1  ;;  %v2264_v33 = vmul.f32 %v2225_v45, %v6723_v47  ;;  %v6725_v51 = vld [vmem:[#allocation91_spill] sm:$0xff] }
 0x4c8   :  { %2824 = vmatpush1.msra.mxu1 %v1746_v24  ;;  %2682 = vmatpush2.msra.mxu0 %v6724_v13  ;;  %v5657_v31 = vpop.permute.xlu0 %2190  ;;  %v2256_v9 = vmul.f32 %v2219_v35, %v6723_v47  ;;  %v2350_v32 = vsel %vm471_vm1, %v6725_v51, %v6709_v58  ;;  %v2261_v5 = vmul.f32 %v2223_v50, %v6674_v16  ;;  %v6726_v53 = vld [vmem:[#allocation7_spill] sm:$0xff]  ;;  %v6727_v58 = vld [vmem:[#allocation30_spill] sm:$0xff] }
 0x4c9   :  { %2825 = vmatprep.subr.mxu1 %v1743_v36  ;;  %2683 = vmatprep.subr.mxu0 %v2265_v29  ;;  %v2358_v46 = vmul.f32 %v2321_v40, %v6726_v53  ;;  %v2260_v60 = vmul.f32 %v2222_v26, %v6723_v47  ;;  %v2257_v24 = vmul.f32 %v2220_v21, %v6674_v16  ;;  %v6728_v50 = vld [vmem:[#allocation6_spill] sm:$0xff]  ;;  %v6729_v40 = vld [vmem:[#allocation47_spill] sm:$0xff] }
 0x4ca   :  { %2826 = vmatpush1.msra.mxu1 %v1742_v4  ;;  %v5666_v45 = vpop.permute.xlu1 %2088  ;;  %2684 = vmatpush2.msra.mxu0 %v2264_v33  ;;  %v2324_v35 = vsel %vm471_vm1, %v6707_v17, %v6725_v51  ;;  %v2318_v29 = vsel %vm471_vm1, %v6727_v58, %v5436_v30  ;;  %v2359_v27 = vmul.f32 %v2349_v43, %v6728_v50  ;;  %v6731_v13 = vld [vmem:[#allocation11_spill] sm:$0xff] }
 0x4cb   :  { %2827 = vmatprep.subr.mxu1 %v5591_v22  ;;  %2685 = vmatprep.subr.mxu0 %v2261_v5  ;;  %v2348_v26 = vsel %vm471_vm1, %v5436_v30, %v6729_v40  ;;  %v2123_v21 = vsel %vm337_vm3, %v5478_v8, %v5552_v39  ;;  %v2363_v36 = vmul.f32 %v2350_v32, %v6728_v50  ;;  %v6730_v30 = vld [vmem:[#allocation99_spill] sm:$0xff] }
 0x4cc   :  { %2828 = vmatpush1.msra.mxu1 %v5446_v55  ;;  %2686 = vmatpush2.msra.mxu0 %v2260_v60  ;;  %v2111_v17 = vpop.permute.xlu0 %2110  ;;  %v2122_v22 = vsel %vm337_vm3, %v5582_v10, %v5478_v8  ;;  %v2362_v33 = vmul.f32 %v2324_v35, %v6726_v53  ;;  %v2354_v55 = vmul.f32 %v2318_v29, %v6726_v53 }
 0x4cd   :  { %2829 = vmatprep.subr.mxu1 %v6712_v37  ;;  %v2125_v43 = vsel %vm337_vm3, %v5394_v34, %v2111_v17  ;;  %v2126_v4 = vsel %vm337_vm3, %v2111_v17, %v6730_v30  ;;  %2687 = vmatprep.subr.mxu0 %v2257_v24  ;;  %v2250_v8 = vsel %vm404_vm2, %v5538_v25, %v6722_v7  ;;  %v6732_v24 = vld [vmem:[#allocation12_spill] sm:$0xff]  ;;  %v6734_v17 = vld [vmem:[#allocation10_spill] sm:$0xff] }
 0x4ce   :  { %v2165_v51 = vmul.f32 %v2126_v4, %v6731_v13  ;;  %2830 = vmatpush1.msra.mxu1 %v6712_v37  ;;  %v5697_v32 = vpop.permute.xlu1 %2084  ;;  %2688 = vmatpush2.msra.mxu0 %v2256_v9  ;;  %v2161_v5 = vmul.f32 %v2123_v21, %v6731_v13  ;;  %v2355_v60 = vmul.f32 %v2348_v26, %v6728_v50  ;;  %v6733_v9 = vld [vmem:[#allocation101_spill] sm:$0xff] }
 0x4cf   :  { %2831 = vmatprep.subr.mxu1 %v2363_v36  ;;  %2689 = vmatprep.subr.mxu0 %v5397_v11  ;;  %v2160_v35 = vmul.f32 %v2122_v22, %v6732_v24  ;;  %v2120_v58 = vsel %vm337_vm3, %v5512_v18, %v5612_v20  ;;  %v2164_v29 = vmul.f32 %v2125_v43, %v6732_v24  ;;  %v6735_v22 = vld [vmem:[#allocation9_spill] sm:$0xff] }
 0x4d0   :  { %2832 = vmatpush2.msra.mxu1 %v2362_v33  ;;  %2690 = vmatpush2.msra.mxu0 %v6733_v9  ;;  %v2215_v40 = vpop.permute.xlu0 %2214  ;;  %v2119_v7 = vsel %vm337_vm3, %v5641_v41, %v5512_v18  ;;  %v2117_v21 = vsel %vm337_vm3, %v5566_v14, %v5666_v45  ;;  %v2224_v18 = vsel %vm404_vm2, %v6719_v62, %v5538_v25 }
 0x4d1   :  { %2833 = vmatprep.subr.mxu1 %v2359_v27  ;;  %v2227_v11 = vsel %vm404_vm2, %v6718_v56, %v2215_v40  ;;  %v2251_v26 = vsel %vm404_vm2, %v2215_v40, %v5291_v15  ;;  %2691 = vmatprep.subr.mxu0 %v2165_v51  ;;  %v2157_v56 = vmul.f32 %v2120_v58, %v6731_v13 }
 0x4d2   :  { %v2266_v36 = vmul.f32 %v2227_v11, %v6734_v17  ;;  %v2267_v43 = vmul.f32 %v2251_v26, %v6735_v22  ;;  %2834 = vmatpush2.msra.mxu1 %v2358_v46  ;;  %v2099_v4 = vpop.permute.xlu1 %2098  ;;  %2692 = vmatpush2.msra.mxu0 %v2164_v29  ;;  %v2116_v15 = vsel %vm337_vm3, %v5697_v32, %v5566_v14 }
 0x4d3   :  { %2835 = vmatprep.subr.mxu1 %v2355_v60  ;;  %2693 = vmatprep.subr.mxu0 %v2161_v5  ;;  %v2249_v27 = vsel %vm404_vm2, %v5597_v52, %v6714_v48  ;;  %v2156_v46 = vmul.f32 %v2119_v7, %v6732_v24  ;;  %v2263_v51 = vmul.f32 %v2250_v8, %v6735_v22  ;;  %v6736_v5 = vld [vmem:[#allocation46_spill] sm:$0xff]  ;;  %v6738_v7 = vld [vmem:[#allocation57_spill] sm:$0xff] }
 0x4d4   :  { %2836 = vmatpush2.msra.mxu1 %v2354_v55  ;;  %2694 = vmatpush2.msra.mxu0 %v2160_v35  ;;  %v2107_v33 = vpop.permute.xlu0 %2106  ;;  %v2221_v25 = vsel %vm404_vm2, %v6716_v2, %v5597_v52  ;;  %v2153_v62 = vmul.f32 %v2117_v21, %v6731_v13  ;;  %v2262_v14 = vmul.f32 %v2224_v18, %v6734_v17  ;;  %v6737_v35 = vld [vmem:[#allocation31_spill] sm:$0xff]  ;;  %v6741_v18 = vld [vmem:[#allocation41_spill] sm:$0xff] }
 0x4d5   :  { %2837 = vmatprep.subr.mxu1 %v2267_v43  ;;  %2695 = vmatprep.subr.mxu0 %v2157_v56  ;;  %v2248_v48 = vsel %vm404_vm2, %v5657_v31, %v6736_v5  ;;  %v2152_v55 = vmul.f32 %v2116_v15, %v6732_v24  ;;  %v2259_v8 = vmul.f32 %v2249_v27, %v6735_v22  ;;  %v6742_v56 = vld [vmem:[#allocation14_spill] sm:$0xff] }
 0x4d6   :  { %2838 = vmatpush2.msra.mxu1 %v2266_v36  ;;  %v2115_v60 = vpop.permute.xlu1 %2114  ;;  %2696 = vmatpush2.msra.mxu0 %v2156_v46  ;;  %v2218_v52 = vsel %vm404_vm2, %v6737_v35, %v5657_v31  ;;  %v2258_v2 = vmul.f32 %v2221_v25, %v6734_v17  ;;  %v2255_v9 = vmul.f32 %v2248_v48, %v6735_v22  ;;  %v6743_v27 = vld [vmem:[#allocation34_spill] sm:$0xff]  ;;  %v6746_v48 = vld [vmem:[#allocation15_spill] sm:$0xff]  ;;  %v6748_v35 = vld [vmem:[#allocation16_spill] sm:$0xff] }
 0x4d7   :  { %2839 = vmatprep.subr.mxu1 %v2263_v51  ;;  %2697 = vmatprep.subr.mxu0 %v2153_v62  ;;  %v2151_v58 = vsel %vm337_vm3, %v2115_v60, %v5394_v34  ;;  %v2127_v40 = vsel %vm337_vm3, %v6730_v30, %v2115_v60  ;;  %v2254_v31 = vmul.f32 %v2218_v52, %v6734_v17  ;;  %v6739_v34 = vld [vmem:[#allocation49_spill] sm:$0xff]  ;;  %v6745_v5 = vld [vmem:[#allocation22_spill] sm:$0xff]  ;;  %v6747_v60 = vld [vmem:[#allocation40_spill] sm:$0xff] }
 0x4d8   :  { %2840 = vmatpush2.msra.mxu1 %v2262_v14  ;;  %2698 = vmatpush2.msra.mxu0 %v2152_v55  ;;  %v1999_v29 = vpop.permute.xlu0 %1998  ;;  %v2150_v11 = vsel %vm337_vm3, %v2107_v33, %v5582_v10  ;;  %v2149_v21 = vsel %vm337_vm3, %v2099_v4, %v5641_v41  ;;  %v2124_v36 = vsel %vm337_vm3, %v5552_v39, %v2107_v33  ;;  %v6740_v30 = vld [vmem:[#allocation13_spill] sm:$0xff]  ;;  %v6744_v39 = vld [vmem:[#allocation44_spill] sm:$0xff] }
 0x4d9   :  { %2841 = vmatprep.subr.mxu1 %v2259_v8  ;;  %2699 = vmatprep.subr.mxu0 %v6738_v7  ;;  %v2167_v43 = vmul.f32 %v2151_v58, %v6740_v30  ;;  %v2166_v15 = vmul.f32 %v2127_v40, %v6742_v56  ;;  %v2121_v41 = vsel %vm337_vm3, %v5612_v20, %v2099_v4  ;;  %v5791_v58 = vld [vmem:[%s6350_s2 + $0x20] sm:$0xff]  ;;  %v6751_v40 = vld [vmem:[#allocation93_spill] sm:$0xff] }
 0x4da   :  { %2842 = vmatpush2.msra.mxu1 %v2258_v2  ;;  %v5758_v26 = vpop.permute.xlu1 %2000  ;;  %2700 = vmatpush2.msra.mxu0 %v6739_v34  ;;  %v2163_v51 = vmul.f32 %v2150_v11, %v6740_v30  ;;  %v2159_v33 = vmul.f32 %v2149_v21, %v6740_v30  ;;  %v2162_v25 = vmul.f32 %v2124_v36, %v6742_v56  ;;  %v5802_v11 = vld [vmem:[%s6349_s1 + $0x30] ss:$0 sm:$0xff]  ;;  %v5808_v21 = vld [vmem:[%s6349_s1 + $0x38] ss:$0 sm:$0xff] }
 0x4db   :  { %2843 = vmatprep.subr.mxu1 %v2255_v9  ;;  %2701 = vmatprep.subr.mxu0 %v6741_v18  ;;  %v2013_v10 = vsel %vm264_vm4, %v1999_v29, %v5758_v26  ;;  %v2158_v8 = vmul.f32 %v2121_v41, %v6742_v56  ;;  %6752 = vst [vmem:[#allocation50_spill] sm:$0xff] %v5802_v11  ;;  %6753 = vst [vmem:[#allocation45_spill] sm:$0xff] %v5808_v21  ;;  %v6754_v18 = vld [vmem:[#allocation73_spill] sm:$0xff] }
 0x4dc   :  { %2844 = vmatpush2.msra.mxu1 %v2254_v31  ;;  %2702 = vmatpush2.msra.mxu0 %v6743_v27  ;;  %v2091_v46 = vpop.permute.xlu0 %2090  ;;  %v2049_v55 = vmul.f32 %v2013_v10, %v6746_v48  ;;  %v6755_v10 = vld [vmem:[#allocation74_spill] sm:$0xff] }
 0x4dd   :  { %2845 = vmatprep.subr.mxu1 %v2167_v43  ;;  %2703 = vmatprep.subr.mxu0 %v6744_v39  ;;  %v2148_v62 = vsel %vm337_vm3, %v2091_v46, %v5697_v32  ;;  %v2118_v20 = vsel %vm337_vm3, %v5666_v45, %v2091_v46  ;;  %v6749_v32 = vld [vmem:[#allocation35_spill] sm:$0xff]  ;;  %v2488_v46 = vld [vmem:[%s6350_s2 + $0x70] sm:$0xff] }
 0x4de   :  { %2846 = vmatpush2.msra.mxu1 %v2166_v15  ;;  %v1975_v14 = vpop.permute.xlu1 %1974  ;;  %2704 = vmatpush2.msra.mxu0 %v6745_v5  ;;  %v2155_v45 = vmul.f32 %v2148_v62, %v6740_v30  ;;  %v2154_v31 = vmul.f32 %v2118_v20, %v6742_v56  ;;  %v6758_v5 = vld [vmem:[#allocation54_spill] sm:$0xff]  ;;  %v2487_v20 = vld [vmem:[%s6350_s2 + $0x68] sm:$0xff] }
 0x4df   :  { %v2035_v4 = vsel %vm264_vm4, %v1975_v14, %v1999_v29  ;;  %2847 = vmatprep.subr.mxu1 %v2163_v51  ;;  %2705 = vmatprep.subr.mxu0 %v6747_v60  ;;  %v6750_v29 = vld [vmem:[#allocation92_spill] sm:$0xff] }
 0x4e0   :  { %v2048_v52 = vmul.f32 %v2035_v4, %v6748_v35  ;;  %2848 = vmatpush2.msra.mxu1 %v2162_v25  ;;  %2706 = vmatpush2.msra.mxu0 %v6749_v32  ;;  %v2415_v2 = vpop.permute.xlu0 %2414  ;;  %v6757_v25 = vld [vmem:[#allocation52_spill] sm:$0xff]  ;;  %v2489_v4 = vld [vmem:[%s6350_s2 + $0x78] sm:$0xff] }
 0x4e1   :  { %2849 = vmatprep.subr.mxu1 %v2159_v33  ;;  %v2427_v9 = vsel %vm538_vm8, %v6750_v29, %v2415_v2  ;;  %v2451_v7 = vsel %vm538_vm8, %v2415_v2, %v6751_v40  ;;  %2707 = vmatprep.subr.mxu0 %v2049_v55  ;;  %v6756_v33 = vld [vmem:[#allocation60_spill] sm:$0xff]  ;;  %v6760_v2 = vld [vmem:[#allocation39_spill] sm:$0xff]  ;;  %v6762_v40 = vld [vmem:[#allocation33_spill] sm:$0xff] }
 0x4e2   :  { %v2466_v34 = vmul.f32 %v5802_v11, %v2427_v9  ;;  %v2467_v36 = vmul.f32 %v5808_v21, %v2451_v7  ;;  %2850 = vmatpush2.msra.mxu1 %v2158_v8  ;;  %v2407_v43 = vpop.permute.xlu1 %2406  ;;  %2708 = vmatpush2.msra.mxu0 %v2048_v52  ;;  %v6759_v8 = vld [vmem:[#allocation48_spill] sm:$0xff]  ;;  %v6761_v29 = vld [vmem:[#allocation43_spill] sm:$0xff] }
 0x4e3   :  { %v2424_v15 = vsel %vm538_vm8, %v6754_v18, %v2407_v43  ;;  %v2450_v27 = vsel %vm538_vm8, %v2407_v43, %v6755_v10  ;;  %2851 = vmatprep.subr.mxu1 %v2155_v45  ;;  %2710 = vmatmul.mubr.f32.vlgmr.msra.gmra.mxu0 %v5791_v58 }
 0x4e4   :  { %v2463_v41 = vmul.f32 %v5808_v21, %v2450_v27  ;;  %2852 = vmatpush2.msra.mxu1 %v2154_v31  ;;  %2898 = vmatprep.subr.mxu0 %v2467_v36  ;;  %v2399_v51 = vpop.permute.xlu0 %2398  ;;  %v2462_v39 = vmul.f32 %v5802_v11, %v2424_v15  ;;  %v6763_v36 = vld [vmem:[#allocation37_spill] sm:$0xff]  ;;  %v6764_v15 = vld [vmem:[#allocation36_spill] sm:$0xff] }
 0x4e5   :  { %2853 = vmatprep.subr.mxu1 %v6756_v33  ;;  %v2421_v62 = vsel %vm538_vm8, %v6757_v25, %v2399_v51  ;;  %v2449_v55 = vsel %vm538_vm8, %v2399_v51, %v6758_v5  ;;  %2899 = vmatpush1.msra.mxu0 %v2466_v34  ;;  %v6765_v51 = vld [vmem:[#allocation42_spill] sm:$0xff]  ;;  %v6766_v25 = vld [vmem:[#allocation23_spill] sm:$0xff] }
 0x4e6   :  { %v2459_v60 = vmul.f32 %v5808_v21, %v2449_v55  ;;  %2854 = vmatpush2.msra.mxu1 %v6759_v8  ;;  %v2391_v52 = vpop.permute.xlu1 %2390  ;;  %2715 = vmatprep.mubr.f32.mxu0 %v2488_v46  ;;  %v2458_v32 = vmul.f32 %v5802_v11, %v2421_v62  ;;  %v6767_v62 = vld [vmem:[#allocation38_spill] sm:$0xff]  ;;  %v6768_v5 = vld [vmem:[#allocation79_spill] sm:$0xff] }
 0x4e7   :  { %v2418_v45 = vsel %vm538_vm8, %v6760_v2, %v2391_v52  ;;  %v2448_v9 = vsel %vm538_vm8, %v2391_v52, %v6761_v29  ;;  %2855 = vmatprep.subr.mxu1 %v6762_v40  ;;  %2900 = vmatprep.subr.mxu0 %v2463_v41 }
 0x4e8   :  { %v2455_v7 = vmul.f32 %v5808_v21, %v2448_v9  ;;  %2716 = vmatmul.mubr.f32.gmra.mxu0 %v2487_v20  ;;  %3683 = vmatmul.mubr.msk.f32.gmra.mxu1 %vm2638_vm9, %v2489_v4  ;;  %v2003_v31 = vpop.permute.xlu0 %2002  ;;  %v2454_v34 = vmul.f32 %v5802_v11, %v2418_v45 }
 0x4e9   :  { %2856 = vmatpush2.msra.mxu1 %v6763_v36  ;;  %2901 = vmatpush1.msra.mxu0 %v2462_v39  ;;  %v2014_v43 = vsel %vm264_vm4, %v5758_v26, %v2003_v31  ;;  %v2015_v18 = vsel %vm264_vm4, %v2003_v31, %v1975_v14 }
 0x4ea   :  { %2857 = vmatprep.subr.mxu1 %v6764_v15  ;;  %2902 = vmatprep.subr.mxu0 %v2459_v60  ;;  %v2051_v10 = vmul.f32 %v2015_v18, %v4081_v63  ;;  %v2315_v27 = vpop.permute.xlu1 %2314  ;;  %v2050_v41 = vmul.f32 %v2014_v43, %v4084_v0 }
 0x4eb   :  { %2858 = vmatpush2.msra.mxu1 %v6765_v51  ;;  %2903 = vmatpush1.msra.mxu0 %v2458_v32  ;;  %v2327_v33 = vsel %vm471_vm1, %v5244_v54, %v2315_v27  ;;  %v2351_v39 = vsel %vm471_vm1, %v2315_v27, %v5248_v61  ;;  %v6769_v54 = vld [vmem:[#allocation5_spill] sm:$0xff] }
 0x4ec   :  { %v2366_v26 = vmul.f32 %v2327_v33, %v6726_v53  ;;  %v2367_v14 = vmul.f32 %v2351_v39, %v6728_v50  ;;  %2859 = vmatprep.subr.mxu1 %v6766_v25  ;;  %2904 = vmatprep.subr.mxu0 %v2455_v7 }
 0x4ed   :  { %2860 = vmatpush2.msra.mxu1 %v6767_v62  ;;  %2905 = vmatpush1.msra.mxu0 %v2454_v34 }
 0x4ee   :  { %2861 = vmatprep.subr.mxu1 %v2051_v10  ;;  %2906 = vmatprep.subr.mxu0 %v2367_v14 }
 0x4ef   :  { %2862 = vmatpush2.msra.mxu1 %v2050_v41  ;;  %2863 = vmatprep.mubr.f32.mxu1 %v6768_v5 }
 0x4f0   :  { %2907 = vmatpush1.msra.mxu0 %v2366_v26  ;;  %2940 = vmatprep.mubr.f32.mxu0 %v6689_v59 }
 0x4f1   :  { %2864 = vmatmul.mubr.f32.vlgmr.msra.gmra.mxu1 %v5791_v58  ;;  %3684 = vmatmul.mubr.msk.f32.vlgmr.msra.gmra.mxu0 %vm2638_vm9, %v6769_v54 }
 0x4f2   :  { %2869 = vmatprep.mubr.f32.mxu1 %v2488_v46  ;;  %2946 = vmatprep.mubr.f32.mxu0 %v6689_v59 }
 0x4f5   :  { %2870 = vmatmul.mubr.f32.gmra.mxu1 %v2487_v20  ;;  %3685 = vmatmul.mubr.msk.f32.gmra.mxu0 %vm2638_vm9, %v2489_v4  ;;  %v2966_v52 = vpop.permute.xlu0 %2965 }
 0x4f7   :  { %v5866_v55 = vpop.permute.xlu1 %2970 }
 0x4fa   :  { %v5889_v10 = vpop.permute.xlu0 %2986 }
 0x4fc   :  { %v2983_v58 = vpop.permute.xlu1 %2982 }
 0x56f   :  { %v2788_v61 = vpop.f32.mrf.mxu1 }
 0x571   :  { %v2790_v32 = vpop.f32.mrf.mxu1 }
 0x5a3   :  { %v2711_v60 = vpop.f32.mrf.mxu0 }
 0x5a4   :  { %v2789_v8 = vadd.f32 %v2788_v61, %v2711_v60 }
 0x5a5   :  { %v2713_v2 = vpop.f32.mrf.mxu0 }
 0x5a6   :  { %v2953_v45 = vmax.f32 %v2789_v8, 0.0  ;;  %v2791_v29 = vadd.f32 %v2790_v32, %v2713_v2 }
 0x5a8   :  { %v2973_v9 = vmul.f32 %v2966_v52, %v2953_v45  ;;  %v2954_v40 = vmax.f32 %v2791_v29, 0.0  ;;  %v2717_v46 = vpop.f32.mrf.mxu0  ;;  %v2794_v20 = vpop.f32.mrf.mxu1 }
 0x5a9   :  { %v2795_v4 = vadd.f32 %v2794_v20, %v2717_v46 }
 0x5aa   :  { %v5868_v7 = vadd.f32 %v2983_v58, %v2973_v9  ;;  %v2974_v59 = vmul.f32 %v2966_v52, %v2954_v40  ;;  %v2719_v36 = vpop.f32.mrf.mxu0  ;;  %v2796_v43 = vpop.f32.mrf.mxu1 }
 0x5ab   :  { %v2957_v34 = vmax.f32 %v2795_v4, 0.0  ;;  %v2797_v15 = vadd.f32 %v2796_v43, %v2719_v36 }
 0x5ac   :  { %3263 = vrot.lane.b32.xlu0 %v5868_v7, %s3731_s24  ;;  %3313 = vrot.lane.b32.xlu1 %v5868_v7, %s3730_s19  ;;  %v5878_v31 = vadd.f32 %v2983_v58, %v2974_v59 }
 0x5ad   :  { %v2977_v18 = vmul.f32 %v5866_v55, %v2957_v34  ;;  %v2958_v27 = vmax.f32 %v2797_v15, 0.0 }
 0x5af   :  { %v5896_v41 = vadd.f32 %v5889_v10, %v2977_v18  ;;  %v2978_v51 = vmul.f32 %v5866_v55, %v2958_v27  ;;  %v3414_v18 = vld [vmem:[%s6350_s2 + $0x40] sm:$0xff]  ;;  %v3746_v27 = vmov 6  }
 0x5b0   :  { %3213 = vrot.lane.b32.xlu0 %v5868_v7, %s3732_s7  ;;  %3161 = vrot.lane.b32.xlu1 %v5868_v7, %s3733_s0 }
 0x5b1   :  { %v5908_v33 = vadd.f32 %v5889_v10, %v2978_v51  ;;  %v2865_v39 = vpop.f32.mrf.mxu1  ;;  %v2942_v26 = vpop.f32.mrf.mxu0  ;;  %3686 = vmatprep.mubr.msk.f32.mxu0 %vm669_vm0, %v3414_v18  ;;  %3687 = vmatprep.mubr.msk.f32.mxu1 %vm669_vm0, %v3414_v18  ;;  %v3747_v51 = vmov 7  }
 0x5b2   :  { %v2943_v14 = vadd.f32 %v2942_v26, %v2865_v39  ;;  %3720 = vset.pattern.permute.xlu0 %v3746_v27  ;;  %3721 = vset.pattern.permute.xlu1 %v3747_v51 }
 0x5b3   :  { %v2867_v5 = vpop.f32.mrf.mxu1  ;;  %v2944_v54 = vpop.f32.mrf.mxu0 }
 0x5b4   :  { %3163 = vrot.lane.b32.xlu0 %v5878_v31, %s3733_s0  ;;  %3111 = vrot.lane.b32.xlu1 %v5868_v7, %s3734_s8  ;;  %v2955_v25 = vmax.f32 %v2943_v14, 0.0  ;;  %v2945_v60 = vadd.f32 %v2944_v54, %v2867_v5 }
 0x5b5   :  { %v2871_v45 = vpop.f32.mrf.mxu1  ;;  %v2948_v29 = vpop.f32.mrf.mxu0 }
 0x5b6   :  { %v2975_v62 = vmul.f32 %v2966_v52, %v2955_v25  ;;  %v2956_v8 = vmax.f32 %v2945_v60, 0.0  ;;  %v2949_v9 = vadd.f32 %v2948_v29, %v2871_v45  ;;  %v3727_v25 = vld [vmem:[%s6351_s3] sm:$0xff] }
 0x5b7   :  { %v2873_v59 = vpop.f32.mrf.mxu1  ;;  %v2950_v46 = vpop.f32.mrf.mxu0 }
 0x5b8   :  { %3113 = vrot.lane.b32.xlu0 %v5878_v31, %s3734_s8  ;;  %3061 = vrot.lane.b32.xlu1 %v5868_v7, %s3735_s9  ;;  %v5926_v61 = vadd.f32 %v2983_v58, %v2975_v62  ;;  %v2976_v32 = vmul.f32 %v2966_v52, %v2956_v8  ;;  %v2959_v52 = vmax.f32 %v2949_v9, 0.0  ;;  %v2951_v20 = vadd.f32 %v2950_v46, %v2873_v59 }
 0x5ba   :  { %6770 = vst [vmem:[#allocation32_spill] sm:$0xff] %v5926_v61  ;;  %v5940_v2 = vadd.f32 %v2983_v58, %v2976_v32  ;;  %v2979_v58 = vmul.f32 %v5866_v55, %v2959_v52  ;;  %v2960_v4 = vmax.f32 %v2951_v20, 0.0 }
 0x5bc   :  { %3063 = vrot.lane.b32.xlu0 %v5878_v31, %s3735_s9  ;;  %3315 = vrot.lane.b32.xlu1 %v5878_v31, %s3730_s19  ;;  %6771 = vst [vmem:[#allocation53_spill] sm:$0xff] %v5940_v2  ;;  %v5960_v40 = vadd.f32 %v5889_v10, %v2979_v58  ;;  %v2980_v34 = vmul.f32 %v5866_v55, %v2960_v4 }
 0x5be   :  { %v5984_v36 = vadd.f32 %v5889_v10, %v2980_v34 }
 0x5c0   :  { %3265 = vrot.lane.b32.xlu1 %v5878_v31, %s3731_s24  ;;  %3271 = vrot.lane.b32.xlu0 %v5896_v41, %s3731_s24 }
 0x5c4   :  { %3215 = vrot.lane.b32.xlu1 %v5878_v31, %s3732_s7  ;;  %3221 = vrot.lane.b32.xlu0 %v5896_v41, %s3732_s7 }
 0x5c8   :  { %3167 = vrot.lane.b32.xlu1 %v5896_v41, %s3733_s0  ;;  %3169 = vrot.lane.b32.xlu0 %v5908_v33, %s3733_s0 }
 0x5cc   :  { %3117 = vrot.lane.b32.xlu1 %v5896_v41, %s3734_s8  ;;  %3119 = vrot.lane.b32.xlu0 %v5908_v33, %s3734_s8 }
 0x5d0   :  { %3067 = vrot.lane.b32.xlu1 %v5896_v41, %s3735_s9  ;;  %3069 = vrot.lane.b32.xlu0 %v5908_v33, %s3735_s9 }
 0x5d4   :  { %3017 = vrot.lane.b32.xlu1 %v5896_v41, %s3736_s10  ;;  %3019 = vrot.lane.b32.xlu0 %v5908_v33, %s3736_s10 }
 0x5d8   :  { %3273 = vrot.lane.b32.xlu1 %v5908_v33, %s3731_s24  ;;  %3317 = vrot.lane.b32.xlu0 %v5926_v61, %s3730_s19 }
 0x5dc   :  { %3223 = vrot.lane.b32.xlu1 %v5908_v33, %s3732_s7  ;;  %3267 = vrot.lane.b32.xlu0 %v5926_v61, %s3731_s24 }
 0x5e0   :  { %3165 = vrot.lane.b32.xlu1 %v5926_v61, %s3733_s0  ;;  %3217 = vrot.lane.b32.xlu0 %v5926_v61, %s3732_s7 }
 0x5e4   :  { %3115 = vrot.lane.b32.xlu1 %v5926_v61, %s3734_s8  ;;  %3155 = vrot.lane.b32.xlu0 %v5940_v2, %s3733_s0 }
 0x5e8   :  { %3065 = vrot.lane.b32.xlu1 %v5926_v61, %s3735_s9  ;;  %3105 = vrot.lane.b32.xlu0 %v5940_v2, %s3734_s8 }
 0x5ec   :  { %3319 = vrot.lane.b32.xlu1 %v5940_v2, %s3730_s19  ;;  %3055 = vrot.lane.b32.xlu0 %v5940_v2, %s3735_s9 }
 0x5f0   :  { %3269 = vrot.lane.b32.xlu1 %v5940_v2, %s3731_s24  ;;  %2999 = vrot.lane.b32.xlu0 %v5940_v2, %s3736_s10 }
 0x5f4   :  { %3219 = vrot.lane.b32.xlu1 %v5940_v2, %s3732_s7  ;;  %3275 = vrot.lane.b32.xlu0 %v5960_v40, %s3731_s24 }
 0x5f8   :  { %3171 = vrot.lane.b32.xlu1 %v5960_v40, %s3733_s0  ;;  %3225 = vrot.lane.b32.xlu0 %v5960_v40, %s3732_s7 }
 0x5fc   :  { %3121 = vrot.lane.b32.xlu1 %v5960_v40, %s3734_s8  ;;  %3013 = vrot.lane.b32.xlu0 %v5878_v31, %s3736_s10 }
 0x600   :  { %3071 = vrot.lane.b32.xlu1 %v5960_v40, %s3735_s9  ;;  %3371 = vrot.lane.b32.xlu0 %v5896_v41, %s3737_s11 }
 0x604   :  { %3021 = vrot.lane.b32.xlu1 %v5960_v40, %s3736_s10  ;;  %3375 = vrot.lane.b32.xlu0 %v5960_v40, %s3737_s11 }
 0x608   :  { %3277 = vrot.lane.b32.xlu1 %v5984_v36, %s3731_s24  ;;  %3363 = vrot.lane.b32.xlu0 %v5868_v7, %s3737_s11 }
 0x60c   :  { %3227 = vrot.lane.b32.xlu1 %v5984_v36, %s3732_s7  ;;  %3157 = vrot.lane.b32.xlu0 %v5984_v36, %s3733_s0 }
 0x610   :  { %3011 = vrot.lane.b32.xlu1 %v5868_v7, %s3736_s10  ;;  %3107 = vrot.lane.b32.xlu0 %v5984_v36, %s3734_s8 }
 0x614   :  { %3015 = vrot.lane.b32.xlu1 %v5926_v61, %s3736_s10  ;;  %3057 = vrot.lane.b32.xlu0 %v5984_v36, %s3735_s9 }
 0x618   :  { %3373 = vrot.lane.b32.xlu1 %v5908_v33, %s3737_s11  ;;  %3001 = vrot.lane.b32.xlu0 %v5984_v36, %s3736_s10 }
 0x61c   :  { %3365 = vrot.lane.b32.xlu1 %v5878_v31, %s3737_s11  ;;  %3367 = vrot.lane.b32.xlu0 %v5926_v61, %s3737_s11 }
 0x61e   :  { %v3314_v55 = vpop.permute.xlu1 %3313  ;;  %v6010_v43 = vpop.permute.xlu0 %3263 }
 0x620   :  { %3369 = vrot.lane.b32.xlu1 %v5940_v2, %s3737_s11  ;;  %3321 = vrot.lane.b32.xlu0 %v5896_v41, %s3730_s19 }
 0x622   :  { %v6021_v15 = vpop.permute.xlu1 %3161  ;;  %v6023_v10 = vpop.permute.xlu0 %3213 }
 0x624   :  { %3323 = vrot.lane.b32.xlu1 %v5908_v33, %s3730_s19  ;;  %3325 = vrot.lane.b32.xlu0 %v5960_v40, %s3730_s19 }
 0x626   :  { %v6029_v39 = vpop.permute.xlu1 %3111  ;;  %v6031_v26 = vpop.permute.xlu0 %3163 }
 0x627   :  { %v6036_v14 = vsel %vm264_vm4, %v6021_v15, %v6031_v26 }
 0x628   :  { %3377 = vrot.lane.b32.xlu1 %v5984_v36, %s3737_s11  ;;  %3643 = vperm.xlu0 %3720, %v3727_v25  }
 0x62a   :  { %v6043_v62 = vpop.permute.xlu1 %3061  ;;  %v6045_v5 = vpop.permute.xlu0 %3113 }
 0x62b   :  { %6772 = vst [vmem:[#allocation51_spill] sm:$0xff] %v6045_v5  ;;  %v6050_v54 = vsel %vm197_vm5, %v6029_v39, %v6045_v5 }
 0x62c   :  { %3327 = vrot.lane.b32.xlu1 %v5984_v36, %s3730_s19  ;;  %3722 = vset.pattern.permute.xlu0 %v3747_v51 }
 0x62e   :  { %v3316_v60 = vpop.permute.xlu1 %3315  ;;  %v6054_v8 = vpop.permute.xlu0 %3063 }
 0x62f   :  { %6773 = vst [vmem:[#allocation26_spill] sm:$0xff] %v6054_v8  ;;  %v6059_v32 = vsel %vm130_vm6, %v6043_v62, %v6054_v8  ;;  %v3329_v51 = vsel %vm471_vm1, %v3314_v55, %v3316_v60 }
 0x630   :  { %3651 = vperm.xlu1 %3721, %v3727_v25   ;;  %v3347_v12 = vmul.f32 %v3329_v51, %v6597_v28 }
 0x632   :  { %v3266_v45 = vpop.permute.xlu1 %3265  ;;  %v6061_v29 = vpop.permute.xlu0 %3271 }
 0x636   :  { %v3216_v9 = vpop.permute.xlu1 %3215  ;;  %v6063_v52 = vpop.permute.xlu0 %3221 }
 0x63a   :  { %v6065_v58 = vpop.permute.xlu1 %3167  ;;  %v6067_v59 = vpop.permute.xlu0 %3169 }
 0x63e   :  { %v6069_v46 = vpop.permute.xlu1 %3117  ;;  %v6071_v20 = vpop.permute.xlu0 %3119 }
 0x642   :  { %v6073_v4 = vpop.permute.xlu1 %3067  ;;  %v6075_v34 = vpop.permute.xlu0 %3069 }
 0x646   :  { %v6077_v18 = vpop.permute.xlu1 %3017  ;;  %v6079_v27 = vpop.permute.xlu0 %3019 }
 0x64a   :  { %v3274_v25 = vpop.permute.xlu1 %3273  ;;  %v3318_v21 = vpop.permute.xlu0 %3317 }
 0x64b   :  { %v3330_v11 = vsel %vm471_vm1, %v3316_v60, %v3318_v21 }
 0x64c   :  { %v3348_v1 = vmul.f32 %v3330_v11, %v6596_v44 }
 0x64e   :  { %v3224_v37 = vpop.permute.xlu1 %3223  ;;  %3494 = vmatprep.subr.mxu0 %v3348_v1  ;;  %v6085_v19 = vpop.permute.xlu0 %3267 }
 0x64f   :  { %3495 = vmatpush1.msra.mxu0 %v3347_v12 }
 0x652   :  { %v6087_v42 = vpop.permute.xlu1 %3165  ;;  %v6089_v8 = vpop.permute.xlu0 %3217 }
 0x656   :  { %v6091_v57 = vpop.permute.xlu1 %3115  ;;  %v6093_v49 = vpop.permute.xlu0 %3155 }
 0x65a   :  { %v6095_v3 = vpop.permute.xlu1 %3065  ;;  %v6097_v60 = vpop.permute.xlu0 %3105 }
 0x65b   :  { %6774 = vst [vmem:[#allocation85_spill] sm:$0xff] %v6095_v3  ;;  %v3282_v3 = vsel %vm404_vm2, %v6061_v29, %v3274_v25 }
 0x65e   :  { %v3320_v11 = vpop.permute.xlu1 %3319  ;;  %v6099_v44 = vpop.permute.xlu0 %3055 }
 0x65f   :  { %v3331_v1 = vsel %vm471_vm1, %v3318_v21, %v3320_v11  ;;  %v3345_v51 = vsel %vm471_vm1, %v3320_v11, %v3314_v55  ;;  %v3280_v21 = vsel %vm404_vm2, %v3266_v45, %v6085_v19  ;;  %v3279_v11 = vsel %vm404_vm2, %v6010_v43, %v3266_v45 }
 0x660   :  { %v3349_v12 = vmul.f32 %v3331_v1, %v6726_v53  ;;  %v3350_v28 = vmul.f32 %v3345_v51, %v6728_v50  ;;  %v3301_v1 = vmul.f32 %v3282_v3, %v6723_v47  ;;  %v3232_v51 = vsel %vm337_vm3, %v6063_v52, %v3224_v37 }
 0x661   :  { %v3229_v3 = vsel %vm337_vm3, %v6023_v10, %v3216_v9 }
 0x662   :  { %3565 = vmatprep.subr.mxu1 %v3350_v28  ;;  %v3270_v61 = vpop.permute.xlu1 %3269  ;;  %v6105_v2 = vpop.permute.xlu0 %2999 }
 0x663   :  { %6775 = vst [vmem:[#allocation75_spill] sm:$0xff] %v6105_v2  ;;  %3566 = vmatpush1.msra.mxu1 %v3349_v12  ;;  %v3298_v12 = vmul.f32 %v3280_v21, %v6674_v16  ;;  %v3297_v2 = vmul.f32 %v3279_v11, %v6723_v47  ;;  %v3247_v11 = vmul.f32 %v3229_v3, %v6732_v24 }
 0x664   :  { %v3187_v3 = vsel %vm264_vm4, %v6093_v49, %v6021_v15 }
 0x666   :  { %v6109_v63 = vpop.permute.xlu1 %3219  ;;  %v3276_v5 = vpop.permute.xlu0 %3275 }
 0x667   :  { %v3283_v55 = vsel %vm404_vm2, %v3274_v25, %v3276_v5  ;;  %v3230_v25 = vsel %vm337_vm3, %v3216_v9, %v6089_v8  ;;  %v3245_v15 = vsel %vm337_vm3, %v6109_v63, %v6023_v10 }
 0x668   :  { %v3302_v28 = vmul.f32 %v3283_v55, %v6674_v16  ;;  %v3251_v16 = vmul.f32 %v3232_v51, %v6732_v24  ;;  %v3248_v21 = vmul.f32 %v3230_v25, %v6731_v13 }
 0x66a   :  { %v6121_v50 = vpop.permute.xlu1 %3171  ;;  %3496 = vmatprep.subr.mxu0 %v3302_v28  ;;  %v3226_v53 = vpop.permute.xlu0 %3225 }
 0x66b   :  { %v3233_v45 = vsel %vm337_vm3, %v3224_v37, %v3226_v53  ;;  %3497 = vmatpush1.msra.mxu0 %v3301_v1  ;;  %v3176_v37 = vsel %vm264_vm4, %v6065_v58, %v6067_v59 }
 0x66c   :  { %v3252_v55 = vmul.f32 %v3233_v45, %v6731_v13  ;;  %3498 = vmatprep.subr.mxu0 %v3298_v12  ;;  %v3194_v13 = vmul.f32 %v3176_v37, %v6746_v48  ;;  %v3189_v37 = vmul.f32 %v3187_v3, %v6748_v35  ;;  %v3177_v3 = vsel %vm264_vm4, %v6067_v59, %v6121_v50 }
 0x66d   :  { %3499 = vmatpush1.msra.mxu0 %v3297_v2 }
 0x66e   :  { %v6132_v28 = vpop.permute.xlu1 %3121  ;;  %3500 = vmatprep.subr.mxu0 %v3252_v55  ;;  %v6134_v47 = vpop.permute.xlu0 %3013 }
 0x66f   :  { %3501 = vmatpush1.msra.mxu0 %v3251_v16 }
 0x670   :  { %3502 = vmatprep.subr.mxu0 %v3248_v21 }
 0x671   :  { %3503 = vmatpush1.msra.mxu0 %v3247_v11 }
 0x672   :  { %v6140_v9 = vpop.permute.xlu1 %3071  ;;  %3504 = vmatprep.subr.mxu0 %v5908_v33  ;;  %v6143_v2 = vpop.permute.xlu0 %3371  ;;  %v3295_v33 = vsel %vm404_vm2, %v3270_v61, %v6010_v43 }
 0x673   :  { %3505 = vmatpush1.msra.mxu0 %v5896_v41  ;;  %v3300_v55 = vmul.f32 %v3295_v33, %v6735_v22  ;;  %v3137_v33 = vsel %vm197_vm5, %v6097_v60, %v6029_v39  ;;  %v3090_v39 = vmul.f32 %v6059_v32, %v6577_v38 }
 0x674   :  { %3506 = vmatprep.subr.mxu0 %v5878_v31  ;;  %v3281_v31 = vsel %vm404_vm2, %v6085_v19, %v3270_v61 }
 0x675   :  { %3507 = vmatpush1.msra.mxu0 %v5868_v7 }
 0x676   :  { %v6149_v24 = vpop.permute.xlu1 %3021  ;;  %3508 = vmatprep.subr.mxu0 %v3194_v13  ;;  %v6151_v1 = vpop.permute.xlu0 %3375  ;;  %v3250_v13 = vmul.f32 %v3245_v15, %v6740_v30 }
 0x67a   :  { %v3278_v51 = vpop.permute.xlu1 %3277  ;;  %v6153_v12 = vpop.permute.xlu0 %3363 }
 0x67b   :  { %v3284_v25 = vsel %vm404_vm2, %v3276_v5, %v3278_v51  ;;  %v3296_v41 = vsel %vm404_vm2, %v3278_v51, %v6061_v29  ;;  %v3299_v5 = vmul.f32 %v3281_v31, %v6734_v17  ;;  %v3174_v31 = vsel %vm264_vm4, %v6031_v26, %v6087_v42 }
 0x67c   :  { %v3303_v7 = vmul.f32 %v3284_v25, %v6734_v17  ;;  %v3304_v45 = vmul.f32 %v3296_v41, %v6735_v22  ;;  %v3126_v17 = vsel %vm197_vm5, %v6069_v46, %v6071_v20  ;;  %v3175_v26 = vsel %vm264_vm4, %v6087_v42, %v6093_v49 }
 0x67e   :  { %v3228_v16 = vpop.permute.xlu1 %3227  ;;  %3567 = vmatprep.subr.mxu1 %v3304_v45  ;;  %v3158_v43 = vpop.permute.xlu0 %3157 }
 0x67f   :  { %v3234_v29 = vsel %vm337_vm3, %v3226_v53, %v3228_v16  ;;  %v3246_v19 = vsel %vm337_vm3, %v3228_v16, %v6063_v52  ;;  %v3188_v61 = vsel %vm264_vm4, %v3158_v43, %v6065_v58  ;;  %3568 = vmatpush1.msra.mxu1 %v3303_v7  ;;  %v3190_v53 = vmul.f32 %v6036_v14, %v6746_v48  ;;  %v6776_v14 = vld [vmem:[#allocation18_spill] sm:$0xff] }
 0x680   :  { %v3253_v22 = vmul.f32 %v3234_v29, %v6742_v56  ;;  %v3254_v21 = vmul.f32 %v3246_v19, %v6740_v30  ;;  %v3193_v11 = vmul.f32 %v3188_v61, %v6748_v35  ;;  %3569 = vmatprep.subr.mxu1 %v3300_v55  ;;  %v3231_v52 = vsel %vm337_vm3, %v6089_v8, %v6109_v63  ;;  %v6777_v8 = vld [vmem:[#allocation19_spill] sm:$0xff]  ;;  %v6781_v19 = vld [vmem:[#allocation32_spill] sm:$0xff] }
 0x681   :  { %3570 = vmatpush1.msra.mxu1 %v3299_v5  ;;  %v3144_v51 = vmul.f32 %v3126_v17, %v6776_v14  ;;  %v3249_v63 = vmul.f32 %v3231_v52, %v6742_v56  ;;  %v3076_v35 = vsel %vm130_vm6, %v6073_v4, %v6075_v34  ;;  %v3026_v30 = vsel %vm63_vm7, %v6077_v18, %v6079_v27  ;;  %v6780_v5 = vld [vmem:[#allocation53_spill] sm:$0xff] }
 0x682   :  { %v3012_v10 = vpop.permute.xlu1 %3011  ;;  %3509 = vmatpush1.msra.mxu0 %v3193_v11  ;;  %3571 = vmatprep.subr.mxu1 %v3254_v21  ;;  %v3108_v58 = vpop.permute.xlu0 %3107  ;;  %v3139_v7 = vmul.f32 %v3137_v33, %v6777_v8  ;;  %v3178_v45 = vsel %vm264_vm4, %v6121_v50, %v3158_v43  ;;  %v3044_v32 = vmul.f32 %v3026_v30, %v6682_v6  ;;  %v6778_v50 = vld [vmem:[#allocation51_spill] sm:$0xff]  ;;  %v6784_v17 = vld [vmem:[#allocation21_spill] sm:$0xff] }
 0x683   :  { %v3138_v48 = vsel %vm197_vm5, %v3108_v58, %v6069_v46  ;;  %3510 = vmatprep.subr.mxu0 %v3190_v53  ;;  %3572 = vmatpush1.msra.mxu1 %v3253_v22  ;;  %v3140_v46 = vmul.f32 %v6050_v54, %v6776_v14  ;;  %v3094_v54 = vmul.f32 %v3076_v35, %v6577_v38  ;;  %v6782_v21 = vld [vmem:[#allocation75_spill] sm:$0xff]  ;;  %v6786_v33 = vld [vmem:[#allocation85_spill] sm:$0xff]  ;;  %v6789_v35 = vld [vmem:[#allocation24_spill] sm:$0xff] }
 0x684   :  { %v3143_v25 = vmul.f32 %v3138_v48, %v6777_v8  ;;  %3511 = vmatpush1.msra.mxu0 %v3189_v37  ;;  %3573 = vmatprep.subr.mxu1 %v3250_v13  ;;  %v3191_v16 = vmul.f32 %v3174_v31, %v4084_v0  ;;  %v3124_v59 = vsel %vm197_vm5, %v6778_v50, %v6091_v57  ;;  %v6783_v11 = vld [vmem:[#allocation27_spill] sm:$0xff]  ;;  %v6788_v8 = vld [vmem:[#allocation25_spill] sm:$0xff] }
 0x685   :  { %3512 = vmatprep.subr.mxu0 %v3144_v51  ;;  %3574 = vmatpush1.msra.mxu1 %v3249_v63  ;;  %v3128_v29 = vsel %vm197_vm5, %v6132_v28, %v3108_v58  ;;  %v3023_v22 = vsel %vm63_vm7, %v3012_v10, %v6134_v47  ;;  %v6785_v58 = vld [vmem:[#allocation20_spill] sm:$0xff]  ;;  %v6787_v63 = vld [vmem:[#allocation26_spill] sm:$0xff] }
 0x686   :  { %v6208_v56 = vpop.permute.xlu1 %3015  ;;  %v3058_v41 = vpop.permute.xlu0 %3057  ;;  %3513 = vmatpush1.msra.mxu0 %v3143_v25  ;;  %3575 = vmatprep.subr.mxu1 %v5984_v36  ;;  %v3087_v36 = vsel %vm130_vm6, %v6099_v44, %v6043_v62  ;;  %v3195_v62 = vmul.f32 %v3177_v3, %v4084_v0  ;;  %v3146_v37 = vmul.f32 %v3128_v29, %v6785_v58  ;;  %v6793_v29 = vld [vmem:[#allocation4_spill] sm:$0xff] }
 0x687   :  { %v3088_v55 = vsel %vm130_vm6, %v3058_v41, %v6073_v4  ;;  %3514 = vmatprep.subr.mxu0 %v3140_v46  ;;  %3576 = vmatpush1.msra.mxu1 %v5960_v40  ;;  %v6779_v4 = vld [vmem:[#allocation17_spill] sm:$0xff]  ;;  %v3127_v40 = vsel %vm197_vm5, %v6071_v20, %v6132_v28  ;;  %v3089_v15 = vmul.f32 %v3087_v36, %v6576_v23 }
 0x688   :  { %v3093_v38 = vmul.f32 %v3088_v55, %v6576_v23  ;;  %3515 = vmatpush1.msra.mxu0 %v3139_v7  ;;  %v3196_v43 = vmul.f32 %v3178_v45, %v6779_v4  ;;  %3577 = vmatprep.subr.mxu1 %v6780_v5  ;;  %v3192_v61 = vmul.f32 %v3175_v26, %v6779_v4  ;;  %v3729_v55 = vld [vmem:[%s6349_s1 + $0x20] ss:$0 sm:$0xff]  ;;  %v6792_v5 = vld [vmem:[#allocation29_spill] sm:$0xff] }
 0x689   :  { %3516 = vmatprep.subr.mxu0 %v3094_v54  ;;  %3578 = vmatpush1.msra.mxu1 %v6781_v19  ;;  %v3125_v20 = vsel %vm197_vm5, %v6091_v57, %v6097_v60  ;;  %v3037_v28 = vsel %vm63_vm7, %v6782_v21, %v3012_v10  ;;  %v3141_v23 = vmul.f32 %v3124_v59, %v6784_v17  ;;  %v6790_v54 = vmov 1.0  }
 0x68a   :  { %v3374_v49 = vpop.permute.xlu1 %3373  ;;  %v3002_v42 = vpop.permute.xlu0 %3001  ;;  %3517 = vmatpush1.msra.mxu0 %v3093_v38  ;;  %3579 = vmatprep.subr.mxu1 %v3196_v43  ;;  %v3145_v52 = vmul.f32 %v3127_v40, %v6784_v17  ;;  %v3077_v57 = vsel %vm130_vm6, %v6075_v34, %v6140_v9  ;;  %v3040_v60 = vmul.f32 %v3023_v22, %v6682_v6  ;;  %v6796_v17 = vld [vmem:[#allocation45_spill] sm:$0xff] }
 0x68b   :  { %v3038_v0 = vsel %vm63_vm7, %v3002_v42, %v6077_v18  ;;  %3518 = vmatprep.subr.mxu0 %v3090_v39  ;;  %3580 = vmatpush1.msra.mxu1 %v3195_v62  ;;  %v3078_v10 = vsel %vm130_vm6, %v6140_v9, %v3058_v41  ;;  %v3142_v48 = vmul.f32 %v3125_v20, %v6785_v58 }
 0x68c   :  { %v3043_v53 = vmul.f32 %v3038_v0, %v6783_v11  ;;  %3519 = vmatpush1.msra.mxu0 %v3089_v15  ;;  %3581 = vmatprep.subr.mxu1 %v3192_v61  ;;  %v3039_v14 = vmul.f32 %v3037_v28, %v6783_v11  ;;  %v3383_v51 = vsel %vm538_vm8, %v3374_v49, %v6151_v1  ;;  %v3413_v15 = vld [vmem:[%s6350_s2 + $0x38] sm:$0xff] }
 0x68d   :  { %3520 = vmatprep.subr.mxu0 %v3044_v32  ;;  %3582 = vmatpush1.msra.mxu1 %v3191_v16  ;;  %v3074_v34 = vsel %vm130_vm6, %v6787_v63, %v6786_v33  ;;  %v3075_v6 = vsel %vm130_vm6, %v6786_v33, %v6099_v44  ;;  %v3382_v9 = vsel %vm538_vm8, %v6143_v2, %v3374_v49  ;;  %v3728_v44 = vld [vmem:[%s6349_s1 + $0x28] ss:$0 sm:$0xff]  ;;  %v6795_v11 = vld [vmem:[#allocation50_spill] sm:$0xff] }
 0x68e   :  { %v3366_v18 = vpop.permute.xlu1 %3365  ;;  %v6260_v13 = vpop.permute.xlu0 %3367  ;;  %3521 = vmatpush1.msra.mxu0 %v3043_v53  ;;  %3583 = vmatprep.subr.mxu1 %v3146_v37  ;;  %v3095_v25 = vmul.f32 %v3077_v57, %v6788_v8  ;;  %v3096_v30 = vmul.f32 %v3078_v10, %v6789_v35  ;;  %v3402_v31 = vmul.f32 %v3728_v44, %v3383_v51  ;;  %v6797_v37 = vld [vmem:[#allocation7_spill] sm:$0xff] }
 0x68f   :  { %3522 = vmatprep.subr.mxu0 %v3040_v60  ;;  %3584 = vmatpush1.msra.mxu1 %v3145_v52  ;;  %v3380_v46 = vsel %vm538_vm8, %v3366_v18, %v6260_v13  ;;  %v3028_v7 = vsel %vm63_vm7, %v6149_v24, %v3002_v42  ;;  %v3379_v45 = vsel %vm538_vm8, %v6153_v12, %v3366_v18 }
 0x690   :  { %3523 = vmatpush1.msra.mxu0 %v3039_v14  ;;  %3585 = vmatprep.subr.mxu1 %v3142_v48  ;;  %v3092_v32 = vmul.f32 %v3075_v6, %v6789_v35  ;;  %v3027_v3 = vsel %vm63_vm7, %v6079_v27, %v6149_v24  ;;  %v3401_v26 = vmul.f32 %v3729_v55, %v3382_v9  ;;  %v6791_v24 = vld [vmem:[#allocation28_spill] sm:$0xff] }
 0x691   :  { %3524 = vmatprep.subr.mxu0 %v6790_v54  ;;  %3586 = vmatpush1.msra.mxu1 %v3141_v23  ;;  %v3091_v36 = vmul.f32 %v3074_v34, %v6788_v8  ;;  %v3025_v38 = vsel %vm63_vm7, %v6208_v56, %v6782_v21  ;;  %v3398_v16 = vmul.f32 %v3728_v44, %v3380_v46 }
 0x692   :  { %v3370_v39 = vpop.permute.xlu1 %3369  ;;  %v3322_v41 = vpop.permute.xlu0 %3321  ;;  %3525 = vmatpush1.msra.mxu0 %v6790_v54  ;;  %3587 = vmatprep.subr.mxu1 %v3096_v30  ;;  %v3024_v27 = vsel %vm63_vm7, %v6134_v47, %v6208_v56  ;;  %v3046_v50 = vmul.f32 %v3028_v7, %v6791_v24  ;;  %v3397_v59 = vmul.f32 %v3729_v55, %v3379_v45  ;;  %v6794_v47 = vld [vmem:[#allocation3_spill] sm:$0xff] }
 0x693   :  { %3552 = vmatprep.subr.mxu0 %v3402_v31  ;;  %3588 = vmatpush1.msra.mxu1 %v3095_v25  ;;  %v3045_v49 = vmul.f32 %v3027_v3, %v6792_v5  ;;  %v3042_v40 = vmul.f32 %v3025_v38, %v6791_v24  ;;  %v3041_v61 = vmul.f32 %v3024_v27, %v6792_v5 }
 0x694   :  { %3553 = vmatpush2.msra.mxu0 %v3401_v26  ;;  %3589 = vmatprep.subr.mxu1 %v3092_v32  ;;  %v3395_v0 = vsel %vm538_vm8, %v3370_v39, %v6153_v12  ;;  %v3381_v28 = vsel %vm538_vm8, %v6260_v13, %v3370_v39  ;;  %v6798_v13 = vld [vmem:[#allocation6_spill] sm:$0xff] }
 0x695   :  { %3554 = vmatprep.subr.mxu0 %v3398_v16  ;;  %3590 = vmatpush1.msra.mxu1 %v3091_v36  ;;  %v3400_v12 = vmul.f32 %v6796_v17, %v3395_v0 }
 0x696   :  { %v3324_v4 = vpop.permute.xlu1 %3323  ;;  %v3326_v43 = vpop.permute.xlu0 %3325  ;;  %3555 = vmatpush2.msra.mxu0 %v3397_v59  ;;  %3591 = vmatprep.subr.mxu1 %v3046_v50 }
 0x697   :  { %v3332_v42 = vsel %vm471_vm1, %v3322_v41, %v3324_v4  ;;  %v3333_v62 = vsel %vm471_vm1, %v3324_v4, %v3326_v43  ;;  %3592 = vmatpush1.msra.mxu1 %v3045_v49 }
 0x698   :  { %v3351_v19 = vmul.f32 %v3332_v42, %v6793_v29  ;;  %v3352_v56 = vmul.f32 %v3333_v62, %v6794_v47  ;;  %3593 = vmatprep.subr.mxu1 %v3042_v40 }
 0x699   :  { %3594 = vmatpush1.msra.mxu1 %v3041_v61 }
 0x69a   :  { %v3378_v22 = vpop.permute.xlu1 %3377  ;;  %3556 = vmatprep.subr.mxu0 %v3352_v56  ;;  %3595 = vmatprep.subr.mxu1 %v6790_v54 }
 0x69b   :  { %v3384_v20 = vsel %vm538_vm8, %v6151_v1, %v3378_v22  ;;  %v3396_v21 = vsel %vm538_vm8, %v3378_v22, %v6143_v2  ;;  %3557 = vmatpush2.msra.mxu0 %v3351_v19  ;;  %3596 = vmatpush1.msra.mxu1 %v6790_v54  ;;  %v3399_v1 = vmul.f32 %v6795_v11, %v3381_v28 }
 0x69c   :  { %v3403_v53 = vmul.f32 %v6795_v11, %v3384_v20  ;;  %v3404_v23 = vmul.f32 %v6796_v17, %v3396_v21  ;;  %3559 = vmatmul.mubr.f32.vlgmr.msra.gmra.mxu0 %v3413_v15 }
 0x69e   :  { %v3328_v52 = vpop.permute.xlu1 %3327  ;;  %3623 = vmatprep.subr.mxu1 %v3404_v23 }
 0x69f   :  { %v3334_v2 = vsel %vm471_vm1, %v3326_v43, %v3328_v52  ;;  %v3346_v58 = vsel %vm471_vm1, %v3328_v52, %v3322_v41  ;;  %3624 = vmatpush2.msra.mxu1 %v3403_v53 }
 0x6a0   :  { %v3353_v18 = vmul.f32 %v3334_v2, %v6797_v37  ;;  %v3354_v57 = vmul.f32 %v3346_v58, %v6798_v13  ;;  %3625 = vmatprep.subr.mxu1 %v3400_v12 }
 0x6a1   :  { %3626 = vmatpush2.msra.mxu1 %v3399_v1 }
 0x6a2   :  { %3627 = vmatprep.subr.mxu1 %v3354_v57 }
 0x6a3   :  { %3628 = vmatpush2.msra.mxu1 %v3353_v18  ;;  %v3644_v10 = vpop.permute.xlu0 %3643 }
 0x6a4   :  { %3630 = vmatmul.mubr.f32.vlgmr.msra.gmra.mxu1 %v3413_v15 }
 0x6ab   :  { %v3652_v51 = vpop.permute.xlu1 %3651 }
 0x75c   :  { %v3560_v60 = vpop.f32.mrf.mxu0 }
 0x75d   :  { %v3636_v48 = vmax.f32 %v3560_v60, 0.0 }
 0x75e   :  { %v3562_v14 = vpop.f32.mrf.mxu0 }
 0x75f   :  { %v3637_v33 = vmax.f32 %v3562_v14, 0.0  ;;  %v3646_v63 = vmul.f32 %v3644_v10, %v3636_v48 }
 0x761   :  { %v3647_v34 = vmul.f32 %v3644_v10, %v3637_v33  ;;  %v3654_v6 = vadd.f32 %v3652_v51, %v3646_v63 }
 0x763   :  { %v3655_v9 = vadd.f32 %v3652_v51, %v3647_v34  ;;  %3658 = vst [vmem:[%s6352_s4] sm:$0xff] %v3654_v6 }
 0x764   :  { %v3631_v8 = vpop.f32.mrf.mxu1 }
 0x765   :  { %v3638_v25 = vmax.f32 %v3631_v8, 0.0  ;;  %3659 = vst [vmem:[%s6352_s4 + $0x8] sm:$0xff] %v3655_v9 }
 0x766   :  { %v3633_v35 = vpop.f32.mrf.mxu1 }
 0x767   :  { %v3639_v30 = vmax.f32 %v3633_v35, 0.0  ;;  %v3648_v46 = vmul.f32 %v3644_v10, %v3638_v25 }
 0x769   :  { %v3649_v39 = vmul.f32 %v3644_v10, %v3639_v30  ;;  %v3656_v41 = vadd.f32 %v3652_v51, %v3648_v46 }
 0x76b   :  { %v3657_v44 = vadd.f32 %v3652_v51, %v3649_v39  ;;  %3660 = vst [vmem:[%s6352_s4 + $0x10] sm:$0xff] %v3656_v41 }
 0x76d   :  { %3661 = vst [vmem:[%s6352_s4 + $0x18] sm:$0xff] %v3657_v44 }

</bundles_post_ra>
